<compile_context>
chip_gen: v5e
topology: v5e:2x2
jax: 0.10.0
libtpu: 0.0.40
codegen_flags: <defaults>
</compile_context>

<pallas_src>
import functools

import jax
import jax.numpy as jnp
from jax import lax
from jax.experimental import pallas as pl
from jax.experimental.pallas import tpu as pltpu

# ---- hyperparameters (stand-ins for args.*) --------------------------------
IN_SIZE = 28          # args.in_size  (== self.input_size == self.stride)
CFG_FC = (32, 32, 32) # args.fc
OUT_SIZE = 10         # args.out_size
THRESH = 0.5          # args.thresh
DECAY = 0.2           # args.decay
TOTAL_PIXELS = 784    # hard-coded in the PyTorch forward
TIME_WINDOW = TOTAL_PIXELS // IN_SIZE


def _round_up(x, m):
    return (x + m - 1) // m * m


# ---- Pallas kernel ----------------------------------------------------------
def _ffsnn_kernel(x_ref, w1_ref, b1_ref, w2_ref, b2_ref, w3_ref, b3_ref,
                  w4_ref, b4_ref, out_ref,
                  *, decay, thresh, time_window, compute_dtype):
    """All tensors are batch-in-lanes: x (IN, n), state (H, n), out (O, n)."""
    f32 = jnp.float32
    n = x_ref.shape[1]                       # batch tile (lane axis)
    h1, h2, h3 = w1_ref.shape[0], w2_ref.shape[0], w3_ref.shape[0]
    o = w4_ref.shape[0]

    # ---- hoist parameter loads + (small, lane-dense) bias broadcasts --------
    # (JAX does not CSE broadcast_in_dim; re-reading refs per step would
    # re-issue the VMEM loads 28x.)  Each (32, n) f32 broadcast is 4 vregs at
    # n = 128 — cheap to hold live across the unrolled loop in this layout.
    w2 = w2_ref[...].astype(compute_dtype)           # (h2, h1)
    w3 = w3_ref[...].astype(compute_dtype)           # (h3, h2)
    w4 = w4_ref[...].astype(compute_dtype)           # (o,  h3)
    b2 = jnp.broadcast_to(b2_ref[...], (h2, n))      # (h2, n) f32
    b3 = jnp.broadcast_to(b3_ref[...], (h3, n))      # (h3, n) f32
    # b4 is loop-invariant under the output sum -> applied once in epilogue.

    # fc1 sees the same input slice every step (stride == in_size == 28 makes
    # the PyTorch sliding-window branch unreachable), so its linear response
    # is loop-invariant: one MXU call, reused for all `time_window` steps.
    x = x_ref[...].astype(compute_dtype)              # (IN, n)
    w1 = w1_ref[...].astype(compute_dtype)            # (h1, IN)
    cur1 = (jnp.dot(w1, x, preferred_element_type=f32)
            + jnp.broadcast_to(b1_ref[...], (h1, n)))  # (h1, n) f32

    decay = jnp.float32(decay)
    thresh = jnp.float32(thresh)

    def lif(cur, mem, spk_mask):
        # mem = mem*decay*(1-spk) + cur  ==  where(spk, cur, mem*decay + cur)
        mem = jnp.where(spk_mask, cur, mem * decay + cur)   # f32 VPU
        return mem, mem > thresh

    def step(_, carry):
        m1, k1, m2, k2, m3, k3, acc = carry
        m1, k1 = lif(cur1, m1, k1)
        cur2 = jnp.dot(w2, k1.astype(compute_dtype),
                       preferred_element_type=f32) + b2
        m2, k2 = lif(cur2, m2, k2)
        cur3 = jnp.dot(w3, k2.astype(compute_dtype),
                       preferred_element_type=f32) + b3
        m3, k3 = lif(cur3, m3, k3)
        acc = acc + jnp.dot(w4, k3.astype(compute_dtype),
                            preferred_element_type=f32)
        return m1, k1, m2, k2, m3, k3, acc

    zeros = lambda r: jnp.zeros((r, n), f32)
    false_mask = lambda r: zeros(r) > thresh          # all-False vreg mask
    init = (zeros(h1), false_mask(h1),
            zeros(h2), false_mask(h2),
            zeros(h3), false_mask(h3),
            zeros(o))
    # Fully unrolled in-kernel recurrence: no per-step grid/pipeline overhead,
    # and the LLO scheduler sees the whole straight-line dependence chain (it
    # can overlap the tiny dependent matmuls with the surrounding VPU work).
    *_, acc = lax.fori_loop(0, time_window, step, init, unroll=True)

    # Epilogue: fold in the hoisted fc4 bias and normalize.  (O, n) store is
    # lane-dense -> unmasked vst for n >= 128.
    inv_t = jnp.float32(1.0 / time_window)
    out_ref[...] = (acc * inv_t
                    + jnp.broadcast_to(b4_ref[...], (o, n))).astype(out_ref.dtype)


# ---- wrapper ----------------------------------------------------------------
def ffsnn_v2_forward(x_flat, params, *, batch_tile=128,
                     compute_dtype=jnp.float32):
    """x_flat: (N, 784) float32.

    params: dict of PyTorch-oriented weights (out, in) and column biases
    (out, 1).  Returns (N, OUT_SIZE) float32 (== FFSNN_v2.forward()[0]).
    """
    N = x_flat.shape[0]
    H1, H2, H3 = CFG_FC
    O = OUT_SIZE
    f32 = jnp.float32

    # ---- input slicing (pure glue) ------------------------------------------
    # In the PyTorch forward, `start_idx < time_window - self.input_size` is
    # `start_idx < 0` when stride == in_size == 28, i.e. never true, so EVERY
    # step consumes the identical last-`in_size` pixel slice.  DMA it once,
    # transposed so batch lives on the lane axis.
    assert TIME_WINDOW - IN_SIZE <= 0, "general sliding-window case not wired"
    # TODO(synk): if in_size/stride were chosen so the sliding-window branch is
    # reachable (e.g. in_size=1), pass a stacked (T, in_size, N) resident block
    # and index it per step inside the loop instead.
    x_step = x_flat[:, TOTAL_PIXELS - IN_SIZE:TOTAL_PIXELS].T   # (IN_SIZE, N)

    # ---- batch padding / tiling ----------------------------------------------
    assert batch_tile % 8 == 0
    tile_n = min(batch_tile, _round_up(N, 8))      # lane axis of every tile
    n_pad = _round_up(N, tile_n)
    if n_pad != N:
        x_step = jnp.pad(x_step, ((0, 0), (0, n_pad - N)))
    grid = (n_pad // tile_n,)
    # VMEM/block: tile_n*(28+10)*4B for x/out (double-buffered) + ~20 KB params;
    # state lives in vregs.  Tens of KB total -> irrelevant even on v7x's
    # 64 MiB VMEM; the binding resources are the vreg file and MXU latency.

    w1, b1 = params["w1"], params["b1"]
    w2, b2 = params["w2"], params["b2"]
    w3, b3 = params["w3"], params["b3"]
    w4, b4 = params["w4"], params["b4"]

    full = lambda shape: pl.BlockSpec(shape, lambda b: (0, 0))

    kernel = functools.partial(
        _ffsnn_kernel, decay=DECAY, thresh=THRESH, time_window=TIME_WINDOW,
        compute_dtype=compute_dtype)

    out = pl.pallas_call(
        kernel,
        out_shape=jax.ShapeDtypeStruct((O, n_pad), f32),
        grid_spec=pltpu.PrefetchScalarGridSpec(
            num_scalar_prefetch=0,
            grid=grid,                                          # batch-only grid
            in_specs=[
                pl.BlockSpec((IN_SIZE, tile_n), lambda b: (0, b)),  # x (IN, n)
                full((H1, IN_SIZE)), full((H1, 1)),                 # fc1
                full((H2, H1)), full((H2, 1)),                      # fc2
                full((H3, H2)), full((H3, 1)),                      # fc3
                full((O, H3)), full((O, 1)),                        # fc4
            ],
            out_specs=pl.BlockSpec((O, tile_n), lambda b: (0, b)),
        ),
        compiler_params=pltpu.CompilerParams(
            dimension_semantics=("parallel",)),  # batch tiles -> both v7x TCs
    )(x_step, w1, b1, w2, b2, w3, b3, w4, b4)
    return out[:, :N].T                           # back to (N, O)


# ---- deterministic parameter init (like nn.Linear's default uniform) --------
def init_params(key):
    def linear(key, fan_in, fan_out):
        kw, kb = jax.random.split(key)
        bound = 1.0 / jnp.sqrt(jnp.float32(fan_in))
        # PyTorch orientation: weight (out, in), bias as a column (out, 1).
        w = jax.random.uniform(kw, (fan_out, fan_in), jnp.float32, -bound, bound)
        b = jax.random.uniform(kb, (fan_out, 1), jnp.float32, -bound, bound)
        return w, b

    k1, k2, k3, k4 = jax.random.split(key, 4)
    H1, H2, H3 = CFG_FC
    w1, b1 = linear(k1, IN_SIZE, H1)
    w2, b2 = linear(k2, H1, H2)
    w3, b3 = linear(k3, H2, H3)
    w4, b4 = linear(k4, H3, OUT_SIZE)
    return dict(w1=w1, b1=b1, w2=w2, b2=b2, w3=w3, b3=b3, w4=w4, b4=b4)


# ---- pure-JAX reference (mirrors the PyTorch forward, f32 throughout) -------
def ffsnn_v2_reference(x_flat, params):
    N = x_flat.shape[0]
    H1, H2, H3 = CFG_FC
    m1 = s1 = jnp.zeros((N, H1), jnp.float32)
    m2 = s2 = jnp.zeros((N, H2), jnp.float32)
    m3 = s3 = jnp.zeros((N, H3), jnp.float32)
    out_sum = jnp.zeros((N, OUT_SIZE), jnp.float32)

    def linear(x, w, b):
        # w: (out, in), b: (out, 1)
        return jnp.dot(x, w.T, preferred_element_type=jnp.float32) + b.T

    def upd(x, w, b, mem, spk):
        mem = mem * DECAY * (1.0 - spk) + linear(x, w, b)
        spk = (mem > THRESH).astype(jnp.float32)
        return mem, spk

    for step in range(TIME_WINDOW):
        start_idx = step * IN_SIZE
        if start_idx < TIME_WINDOW - IN_SIZE:   # never true for this config
            x = x_flat[:, start_idx:start_idx + IN_SIZE]
        else:
            x = x_flat[:, TOTAL_PIXELS - IN_SIZE:TOTAL_PIXELS]
        m1, s1 = upd(x, params["w1"], params["b1"], m1, s1)
        m2, s2 = upd(s1, params["w2"], params["b2"], m2, s2)
        m3, s3 = upd(s2, params["w3"], params["b3"], m3, s3)
        out_sum = out_sum + linear(s3, params["w4"], params["b4"])
    return out_sum / TIME_WINDOW


if __name__ == "__main__":
    key = jax.random.PRNGKey(0)
    kx, kp = jax.random.split(key)

    N = 2  # batch
    # pMNIST-style input: (N, 1, 28, 28) -> squeezed & flattened to (N, 784)
    x = jax.random.uniform(kx, (N, 1, 28, 28), jnp.float32)
    x_flat = x.reshape(N, -1)

    params = init_params(kp)

    out = ffsnn_v2_forward(x_flat, params)
    out = jax.block_until_ready(out)

    ref = ffsnn_v2_reference(x_flat, params)
    assert out.shape == (N, OUT_SIZE)
    assert jnp.allclose(out, ref, atol=1e-4, rtol=1e-4), (out, ref)

    print("KERNEL_OK")
</pallas_src>

<mosaic_0001>
module attributes {stable_mosaic.version = 11 : i64} {
  func.func @_ffsnn_kernel(%arg0: i32, %arg1: memref<28x8xf32, #tpu.memory_space<vmem>>, %arg2: memref<32x28xf32, #tpu.memory_space<vmem>>, %arg3: memref<32x1xf32, #tpu.memory_space<vmem>>, %arg4: memref<32x32xf32, #tpu.memory_space<vmem>>, %arg5: memref<32x1xf32, #tpu.memory_space<vmem>>, %arg6: memref<32x32xf32, #tpu.memory_space<vmem>>, %arg7: memref<32x1xf32, #tpu.memory_space<vmem>>, %arg8: memref<10x32xf32, #tpu.memory_space<vmem>>, %arg9: memref<10x1xf32, #tpu.memory_space<vmem>>, %arg10: memref<10x8xf32, #tpu.memory_space<vmem>>) attributes {dimension_semantics = [#tpu.dimension_semantics<parallel>], iteration_bounds = array<i64: 1>, scalar_prefetch = 0 : i64, scratch_operands = 0 : i64, tpu.core_type = #tpu.core_type<tc>, window_params = [{transform_indices = @transform_0, window_bounds = array<i64: 28, 8>}, {pipeline_mode = #tpu.pipeline_mode<synchronous>, transform_indices = @transform_1, window_bounds = array<i64: 32, 28>}, {pipeline_mode = #tpu.pipeline_mode<synchronous>, transform_indices = @transform_2, window_bounds = array<i64: 32, 1>}, {pipeline_mode = #tpu.pipeline_mode<synchronous>, transform_indices = @transform_3, window_bounds = array<i64: 32, 32>}, {pipeline_mode = #tpu.pipeline_mode<synchronous>, transform_indices = @transform_4, window_bounds = array<i64: 32, 1>}, {pipeline_mode = #tpu.pipeline_mode<synchronous>, transform_indices = @transform_5, window_bounds = array<i64: 32, 32>}, {pipeline_mode = #tpu.pipeline_mode<synchronous>, transform_indices = @transform_6, window_bounds = array<i64: 32, 1>}, {pipeline_mode = #tpu.pipeline_mode<synchronous>, transform_indices = @transform_7, window_bounds = array<i64: 10, 32>}, {pipeline_mode = #tpu.pipeline_mode<synchronous>, transform_indices = @transform_8, window_bounds = array<i64: 10, 1>}, {transform_indices = @transform_9, window_bounds = array<i64: 10, 8>}]} {
    %c0 = arith.constant 0 : index
    %c0_0 = arith.constant 0 : index
    %0 = vector.load %arg4[%c0, %c0_0] : memref<32x32xf32, #tpu.memory_space<vmem>>, vector<32x32xf32>
    %c0_1 = arith.constant 0 : index
    %c0_2 = arith.constant 0 : index
    %1 = vector.load %arg6[%c0_1, %c0_2] : memref<32x32xf32, #tpu.memory_space<vmem>>, vector<32x32xf32>
    %c0_3 = arith.constant 0 : index
    %c0_4 = arith.constant 0 : index
    %2 = vector.load %arg8[%c0_3, %c0_4] : memref<10x32xf32, #tpu.memory_space<vmem>>, vector<10x32xf32>
    %c0_5 = arith.constant 0 : index
    %c0_6 = arith.constant 0 : index
    %3 = vector.load %arg5[%c0_5, %c0_6] : memref<32x1xf32, #tpu.memory_space<vmem>>, vector<32x1xf32>
    %4 = vector.shape_cast %3 : vector<32x1xf32> to vector<32x1xf32>
    %5 = vector.broadcast %4 : vector<32x1xf32> to vector<32x8xf32>
    %c0_7 = arith.constant 0 : index
    %c0_8 = arith.constant 0 : index
    %6 = vector.load %arg7[%c0_7, %c0_8] : memref<32x1xf32, #tpu.memory_space<vmem>>, vector<32x1xf32>
    %7 = vector.shape_cast %6 : vector<32x1xf32> to vector<32x1xf32>
    %8 = vector.broadcast %7 : vector<32x1xf32> to vector<32x8xf32>
    %c0_9 = arith.constant 0 : index
    %c0_10 = arith.constant 0 : index
    %9 = vector.load %arg1[%c0_9, %c0_10] : memref<28x8xf32, #tpu.memory_space<vmem>>, vector<28x8xf32>
    %c0_11 = arith.constant 0 : index
    %c0_12 = arith.constant 0 : index
    %10 = vector.load %arg2[%c0_11, %c0_12] : memref<32x28xf32, #tpu.memory_space<vmem>>, vector<32x28xf32>
    %cst = arith.constant dense<0.000000e+00> : vector<32x8xf32>
    %11 = tpu.matmul %10, %9, %cst {dimension_numbers = #tpu.dot_dimension_numbers<[1], [0], [0], [1], [0, 0, 1, 1], [], []>} : vector<32x28xf32>, vector<28x8xf32>, vector<32x8xf32> -> vector<32x8xf32>
    %c0_13 = arith.constant 0 : index
    %c0_14 = arith.constant 0 : index
    %12 = vector.load %arg3[%c0_13, %c0_14] : memref<32x1xf32, #tpu.memory_space<vmem>>, vector<32x1xf32>
    %13 = vector.shape_cast %12 : vector<32x1xf32> to vector<32x1xf32>
    %14 = vector.broadcast %13 : vector<32x1xf32> to vector<32x8xf32>
    %15 = arith.addf %11, %14 : vector<32x8xf32>
    %cst_15 = arith.constant 0.000000e+00 : f32
    %16 = vector.broadcast %cst_15 : f32 to vector<32x8xf32>
    %cst_16 = arith.constant 0.000000e+00 : f32
    %17 = vector.broadcast %cst_16 : f32 to vector<32x8xf32>
    %cst_17 = arith.constant 5.000000e-01 : f32
    %18 = vector.broadcast %cst_17 : f32 to vector<32x8xf32>
    %19 = arith.cmpf ogt, %17, %18 : vector<32x8xf32>
    %cst_18 = arith.constant 0.000000e+00 : f32
    %20 = vector.broadcast %cst_18 : f32 to vector<32x8xf32>
    %cst_19 = arith.constant 0.000000e+00 : f32
    %21 = vector.broadcast %cst_19 : f32 to vector<32x8xf32>
    %cst_20 = arith.constant 5.000000e-01 : f32
    %22 = vector.broadcast %cst_20 : f32 to vector<32x8xf32>
    %23 = arith.cmpf ogt, %21, %22 : vector<32x8xf32>
    %cst_21 = arith.constant 0.000000e+00 : f32
    %24 = vector.broadcast %cst_21 : f32 to vector<32x8xf32>
    %cst_22 = arith.constant 0.000000e+00 : f32
    %25 = vector.broadcast %cst_22 : f32 to vector<32x8xf32>
    %cst_23 = arith.constant 5.000000e-01 : f32
    %26 = vector.broadcast %cst_23 : f32 to vector<32x8xf32>
    %27 = arith.cmpf ogt, %25, %26 : vector<32x8xf32>
    %cst_24 = arith.constant 0.000000e+00 : f32
    %28 = vector.broadcast %cst_24 : f32 to vector<10x8xf32>
    %cst_25 = arith.constant 2.000000e-01 : f32
    %cst_26 = arith.constant 5.000000e-01 : f32
    %c0_i32 = arith.constant 0 : i32
    %29 = vector.broadcast %cst_25 : f32 to vector<32x8xf32>
    %30 = arith.mulf %16, %29 : vector<32x8xf32>
    %31 = arith.addf %30, %15 : vector<32x8xf32>
    %32 = arith.select %19, %15, %31 : vector<32x8xi1>, vector<32x8xf32>
    %33 = vector.broadcast %cst_26 : f32 to vector<32x8xf32>
    %34 = arith.cmpf ogt, %32, %33 : vector<32x8xf32>
    %35 = arith.extui %34 : vector<32x8xi1> to vector<32x8xi32>
    %36 = arith.sitofp %35 : vector<32x8xi32> to vector<32x8xf32>
    %cst_27 = arith.constant dense<0.000000e+00> : vector<32x8xf32>
    %37 = tpu.matmul %0, %36, %cst_27 {dimension_numbers = #tpu.dot_dimension_numbers<[1], [0], [0], [1], [0, 0, 1, 1], [], []>} : vector<32x32xf32>, vector<32x8xf32>, vector<32x8xf32> -> vector<32x8xf32>
    %38 = arith.addf %37, %5 : vector<32x8xf32>
    %39 = vector.broadcast %cst_25 : f32 to vector<32x8xf32>
    %40 = arith.mulf %20, %39 : vector<32x8xf32>
    %41 = arith.addf %40, %38 : vector<32x8xf32>
    %42 = arith.select %23, %38, %41 : vector<32x8xi1>, vector<32x8xf32>
    %43 = vector.broadcast %cst_26 : f32 to vector<32x8xf32>
    %44 = arith.cmpf ogt, %42, %43 : vector<32x8xf32>
    %45 = arith.extui %44 : vector<32x8xi1> to vector<32x8xi32>
    %46 = arith.sitofp %45 : vector<32x8xi32> to vector<32x8xf32>
    %cst_28 = arith.constant dense<0.000000e+00> : vector<32x8xf32>
    %47 = tpu.matmul %1, %46, %cst_28 {dimension_numbers = #tpu.dot_dimension_numbers<[1], [0], [0], [1], [0, 0, 1, 1], [], []>} : vector<32x32xf32>, vector<32x8xf32>, vector<32x8xf32> -> vector<32x8xf32>
    %48 = arith.addf %47, %8 : vector<32x8xf32>
    %49 = vector.broadcast %cst_25 : f32 to vector<32x8xf32>
    %50 = arith.mulf %24, %49 : vector<32x8xf32>
    %51 = arith.addf %50, %48 : vector<32x8xf32>
    %52 = arith.select %27, %48, %51 : vector<32x8xi1>, vector<32x8xf32>
    %53 = vector.broadcast %cst_26 : f32 to vector<32x8xf32>
    %54 = arith.cmpf ogt, %52, %53 : vector<32x8xf32>
    %55 = arith.extui %54 : vector<32x8xi1> to vector<32x8xi32>
    %56 = arith.sitofp %55 : vector<32x8xi32> to vector<32x8xf32>
    %cst_29 = arith.constant dense<0.000000e+00> : vector<10x8xf32>
    %57 = tpu.matmul %2, %56, %cst_29 {dimension_numbers = #tpu.dot_dimension_numbers<[1], [0], [0], [1], [0, 0, 1, 1], [], []>} : vector<10x32xf32>, vector<32x8xf32>, vector<10x8xf32> -> vector<10x8xf32>
    %58 = arith.addf %28, %57 : vector<10x8xf32>
    %c1_i32 = arith.constant 1 : i32
    %59 = vector.broadcast %cst_25 : f32 to vector<32x8xf32>
    %60 = arith.mulf %32, %59 : vector<32x8xf32>
    %61 = arith.addf %60, %15 : vector<32x8xf32>
    %62 = arith.select %34, %15, %61 : vector<32x8xi1>, vector<32x8xf32>
    %63 = vector.broadcast %cst_26 : f32 to vector<32x8xf32>
    %64 = arith.cmpf ogt, %62, %63 : vector<32x8xf32>
    %65 = arith.extui %64 : vector<32x8xi1> to vector<32x8xi32>
    %66 = arith.sitofp %65 : vector<32x8xi32> to vector<32x8xf32>
    %cst_30 = arith.constant dense<0.000000e+00> : vector<32x8xf32>
    %67 = tpu.matmul %0, %66, %cst_30 {dimension_numbers = #tpu.dot_dimension_numbers<[1], [0], [0], [1], [0, 0, 1, 1], [], []>} : vector<32x32xf32>, vector<32x8xf32>, vector<32x8xf32> -> vector<32x8xf32>
    %68 = arith.addf %67, %5 : vector<32x8xf32>
    %69 = vector.broadcast %cst_25 : f32 to vector<32x8xf32>
    %70 = arith.mulf %42, %69 : vector<32x8xf32>
    %71 = arith.addf %70, %68 : vector<32x8xf32>
    %72 = arith.select %44, %68, %71 : vector<32x8xi1>, vector<32x8xf32>
    %73 = vector.broadcast %cst_26 : f32 to vector<32x8xf32>
    %74 = arith.cmpf ogt, %72, %73 : vector<32x8xf32>
    %75 = arith.extui %74 : vector<32x8xi1> to vector<32x8xi32>
    %76 = arith.sitofp %75 : vector<32x8xi32> to vector<32x8xf32>
    %cst_31 = arith.constant dense<0.000000e+00> : vector<32x8xf32>
    %77 = tpu.matmul %1, %76, %cst_31 {dimension_numbers = #tpu.dot_dimension_numbers<[1], [0], [0], [1], [0, 0, 1, 1], [], []>} : vector<32x32xf32>, vector<32x8xf32>, vector<32x8xf32> -> vector<32x8xf32>
    %78 = arith.addf %77, %8 : vector<32x8xf32>
    %79 = vector.broadcast %cst_25 : f32 to vector<32x8xf32>
    %80 = arith.mulf %52, %79 : vector<32x8xf32>
    %81 = arith.addf %80, %78 : vector<32x8xf32>
    %82 = arith.select %54, %78, %81 : vector<32x8xi1>, vector<32x8xf32>
    %83 = vector.broadcast %cst_26 : f32 to vector<32x8xf32>
    %84 = arith.cmpf ogt, %82, %83 : vector<32x8xf32>
    %85 = arith.extui %84 : vector<32x8xi1> to vector<32x8xi32>
    %86 = arith.sitofp %85 : vector<32x8xi32> to vector<32x8xf32>
    %cst_32 = arith.constant dense<0.000000e+00> : vector<10x8xf32>
    %87 = tpu.matmul %2, %86, %cst_32 {dimension_numbers = #tpu.dot_dimension_numbers<[1], [0], [0], [1], [0, 0, 1, 1], [], []>} : vector<10x32xf32>, vector<32x8xf32>, vector<10x8xf32> -> vector<10x8xf32>
    %88 = arith.addf %58, %87 : vector<10x8xf32>
    %c2_i32 = arith.constant 2 : i32
    %89 = vector.broadcast %cst_25 : f32 to vector<32x8xf32>
    %90 = arith.mulf %62, %89 : vector<32x8xf32>
    %91 = arith.addf %90, %15 : vector<32x8xf32>
    %92 = arith.select %64, %15, %91 : vector<32x8xi1>, vector<32x8xf32>
    %93 = vector.broadcast %cst_26 : f32 to vector<32x8xf32>
    %94 = arith.cmpf ogt, %92, %93 : vector<32x8xf32>
    %95 = arith.extui %94 : vector<32x8xi1> to vector<32x8xi32>
    %96 = arith.sitofp %95 : vector<32x8xi32> to vector<32x8xf32>
    %cst_33 = arith.constant dense<0.000000e+00> : vector<32x8xf32>
    %97 = tpu.matmul %0, %96, %cst_33 {dimension_numbers = #tpu.dot_dimension_numbers<[1], [0], [0], [1], [0, 0, 1, 1], [], []>} : vector<32x32xf32>, vector<32x8xf32>, vector<32x8xf32> -> vector<32x8xf32>
    %98 = arith.addf %97, %5 : vector<32x8xf32>
    %99 = vector.broadcast %cst_25 : f32 to vector<32x8xf32>
    %100 = arith.mulf %72, %99 : vector<32x8xf32>
    %101 = arith.addf %100, %98 : vector<32x8xf32>
    %102 = arith.select %74, %98, %101 : vector<32x8xi1>, vector<32x8xf32>
    %103 = vector.broadcast %cst_26 : f32 to vector<32x8xf32>
    %104 = arith.cmpf ogt, %102, %103 : vector<32x8xf32>
    %105 = arith.extui %104 : vector<32x8xi1> to vector<32x8xi32>
    %106 = arith.sitofp %105 : vector<32x8xi32> to vector<32x8xf32>
    %cst_34 = arith.constant dense<0.000000e+00> : vector<32x8xf32>
    %107 = tpu.matmul %1, %106, %cst_34 {dimension_numbers = #tpu.dot_dimension_numbers<[1], [0], [0], [1], [0, 0, 1, 1], [], []>} : vector<32x32xf32>, vector<32x8xf32>, vector<32x8xf32> -> vector<32x8xf32>
    %108 = arith.addf %107, %8 : vector<32x8xf32>
    %109 = vector.broadcast %cst_25 : f32 to vector<32x8xf32>
    %110 = arith.mulf %82, %109 : vector<32x8xf32>
    %111 = arith.addf %110, %108 : vector<32x8xf32>
    %112 = arith.select %84, %108, %111 : vector<32x8xi1>, vector<32x8xf32>
    %113 = vector.broadcast %cst_26 : f32 to vector<32x8xf32>
    %114 = arith.cmpf ogt, %112, %113 : vector<32x8xf32>
    %115 = arith.extui %114 : vector<32x8xi1> to vector<32x8xi32>
    %116 = arith.sitofp %115 : vector<32x8xi32> to vector<32x8xf32>
    %cst_35 = arith.constant dense<0.000000e+00> : vector<10x8xf32>
    %117 = tpu.matmul %2, %116, %cst_35 {dimension_numbers = #tpu.dot_dimension_numbers<[1], [0], [0], [1], [0, 0, 1, 1], [], []>} : vector<10x32xf32>, vector<32x8xf32>, vector<10x8xf32> -> vector<10x8xf32>
    %118 = arith.addf %88, %117 : vector<10x8xf32>
    %c3_i32 = arith.constant 3 : i32
    %119 = vector.broadcast %cst_25 : f32 to vector<32x8xf32>
    %120 = arith.mulf %92, %119 : vector<32x8xf32>
    %121 = arith.addf %120, %15 : vector<32x8xf32>
    %122 = arith.select %94, %15, %121 : vector<32x8xi1>, vector<32x8xf32>
    %123 = vector.broadcast %cst_26 : f32 to vector<32x8xf32>
    %124 = arith.cmpf ogt, %122, %123 : vector<32x8xf32>
    %125 = arith.extui %124 : vector<32x8xi1> to vector<32x8xi32>
    %126 = arith.sitofp %125 : vector<32x8xi32> to vector<32x8xf32>
    %cst_36 = arith.constant dense<0.000000e+00> : vector<32x8xf32>
    %127 = tpu.matmul %0, %126, %cst_36 {dimension_numbers = #tpu.dot_dimension_numbers<[1], [0], [0], [1], [0, 0, 1, 1], [], []>} : vector<32x32xf32>, vector<32x8xf32>, vector<32x8xf32> -> vector<32x8xf32>
    %128 = arith.addf %127, %5 : vector<32x8xf32>
    %129 = vector.broadcast %cst_25 : f32 to vector<32x8xf32>
    %130 = arith.mulf %102, %129 : vector<32x8xf32>
    %131 = arith.addf %130, %128 : vector<32x8xf32>
    %132 = arith.select %104, %128, %131 : vector<32x8xi1>, vector<32x8xf32>
    %133 = vector.broadcast %cst_26 : f32 to vector<32x8xf32>
    %134 = arith.cmpf ogt, %132, %133 : vector<32x8xf32>
    %135 = arith.extui %134 : vector<32x8xi1> to vector<32x8xi32>
    %136 = arith.sitofp %135 : vector<32x8xi32> to vector<32x8xf32>
    %cst_37 = arith.constant dense<0.000000e+00> : vector<32x8xf32>
    %137 = tpu.matmul %1, %136, %cst_37 {dimension_numbers = #tpu.dot_dimension_numbers<[1], [0], [0], [1], [0, 0, 1, 1], [], []>} : vector<32x32xf32>, vector<32x8xf32>, vector<32x8xf32> -> vector<32x8xf32>
    %138 = arith.addf %137, %8 : vector<32x8xf32>
    %139 = vector.broadcast %cst_25 : f32 to vector<32x8xf32>
    %140 = arith.mulf %112, %139 : vector<32x8xf32>
    %141 = arith.addf %140, %138 : vector<32x8xf32>
    %142 = arith.select %114, %138, %141 : vector<32x8xi1>, vector<32x8xf32>
    %143 = vector.broadcast %cst_26 : f32 to vector<32x8xf32>
    %144 = arith.cmpf ogt, %142, %143 : vector<32x8xf32>
    %145 = arith.extui %144 : vector<32x8xi1> to vector<32x8xi32>
    %146 = arith.sitofp %145 : vector<32x8xi32> to vector<32x8xf32>
    %cst_38 = arith.constant dense<0.000000e+00> : vector<10x8xf32>
    %147 = tpu.matmul %2, %146, %cst_38 {dimension_numbers = #tpu.dot_dimension_numbers<[1], [0], [0], [1], [0, 0, 1, 1], [], []>} : vector<10x32xf32>, vector<32x8xf32>, vector<10x8xf32> -> vector<10x8xf32>
    %148 = arith.addf %118, %147 : vector<10x8xf32>
    %c4_i32 = arith.constant 4 : i32
    %149 = vector.broadcast %cst_25 : f32 to vector<32x8xf32>
    %150 = arith.mulf %122, %149 : vector<32x8xf32>
    %151 = arith.addf %150, %15 : vector<32x8xf32>
    %152 = arith.select %124, %15, %151 : vector<32x8xi1>, vector<32x8xf32>
    %153 = vector.broadcast %cst_26 : f32 to vector<32x8xf32>
    %154 = arith.cmpf ogt, %152, %153 : vector<32x8xf32>
    %155 = arith.extui %154 : vector<32x8xi1> to vector<32x8xi32>
    %156 = arith.sitofp %155 : vector<32x8xi32> to vector<32x8xf32>
    %cst_39 = arith.constant dense<0.000000e+00> : vector<32x8xf32>
    %157 = tpu.matmul %0, %156, %cst_39 {dimension_numbers = #tpu.dot_dimension_numbers<[1], [0], [0], [1], [0, 0, 1, 1], [], []>} : vector<32x32xf32>, vector<32x8xf32>, vector<32x8xf32> -> vector<32x8xf32>
    %158 = arith.addf %157, %5 : vector<32x8xf32>
    %159 = vector.broadcast %cst_25 : f32 to vector<32x8xf32>
    %160 = arith.mulf %132, %159 : vector<32x8xf32>
    %161 = arith.addf %160, %158 : vector<32x8xf32>
    %162 = arith.select %134, %158, %161 : vector<32x8xi1>, vector<32x8xf32>
    %163 = vector.broadcast %cst_26 : f32 to vector<32x8xf32>
    %164 = arith.cmpf ogt, %162, %163 : vector<32x8xf32>
    %165 = arith.extui %164 : vector<32x8xi1> to vector<32x8xi32>
    %166 = arith.sitofp %165 : vector<32x8xi32> to vector<32x8xf32>
    %cst_40 = arith.constant dense<0.000000e+00> : vector<32x8xf32>
    %167 = tpu.matmul %1, %166, %cst_40 {dimension_numbers = #tpu.dot_dimension_numbers<[1], [0], [0], [1], [0, 0, 1, 1], [], []>} : vector<32x32xf32>, vector<32x8xf32>, vector<32x8xf32> -> vector<32x8xf32>
    %168 = arith.addf %167, %8 : vector<32x8xf32>
    %169 = vector.broadcast %cst_25 : f32 to vector<32x8xf32>
    %170 = arith.mulf %142, %169 : vector<32x8xf32>
    %171 = arith.addf %170, %168 : vector<32x8xf32>
    %172 = arith.select %144, %168, %171 : vector<32x8xi1>, vector<32x8xf32>
    %173 = vector.broadcast %cst_26 : f32 to vector<32x8xf32>
    %174 = arith.cmpf ogt, %172, %173 : vector<32x8xf32>
    %175 = arith.extui %174 : vector<32x8xi1> to vector<32x8xi32>
    %176 = arith.sitofp %175 : vector<32x8xi32> to vector<32x8xf32>
    %cst_41 = arith.constant dense<0.000000e+00> : vector<10x8xf32>
    %177 = tpu.matmul %2, %176, %cst_41 {dimension_numbers = #tpu.dot_dimension_numbers<[1], [0], [0], [1], [0, 0, 1, 1], [], []>} : vector<10x32xf32>, vector<32x8xf32>, vector<10x8xf32> -> vector<10x8xf32>
    %178 = arith.addf %148, %177 : vector<10x8xf32>
    %c5_i32 = arith.constant 5 : i32
    %179 = vector.broadcast %cst_25 : f32 to vector<32x8xf32>
    %180 = arith.mulf %152, %179 : vector<32x8xf32>
    %181 = arith.addf %180, %15 : vector<32x8xf32>
    %182 = arith.select %154, %15, %181 : vector<32x8xi1>, vector<32x8xf32>
    %183 = vector.broadcast %cst_26 : f32 to vector<32x8xf32>
    %184 = arith.cmpf ogt, %182, %183 : vector<32x8xf32>
    %185 = arith.extui %184 : vector<32x8xi1> to vector<32x8xi32>
    %186 = arith.sitofp %185 : vector<32x8xi32> to vector<32x8xf32>
    %cst_42 = arith.constant dense<0.000000e+00> : vector<32x8xf32>
    %187 = tpu.matmul %0, %186, %cst_42 {dimension_numbers = #tpu.dot_dimension_numbers<[1], [0], [0], [1], [0, 0, 1, 1], [], []>} : vector<32x32xf32>, vector<32x8xf32>, vector<32x8xf32> -> vector<32x8xf32>
    %188 = arith.addf %187, %5 : vector<32x8xf32>
    %189 = vector.broadcast %cst_25 : f32 to vector<32x8xf32>
    %190 = arith.mulf %162, %189 : vector<32x8xf32>
    %191 = arith.addf %190, %188 : vector<32x8xf32>
    %192 = arith.select %164, %188, %191 : vector<32x8xi1>, vector<32x8xf32>
    %193 = vector.broadcast %cst_26 : f32 to vector<32x8xf32>
    %194 = arith.cmpf ogt, %192, %193 : vector<32x8xf32>
    %195 = arith.extui %194 : vector<32x8xi1> to vector<32x8xi32>
    %196 = arith.sitofp %195 : vector<32x8xi32> to vector<32x8xf32>
    %cst_43 = arith.constant dense<0.000000e+00> : vector<32x8xf32>
    %197 = tpu.matmul %1, %196, %cst_43 {dimension_numbers = #tpu.dot_dimension_numbers<[1], [0], [0], [1], [0, 0, 1, 1], [], []>} : vector<32x32xf32>, vector<32x8xf32>, vector<32x8xf32> -> vector<32x8xf32>
    %198 = arith.addf %197, %8 : vector<32x8xf32>
    %199 = vector.broadcast %cst_25 : f32 to vector<32x8xf32>
    %200 = arith.mulf %172, %199 : vector<32x8xf32>
    %201 = arith.addf %200, %198 : vector<32x8xf32>
    %202 = arith.select %174, %198, %201 : vector<32x8xi1>, vector<32x8xf32>
    %203 = vector.broadcast %cst_26 : f32 to vector<32x8xf32>
    %204 = arith.cmpf ogt, %202, %203 : vector<32x8xf32>
    %205 = arith.extui %204 : vector<32x8xi1> to vector<32x8xi32>
    %206 = arith.sitofp %205 : vector<32x8xi32> to vector<32x8xf32>
    %cst_44 = arith.constant dense<0.000000e+00> : vector<10x8xf32>
    %207 = tpu.matmul %2, %206, %cst_44 {dimension_numbers = #tpu.dot_dimension_numbers<[1], [0], [0], [1], [0, 0, 1, 1], [], []>} : vector<10x32xf32>, vector<32x8xf32>, vector<10x8xf32> -> vector<10x8xf32>
    %208 = arith.addf %178, %207 : vector<10x8xf32>
    %c6_i32 = arith.constant 6 : i32
    %209 = vector.broadcast %cst_25 : f32 to vector<32x8xf32>
    %210 = arith.mulf %182, %209 : vector<32x8xf32>
    %211 = arith.addf %210, %15 : vector<32x8xf32>
    %212 = arith.select %184, %15, %211 : vector<32x8xi1>, vector<32x8xf32>
    %213 = vector.broadcast %cst_26 : f32 to vector<32x8xf32>
    %214 = arith.cmpf ogt, %212, %213 : vector<32x8xf32>
    %215 = arith.extui %214 : vector<32x8xi1> to vector<32x8xi32>
    %216 = arith.sitofp %215 : vector<32x8xi32> to vector<32x8xf32>
    %cst_45 = arith.constant dense<0.000000e+00> : vector<32x8xf32>
    %217 = tpu.matmul %0, %216, %cst_45 {dimension_numbers = #tpu.dot_dimension_numbers<[1], [0], [0], [1], [0, 0, 1, 1], [], []>} : vector<32x32xf32>, vector<32x8xf32>, vector<32x8xf32> -> vector<32x8xf32>
    %218 = arith.addf %217, %5 : vector<32x8xf32>
    %219 = vector.broadcast %cst_25 : f32 to vector<32x8xf32>
    %220 = arith.mulf %192, %219 : vector<32x8xf32>
    %221 = arith.addf %220, %218 : vector<32x8xf32>
    %222 = arith.select %194, %218, %221 : vector<32x8xi1>, vector<32x8xf32>
    %223 = vector.broadcast %cst_26 : f32 to vector<32x8xf32>
    %224 = arith.cmpf ogt, %222, %223 : vector<32x8xf32>
    %225 = arith.extui %224 : vector<32x8xi1> to vector<32x8xi32>
    %226 = arith.sitofp %225 : vector<32x8xi32> to vector<32x8xf32>
    %cst_46 = arith.constant dense<0.000000e+00> : vector<32x8xf32>
    %227 = tpu.matmul %1, %226, %cst_46 {dimension_numbers = #tpu.dot_dimension_numbers<[1], [0], [0], [1], [0, 0, 1, 1], [], []>} : vector<32x32xf32>, vector<32x8xf32>, vector<32x8xf32> -> vector<32x8xf32>
    %228 = arith.addf %227, %8 : vector<32x8xf32>
    %229 = vector.broadcast %cst_25 : f32 to vector<32x8xf32>
    %230 = arith.mulf %202, %229 : vector<32x8xf32>
    %231 = arith.addf %230, %228 : vector<32x8xf32>
    %232 = arith.select %204, %228, %231 : vector<32x8xi1>, vector<32x8xf32>
    %233 = vector.broadcast %cst_26 : f32 to vector<32x8xf32>
    %234 = arith.cmpf ogt, %232, %233 : vector<32x8xf32>
    %235 = arith.extui %234 : vector<32x8xi1> to vector<32x8xi32>
    %236 = arith.sitofp %235 : vector<32x8xi32> to vector<32x8xf32>
    %cst_47 = arith.constant dense<0.000000e+00> : vector<10x8xf32>
    %237 = tpu.matmul %2, %236, %cst_47 {dimension_numbers = #tpu.dot_dimension_numbers<[1], [0], [0], [1], [0, 0, 1, 1], [], []>} : vector<10x32xf32>, vector<32x8xf32>, vector<10x8xf32> -> vector<10x8xf32>
    %238 = arith.addf %208, %237 : vector<10x8xf32>
    %c7_i32 = arith.constant 7 : i32
    %239 = vector.broadcast %cst_25 : f32 to vector<32x8xf32>
    %240 = arith.mulf %212, %239 : vector<32x8xf32>
    %241 = arith.addf %240, %15 : vector<32x8xf32>
    %242 = arith.select %214, %15, %241 : vector<32x8xi1>, vector<32x8xf32>
    %243 = vector.broadcast %cst_26 : f32 to vector<32x8xf32>
    %244 = arith.cmpf ogt, %242, %243 : vector<32x8xf32>
    %245 = arith.extui %244 : vector<32x8xi1> to vector<32x8xi32>
    %246 = arith.sitofp %245 : vector<32x8xi32> to vector<32x8xf32>
    %cst_48 = arith.constant dense<0.000000e+00> : vector<32x8xf32>
    %247 = tpu.matmul %0, %246, %cst_48 {dimension_numbers = #tpu.dot_dimension_numbers<[1], [0], [0], [1], [0, 0, 1, 1], [], []>} : vector<32x32xf32>, vector<32x8xf32>, vector<32x8xf32> -> vector<32x8xf32>
    %248 = arith.addf %247, %5 : vector<32x8xf32>
    %249 = vector.broadcast %cst_25 : f32 to vector<32x8xf32>
    %250 = arith.mulf %222, %249 : vector<32x8xf32>
    %251 = arith.addf %250, %248 : vector<32x8xf32>
    %252 = arith.select %224, %248, %251 : vector<32x8xi1>, vector<32x8xf32>
    %253 = vector.broadcast %cst_26 : f32 to vector<32x8xf32>
    %254 = arith.cmpf ogt, %252, %253 : vector<32x8xf32>
    %255 = arith.extui %254 : vector<32x8xi1> to vector<32x8xi32>
    %256 = arith.sitofp %255 : vector<32x8xi32> to vector<32x8xf32>
    %cst_49 = arith.constant dense<0.000000e+00> : vector<32x8xf32>
    %257 = tpu.matmul %1, %256, %cst_49 {dimension_numbers = #tpu.dot_dimension_numbers<[1], [0], [0], [1], [0, 0, 1, 1], [], []>} : vector<32x32xf32>, vector<32x8xf32>, vector<32x8xf32> -> vector<32x8xf32>
    %258 = arith.addf %257, %8 : vector<32x8xf32>
    %259 = vector.broadcast %cst_25 : f32 to vector<32x8xf32>
    %260 = arith.mulf %232, %259 : vector<32x8xf32>
    %261 = arith.addf %260, %258 : vector<32x8xf32>
    %262 = arith.select %234, %258, %261 : vector<32x8xi1>, vector<32x8xf32>
    %263 = vector.broadcast %cst_26 : f32 to vector<32x8xf32>
    %264 = arith.cmpf ogt, %262, %263 : vector<32x8xf32>
    %265 = arith.extui %264 : vector<32x8xi1> to vector<32x8xi32>
    %266 = arith.sitofp %265 : vector<32x8xi32> to vector<32x8xf32>
    %cst_50 = arith.constant dense<0.000000e+00> : vector<10x8xf32>
    %267 = tpu.matmul %2, %266, %cst_50 {dimension_numbers = #tpu.dot_dimension_numbers<[1], [0], [0], [1], [0, 0, 1, 1], [], []>} : vector<10x32xf32>, vector<32x8xf32>, vector<10x8xf32> -> vector<10x8xf32>
    %268 = arith.addf %238, %267 : vector<10x8xf32>
    %c8_i32 = arith.constant 8 : i32
    %269 = vector.broadcast %cst_25 : f32 to vector<32x8xf32>
    %270 = arith.mulf %242, %269 : vector<32x8xf32>
    %271 = arith.addf %270, %15 : vector<32x8xf32>
    %272 = arith.select %244, %15, %271 : vector<32x8xi1>, vector<32x8xf32>
    %273 = vector.broadcast %cst_26 : f32 to vector<32x8xf32>
    %274 = arith.cmpf ogt, %272, %273 : vector<32x8xf32>
    %275 = arith.extui %274 : vector<32x8xi1> to vector<32x8xi32>
    %276 = arith.sitofp %275 : vector<32x8xi32> to vector<32x8xf32>
    %cst_51 = arith.constant dense<0.000000e+00> : vector<32x8xf32>
    %277 = tpu.matmul %0, %276, %cst_51 {dimension_numbers = #tpu.dot_dimension_numbers<[1], [0], [0], [1], [0, 0, 1, 1], [], []>} : vector<32x32xf32>, vector<32x8xf32>, vector<32x8xf32> -> vector<32x8xf32>
    %278 = arith.addf %277, %5 : vector<32x8xf32>
    %279 = vector.broadcast %cst_25 : f32 to vector<32x8xf32>
    %280 = arith.mulf %252, %279 : vector<32x8xf32>
    %281 = arith.addf %280, %278 : vector<32x8xf32>
    %282 = arith.select %254, %278, %281 : vector<32x8xi1>, vector<32x8xf32>
    %283 = vector.broadcast %cst_26 : f32 to vector<32x8xf32>
    %284 = arith.cmpf ogt, %282, %283 : vector<32x8xf32>
    %285 = arith.extui %284 : vector<32x8xi1> to vector<32x8xi32>
    %286 = arith.sitofp %285 : vector<32x8xi32> to vector<32x8xf32>
    %cst_52 = arith.constant dense<0.000000e+00> : vector<32x8xf32>
    %287 = tpu.matmul %1, %286, %cst_52 {dimension_numbers = #tpu.dot_dimension_numbers<[1], [0], [0], [1], [0, 0, 1, 1], [], []>} : vector<32x32xf32>, vector<32x8xf32>, vector<32x8xf32> -> vector<32x8xf32>
    %288 = arith.addf %287, %8 : vector<32x8xf32>
    %289 = vector.broadcast %cst_25 : f32 to vector<32x8xf32>
    %290 = arith.mulf %262, %289 : vector<32x8xf32>
    %291 = arith.addf %290, %288 : vector<32x8xf32>
    %292 = arith.select %264, %288, %291 : vector<32x8xi1>, vector<32x8xf32>
    %293 = vector.broadcast %cst_26 : f32 to vector<32x8xf32>
    %294 = arith.cmpf ogt, %292, %293 : vector<32x8xf32>
    %295 = arith.extui %294 : vector<32x8xi1> to vector<32x8xi32>
    %296 = arith.sitofp %295 : vector<32x8xi32> to vector<32x8xf32>
    %cst_53 = arith.constant dense<0.000000e+00> : vector<10x8xf32>
    %297 = tpu.matmul %2, %296, %cst_53 {dimension_numbers = #tpu.dot_dimension_numbers<[1], [0], [0], [1], [0, 0, 1, 1], [], []>} : vector<10x32xf32>, vector<32x8xf32>, vector<10x8xf32> -> vector<10x8xf32>
    %298 = arith.addf %268, %297 : vector<10x8xf32>
    %c9_i32 = arith.constant 9 : i32
    %299 = vector.broadcast %cst_25 : f32 to vector<32x8xf32>
    %300 = arith.mulf %272, %299 : vector<32x8xf32>
    %301 = arith.addf %300, %15 : vector<32x8xf32>
    %302 = arith.select %274, %15, %301 : vector<32x8xi1>, vector<32x8xf32>
    %303 = vector.broadcast %cst_26 : f32 to vector<32x8xf32>
    %304 = arith.cmpf ogt, %302, %303 : vector<32x8xf32>
    %305 = arith.extui %304 : vector<32x8xi1> to vector<32x8xi32>
    %306 = arith.sitofp %305 : vector<32x8xi32> to vector<32x8xf32>
    %cst_54 = arith.constant dense<0.000000e+00> : vector<32x8xf32>
    %307 = tpu.matmul %0, %306, %cst_54 {dimension_numbers = #tpu.dot_dimension_numbers<[1], [0], [0], [1], [0, 0, 1, 1], [], []>} : vector<32x32xf32>, vector<32x8xf32>, vector<32x8xf32> -> vector<32x8xf32>
    %308 = arith.addf %307, %5 : vector<32x8xf32>
    %309 = vector.broadcast %cst_25 : f32 to vector<32x8xf32>
    %310 = arith.mulf %282, %309 : vector<32x8xf32>
    %311 = arith.addf %310, %308 : vector<32x8xf32>
    %312 = arith.select %284, %308, %311 : vector<32x8xi1>, vector<32x8xf32>
    %313 = vector.broadcast %cst_26 : f32 to vector<32x8xf32>
    %314 = arith.cmpf ogt, %312, %313 : vector<32x8xf32>
    %315 = arith.extui %314 : vector<32x8xi1> to vector<32x8xi32>
    %316 = arith.sitofp %315 : vector<32x8xi32> to vector<32x8xf32>
    %cst_55 = arith.constant dense<0.000000e+00> : vector<32x8xf32>
    %317 = tpu.matmul %1, %316, %cst_55 {dimension_numbers = #tpu.dot_dimension_numbers<[1], [0], [0], [1], [0, 0, 1, 1], [], []>} : vector<32x32xf32>, vector<32x8xf32>, vector<32x8xf32> -> vector<32x8xf32>
    %318 = arith.addf %317, %8 : vector<32x8xf32>
    %319 = vector.broadcast %cst_25 : f32 to vector<32x8xf32>
    %320 = arith.mulf %292, %319 : vector<32x8xf32>
    %321 = arith.addf %320, %318 : vector<32x8xf32>
    %322 = arith.select %294, %318, %321 : vector<32x8xi1>, vector<32x8xf32>
    %323 = vector.broadcast %cst_26 : f32 to vector<32x8xf32>
    %324 = arith.cmpf ogt, %322, %323 : vector<32x8xf32>
    %325 = arith.extui %324 : vector<32x8xi1> to vector<32x8xi32>
    %326 = arith.sitofp %325 : vector<32x8xi32> to vector<32x8xf32>
    %cst_56 = arith.constant dense<0.000000e+00> : vector<10x8xf32>
    %327 = tpu.matmul %2, %326, %cst_56 {dimension_numbers = #tpu.dot_dimension_numbers<[1], [0], [0], [1], [0, 0, 1, 1], [], []>} : vector<10x32xf32>, vector<32x8xf32>, vector<10x8xf32> -> vector<10x8xf32>
    %328 = arith.addf %298, %327 : vector<10x8xf32>
    %c10_i32 = arith.constant 10 : i32
    %329 = vector.broadcast %cst_25 : f32 to vector<32x8xf32>
    %330 = arith.mulf %302, %329 : vector<32x8xf32>
    %331 = arith.addf %330, %15 : vector<32x8xf32>
    %332 = arith.select %304, %15, %331 : vector<32x8xi1>, vector<32x8xf32>
    %333 = vector.broadcast %cst_26 : f32 to vector<32x8xf32>
    %334 = arith.cmpf ogt, %332, %333 : vector<32x8xf32>
    %335 = arith.extui %334 : vector<32x8xi1> to vector<32x8xi32>
    %336 = arith.sitofp %335 : vector<32x8xi32> to vector<32x8xf32>
    %cst_57 = arith.constant dense<0.000000e+00> : vector<32x8xf32>
    %337 = tpu.matmul %0, %336, %cst_57 {dimension_numbers = #tpu.dot_dimension_numbers<[1], [0], [0], [1], [0, 0, 1, 1], [], []>} : vector<32x32xf32>, vector<32x8xf32>, vector<32x8xf32> -> vector<32x8xf32>
    %338 = arith.addf %337, %5 : vector<32x8xf32>
    %339 = vector.broadcast %cst_25 : f32 to vector<32x8xf32>
    %340 = arith.mulf %312, %339 : vector<32x8xf32>
    %341 = arith.addf %340, %338 : vector<32x8xf32>
    %342 = arith.select %314, %338, %341 : vector<32x8xi1>, vector<32x8xf32>
    %343 = vector.broadcast %cst_26 : f32 to vector<32x8xf32>
    %344 = arith.cmpf ogt, %342, %343 : vector<32x8xf32>
    %345 = arith.extui %344 : vector<32x8xi1> to vector<32x8xi32>
    %346 = arith.sitofp %345 : vector<32x8xi32> to vector<32x8xf32>
    %cst_58 = arith.constant dense<0.000000e+00> : vector<32x8xf32>
    %347 = tpu.matmul %1, %346, %cst_58 {dimension_numbers = #tpu.dot_dimension_numbers<[1], [0], [0], [1], [0, 0, 1, 1], [], []>} : vector<32x32xf32>, vector<32x8xf32>, vector<32x8xf32> -> vector<32x8xf32>
    %348 = arith.addf %347, %8 : vector<32x8xf32>
    %349 = vector.broadcast %cst_25 : f32 to vector<32x8xf32>
    %350 = arith.mulf %322, %349 : vector<32x8xf32>
    %351 = arith.addf %350, %348 : vector<32x8xf32>
    %352 = arith.select %324, %348, %351 : vector<32x8xi1>, vector<32x8xf32>
    %353 = vector.broadcast %cst_26 : f32 to vector<32x8xf32>
    %354 = arith.cmpf ogt, %352, %353 : vector<32x8xf32>
    %355 = arith.extui %354 : vector<32x8xi1> to vector<32x8xi32>
    %356 = arith.sitofp %355 : vector<32x8xi32> to vector<32x8xf32>
    %cst_59 = arith.constant dense<0.000000e+00> : vector<10x8xf32>
    %357 = tpu.matmul %2, %356, %cst_59 {dimension_numbers = #tpu.dot_dimension_numbers<[1], [0], [0], [1], [0, 0, 1, 1], [], []>} : vector<10x32xf32>, vector<32x8xf32>, vector<10x8xf32> -> vector<10x8xf32>
    %358 = arith.addf %328, %357 : vector<10x8xf32>
    %c11_i32 = arith.constant 11 : i32
    %359 = vector.broadcast %cst_25 : f32 to vector<32x8xf32>
    %360 = arith.mulf %332, %359 : vector<32x8xf32>
    %361 = arith.addf %360, %15 : vector<32x8xf32>
    %362 = arith.select %334, %15, %361 : vector<32x8xi1>, vector<32x8xf32>
    %363 = vector.broadcast %cst_26 : f32 to vector<32x8xf32>
    %364 = arith.cmpf ogt, %362, %363 : vector<32x8xf32>
    %365 = arith.extui %364 : vector<32x8xi1> to vector<32x8xi32>
    %366 = arith.sitofp %365 : vector<32x8xi32> to vector<32x8xf32>
    %cst_60 = arith.constant dense<0.000000e+00> : vector<32x8xf32>
    %367 = tpu.matmul %0, %366, %cst_60 {dimension_numbers = #tpu.dot_dimension_numbers<[1], [0], [0], [1], [0, 0, 1, 1], [], []>} : vector<32x32xf32>, vector<32x8xf32>, vector<32x8xf32> -> vector<32x8xf32>
    %368 = arith.addf %367, %5 : vector<32x8xf32>
    %369 = vector.broadcast %cst_25 : f32 to vector<32x8xf32>
    %370 = arith.mulf %342, %369 : vector<32x8xf32>
    %371 = arith.addf %370, %368 : vector<32x8xf32>
    %372 = arith.select %344, %368, %371 : vector<32x8xi1>, vector<32x8xf32>
    %373 = vector.broadcast %cst_26 : f32 to vector<32x8xf32>
    %374 = arith.cmpf ogt, %372, %373 : vector<32x8xf32>
    %375 = arith.extui %374 : vector<32x8xi1> to vector<32x8xi32>
    %376 = arith.sitofp %375 : vector<32x8xi32> to vector<32x8xf32>
    %cst_61 = arith.constant dense<0.000000e+00> : vector<32x8xf32>
    %377 = tpu.matmul %1, %376, %cst_61 {dimension_numbers = #tpu.dot_dimension_numbers<[1], [0], [0], [1], [0, 0, 1, 1], [], []>} : vector<32x32xf32>, vector<32x8xf32>, vector<32x8xf32> -> vector<32x8xf32>
    %378 = arith.addf %377, %8 : vector<32x8xf32>
    %379 = vector.broadcast %cst_25 : f32 to vector<32x8xf32>
    %380 = arith.mulf %352, %379 : vector<32x8xf32>
    %381 = arith.addf %380, %378 : vector<32x8xf32>
    %382 = arith.select %354, %378, %381 : vector<32x8xi1>, vector<32x8xf32>
    %383 = vector.broadcast %cst_26 : f32 to vector<32x8xf32>
    %384 = arith.cmpf ogt, %382, %383 : vector<32x8xf32>
    %385 = arith.extui %384 : vector<32x8xi1> to vector<32x8xi32>
    %386 = arith.sitofp %385 : vector<32x8xi32> to vector<32x8xf32>
    %cst_62 = arith.constant dense<0.000000e+00> : vector<10x8xf32>
    %387 = tpu.matmul %2, %386, %cst_62 {dimension_numbers = #tpu.dot_dimension_numbers<[1], [0], [0], [1], [0, 0, 1, 1], [], []>} : vector<10x32xf32>, vector<32x8xf32>, vector<10x8xf32> -> vector<10x8xf32>
    %388 = arith.addf %358, %387 : vector<10x8xf32>
    %c12_i32 = arith.constant 12 : i32
    %389 = vector.broadcast %cst_25 : f32 to vector<32x8xf32>
    %390 = arith.mulf %362, %389 : vector<32x8xf32>
    %391 = arith.addf %390, %15 : vector<32x8xf32>
    %392 = arith.select %364, %15, %391 : vector<32x8xi1>, vector<32x8xf32>
    %393 = vector.broadcast %cst_26 : f32 to vector<32x8xf32>
    %394 = arith.cmpf ogt, %392, %393 : vector<32x8xf32>
    %395 = arith.extui %394 : vector<32x8xi1> to vector<32x8xi32>
    %396 = arith.sitofp %395 : vector<32x8xi32> to vector<32x8xf32>
    %cst_63 = arith.constant dense<0.000000e+00> : vector<32x8xf32>
    %397 = tpu.matmul %0, %396, %cst_63 {dimension_numbers = #tpu.dot_dimension_numbers<[1], [0], [0], [1], [0, 0, 1, 1], [], []>} : vector<32x32xf32>, vector<32x8xf32>, vector<32x8xf32> -> vector<32x8xf32>
    %398 = arith.addf %397, %5 : vector<32x8xf32>
    %399 = vector.broadcast %cst_25 : f32 to vector<32x8xf32>
    %400 = arith.mulf %372, %399 : vector<32x8xf32>
    %401 = arith.addf %400, %398 : vector<32x8xf32>
    %402 = arith.select %374, %398, %401 : vector<32x8xi1>, vector<32x8xf32>
    %403 = vector.broadcast %cst_26 : f32 to vector<32x8xf32>
    %404 = arith.cmpf ogt, %402, %403 : vector<32x8xf32>
    %405 = arith.extui %404 : vector<32x8xi1> to vector<32x8xi32>
    %406 = arith.sitofp %405 : vector<32x8xi32> to vector<32x8xf32>
    %cst_64 = arith.constant dense<0.000000e+00> : vector<32x8xf32>
    %407 = tpu.matmul %1, %406, %cst_64 {dimension_numbers = #tpu.dot_dimension_numbers<[1], [0], [0], [1], [0, 0, 1, 1], [], []>} : vector<32x32xf32>, vector<32x8xf32>, vector<32x8xf32> -> vector<32x8xf32>
    %408 = arith.addf %407, %8 : vector<32x8xf32>
    %409 = vector.broadcast %cst_25 : f32 to vector<32x8xf32>
    %410 = arith.mulf %382, %409 : vector<32x8xf32>
    %411 = arith.addf %410, %408 : vector<32x8xf32>
    %412 = arith.select %384, %408, %411 : vector<32x8xi1>, vector<32x8xf32>
    %413 = vector.broadcast %cst_26 : f32 to vector<32x8xf32>
    %414 = arith.cmpf ogt, %412, %413 : vector<32x8xf32>
    %415 = arith.extui %414 : vector<32x8xi1> to vector<32x8xi32>
    %416 = arith.sitofp %415 : vector<32x8xi32> to vector<32x8xf32>
    %cst_65 = arith.constant dense<0.000000e+00> : vector<10x8xf32>
    %417 = tpu.matmul %2, %416, %cst_65 {dimension_numbers = #tpu.dot_dimension_numbers<[1], [0], [0], [1], [0, 0, 1, 1], [], []>} : vector<10x32xf32>, vector<32x8xf32>, vector<10x8xf32> -> vector<10x8xf32>
    %418 = arith.addf %388, %417 : vector<10x8xf32>
    %c13_i32 = arith.constant 13 : i32
    %419 = vector.broadcast %cst_25 : f32 to vector<32x8xf32>
    %420 = arith.mulf %392, %419 : vector<32x8xf32>
    %421 = arith.addf %420, %15 : vector<32x8xf32>
    %422 = arith.select %394, %15, %421 : vector<32x8xi1>, vector<32x8xf32>
    %423 = vector.broadcast %cst_26 : f32 to vector<32x8xf32>
    %424 = arith.cmpf ogt, %422, %423 : vector<32x8xf32>
    %425 = arith.extui %424 : vector<32x8xi1> to vector<32x8xi32>
    %426 = arith.sitofp %425 : vector<32x8xi32> to vector<32x8xf32>
    %cst_66 = arith.constant dense<0.000000e+00> : vector<32x8xf32>
    %427 = tpu.matmul %0, %426, %cst_66 {dimension_numbers = #tpu.dot_dimension_numbers<[1], [0], [0], [1], [0, 0, 1, 1], [], []>} : vector<32x32xf32>, vector<32x8xf32>, vector<32x8xf32> -> vector<32x8xf32>
    %428 = arith.addf %427, %5 : vector<32x8xf32>
    %429 = vector.broadcast %cst_25 : f32 to vector<32x8xf32>
    %430 = arith.mulf %402, %429 : vector<32x8xf32>
    %431 = arith.addf %430, %428 : vector<32x8xf32>
    %432 = arith.select %404, %428, %431 : vector<32x8xi1>, vector<32x8xf32>
    %433 = vector.broadcast %cst_26 : f32 to vector<32x8xf32>
    %434 = arith.cmpf ogt, %432, %433 : vector<32x8xf32>
    %435 = arith.extui %434 : vector<32x8xi1> to vector<32x8xi32>
    %436 = arith.sitofp %435 : vector<32x8xi32> to vector<32x8xf32>
    %cst_67 = arith.constant dense<0.000000e+00> : vector<32x8xf32>
    %437 = tpu.matmul %1, %436, %cst_67 {dimension_numbers = #tpu.dot_dimension_numbers<[1], [0], [0], [1], [0, 0, 1, 1], [], []>} : vector<32x32xf32>, vector<32x8xf32>, vector<32x8xf32> -> vector<32x8xf32>
    %438 = arith.addf %437, %8 : vector<32x8xf32>
    %439 = vector.broadcast %cst_25 : f32 to vector<32x8xf32>
    %440 = arith.mulf %412, %439 : vector<32x8xf32>
    %441 = arith.addf %440, %438 : vector<32x8xf32>
    %442 = arith.select %414, %438, %441 : vector<32x8xi1>, vector<32x8xf32>
    %443 = vector.broadcast %cst_26 : f32 to vector<32x8xf32>
    %444 = arith.cmpf ogt, %442, %443 : vector<32x8xf32>
    %445 = arith.extui %444 : vector<32x8xi1> to vector<32x8xi32>
    %446 = arith.sitofp %445 : vector<32x8xi32> to vector<32x8xf32>
    %cst_68 = arith.constant dense<0.000000e+00> : vector<10x8xf32>
    %447 = tpu.matmul %2, %446, %cst_68 {dimension_numbers = #tpu.dot_dimension_numbers<[1], [0], [0], [1], [0, 0, 1, 1], [], []>} : vector<10x32xf32>, vector<32x8xf32>, vector<10x8xf32> -> vector<10x8xf32>
    %448 = arith.addf %418, %447 : vector<10x8xf32>
    %c14_i32 = arith.constant 14 : i32
    %449 = vector.broadcast %cst_25 : f32 to vector<32x8xf32>
    %450 = arith.mulf %422, %449 : vector<32x8xf32>
    %451 = arith.addf %450, %15 : vector<32x8xf32>
    %452 = arith.select %424, %15, %451 : vector<32x8xi1>, vector<32x8xf32>
    %453 = vector.broadcast %cst_26 : f32 to vector<32x8xf32>
    %454 = arith.cmpf ogt, %452, %453 : vector<32x8xf32>
    %455 = arith.extui %454 : vector<32x8xi1> to vector<32x8xi32>
    %456 = arith.sitofp %455 : vector<32x8xi32> to vector<32x8xf32>
    %cst_69 = arith.constant dense<0.000000e+00> : vector<32x8xf32>
    %457 = tpu.matmul %0, %456, %cst_69 {dimension_numbers = #tpu.dot_dimension_numbers<[1], [0], [0], [1], [0, 0, 1, 1], [], []>} : vector<32x32xf32>, vector<32x8xf32>, vector<32x8xf32> -> vector<32x8xf32>
    %458 = arith.addf %457, %5 : vector<32x8xf32>
    %459 = vector.broadcast %cst_25 : f32 to vector<32x8xf32>
    %460 = arith.mulf %432, %459 : vector<32x8xf32>
    %461 = arith.addf %460, %458 : vector<32x8xf32>
    %462 = arith.select %434, %458, %461 : vector<32x8xi1>, vector<32x8xf32>
    %463 = vector.broadcast %cst_26 : f32 to vector<32x8xf32>
    %464 = arith.cmpf ogt, %462, %463 : vector<32x8xf32>
    %465 = arith.extui %464 : vector<32x8xi1> to vector<32x8xi32>
    %466 = arith.sitofp %465 : vector<32x8xi32> to vector<32x8xf32>
    %cst_70 = arith.constant dense<0.000000e+00> : vector<32x8xf32>
    %467 = tpu.matmul %1, %466, %cst_70 {dimension_numbers = #tpu.dot_dimension_numbers<[1], [0], [0], [1], [0, 0, 1, 1], [], []>} : vector<32x32xf32>, vector<32x8xf32>, vector<32x8xf32> -> vector<32x8xf32>
    %468 = arith.addf %467, %8 : vector<32x8xf32>
    %469 = vector.broadcast %cst_25 : f32 to vector<32x8xf32>
    %470 = arith.mulf %442, %469 : vector<32x8xf32>
    %471 = arith.addf %470, %468 : vector<32x8xf32>
    %472 = arith.select %444, %468, %471 : vector<32x8xi1>, vector<32x8xf32>
    %473 = vector.broadcast %cst_26 : f32 to vector<32x8xf32>
    %474 = arith.cmpf ogt, %472, %473 : vector<32x8xf32>
    %475 = arith.extui %474 : vector<32x8xi1> to vector<32x8xi32>
    %476 = arith.sitofp %475 : vector<32x8xi32> to vector<32x8xf32>
    %cst_71 = arith.constant dense<0.000000e+00> : vector<10x8xf32>
    %477 = tpu.matmul %2, %476, %cst_71 {dimension_numbers = #tpu.dot_dimension_numbers<[1], [0], [0], [1], [0, 0, 1, 1], [], []>} : vector<10x32xf32>, vector<32x8xf32>, vector<10x8xf32> -> vector<10x8xf32>
    %478 = arith.addf %448, %477 : vector<10x8xf32>
    %c15_i32 = arith.constant 15 : i32
    %479 = vector.broadcast %cst_25 : f32 to vector<32x8xf32>
    %480 = arith.mulf %452, %479 : vector<32x8xf32>
    %481 = arith.addf %480, %15 : vector<32x8xf32>
    %482 = arith.select %454, %15, %481 : vector<32x8xi1>, vector<32x8xf32>
    %483 = vector.broadcast %cst_26 : f32 to vector<32x8xf32>
    %484 = arith.cmpf ogt, %482, %483 : vector<32x8xf32>
    %485 = arith.extui %484 : vector<32x8xi1> to vector<32x8xi32>
    %486 = arith.sitofp %485 : vector<32x8xi32> to vector<32x8xf32>
    %cst_72 = arith.constant dense<0.000000e+00> : vector<32x8xf32>
    %487 = tpu.matmul %0, %486, %cst_72 {dimension_numbers = #tpu.dot_dimension_numbers<[1], [0], [0], [1], [0, 0, 1, 1], [], []>} : vector<32x32xf32>, vector<32x8xf32>, vector<32x8xf32> -> vector<32x8xf32>
    %488 = arith.addf %487, %5 : vector<32x8xf32>
    %489 = vector.broadcast %cst_25 : f32 to vector<32x8xf32>
    %490 = arith.mulf %462, %489 : vector<32x8xf32>
    %491 = arith.addf %490, %488 : vector<32x8xf32>
    %492 = arith.select %464, %488, %491 : vector<32x8xi1>, vector<32x8xf32>
    %493 = vector.broadcast %cst_26 : f32 to vector<32x8xf32>
    %494 = arith.cmpf ogt, %492, %493 : vector<32x8xf32>
    %495 = arith.extui %494 : vector<32x8xi1> to vector<32x8xi32>
    %496 = arith.sitofp %495 : vector<32x8xi32> to vector<32x8xf32>
    %cst_73 = arith.constant dense<0.000000e+00> : vector<32x8xf32>
    %497 = tpu.matmul %1, %496, %cst_73 {dimension_numbers = #tpu.dot_dimension_numbers<[1], [0], [0], [1], [0, 0, 1, 1], [], []>} : vector<32x32xf32>, vector<32x8xf32>, vector<32x8xf32> -> vector<32x8xf32>
    %498 = arith.addf %497, %8 : vector<32x8xf32>
    %499 = vector.broadcast %cst_25 : f32 to vector<32x8xf32>
    %500 = arith.mulf %472, %499 : vector<32x8xf32>
    %501 = arith.addf %500, %498 : vector<32x8xf32>
    %502 = arith.select %474, %498, %501 : vector<32x8xi1>, vector<32x8xf32>
    %503 = vector.broadcast %cst_26 : f32 to vector<32x8xf32>
    %504 = arith.cmpf ogt, %502, %503 : vector<32x8xf32>
    %505 = arith.extui %504 : vector<32x8xi1> to vector<32x8xi32>
    %506 = arith.sitofp %505 : vector<32x8xi32> to vector<32x8xf32>
    %cst_74 = arith.constant dense<0.000000e+00> : vector<10x8xf32>
    %507 = tpu.matmul %2, %506, %cst_74 {dimension_numbers = #tpu.dot_dimension_numbers<[1], [0], [0], [1], [0, 0, 1, 1], [], []>} : vector<10x32xf32>, vector<32x8xf32>, vector<10x8xf32> -> vector<10x8xf32>
    %508 = arith.addf %478, %507 : vector<10x8xf32>
    %c16_i32 = arith.constant 16 : i32
    %509 = vector.broadcast %cst_25 : f32 to vector<32x8xf32>
    %510 = arith.mulf %482, %509 : vector<32x8xf32>
    %511 = arith.addf %510, %15 : vector<32x8xf32>
    %512 = arith.select %484, %15, %511 : vector<32x8xi1>, vector<32x8xf32>
    %513 = vector.broadcast %cst_26 : f32 to vector<32x8xf32>
    %514 = arith.cmpf ogt, %512, %513 : vector<32x8xf32>
    %515 = arith.extui %514 : vector<32x8xi1> to vector<32x8xi32>
    %516 = arith.sitofp %515 : vector<32x8xi32> to vector<32x8xf32>
    %cst_75 = arith.constant dense<0.000000e+00> : vector<32x8xf32>
    %517 = tpu.matmul %0, %516, %cst_75 {dimension_numbers = #tpu.dot_dimension_numbers<[1], [0], [0], [1], [0, 0, 1, 1], [], []>} : vector<32x32xf32>, vector<32x8xf32>, vector<32x8xf32> -> vector<32x8xf32>
    %518 = arith.addf %517, %5 : vector<32x8xf32>
    %519 = vector.broadcast %cst_25 : f32 to vector<32x8xf32>
    %520 = arith.mulf %492, %519 : vector<32x8xf32>
    %521 = arith.addf %520, %518 : vector<32x8xf32>
    %522 = arith.select %494, %518, %521 : vector<32x8xi1>, vector<32x8xf32>
    %523 = vector.broadcast %cst_26 : f32 to vector<32x8xf32>
    %524 = arith.cmpf ogt, %522, %523 : vector<32x8xf32>
    %525 = arith.extui %524 : vector<32x8xi1> to vector<32x8xi32>
    %526 = arith.sitofp %525 : vector<32x8xi32> to vector<32x8xf32>
    %cst_76 = arith.constant dense<0.000000e+00> : vector<32x8xf32>
    %527 = tpu.matmul %1, %526, %cst_76 {dimension_numbers = #tpu.dot_dimension_numbers<[1], [0], [0], [1], [0, 0, 1, 1], [], []>} : vector<32x32xf32>, vector<32x8xf32>, vector<32x8xf32> -> vector<32x8xf32>
    %528 = arith.addf %527, %8 : vector<32x8xf32>
    %529 = vector.broadcast %cst_25 : f32 to vector<32x8xf32>
    %530 = arith.mulf %502, %529 : vector<32x8xf32>
    %531 = arith.addf %530, %528 : vector<32x8xf32>
    %532 = arith.select %504, %528, %531 : vector<32x8xi1>, vector<32x8xf32>
    %533 = vector.broadcast %cst_26 : f32 to vector<32x8xf32>
    %534 = arith.cmpf ogt, %532, %533 : vector<32x8xf32>
    %535 = arith.extui %534 : vector<32x8xi1> to vector<32x8xi32>
    %536 = arith.sitofp %535 : vector<32x8xi32> to vector<32x8xf32>
    %cst_77 = arith.constant dense<0.000000e+00> : vector<10x8xf32>
    %537 = tpu.matmul %2, %536, %cst_77 {dimension_numbers = #tpu.dot_dimension_numbers<[1], [0], [0], [1], [0, 0, 1, 1], [], []>} : vector<10x32xf32>, vector<32x8xf32>, vector<10x8xf32> -> vector<10x8xf32>
    %538 = arith.addf %508, %537 : vector<10x8xf32>
    %c17_i32 = arith.constant 17 : i32
    %539 = vector.broadcast %cst_25 : f32 to vector<32x8xf32>
    %540 = arith.mulf %512, %539 : vector<32x8xf32>
    %541 = arith.addf %540, %15 : vector<32x8xf32>
    %542 = arith.select %514, %15, %541 : vector<32x8xi1>, vector<32x8xf32>
    %543 = vector.broadcast %cst_26 : f32 to vector<32x8xf32>
    %544 = arith.cmpf ogt, %542, %543 : vector<32x8xf32>
    %545 = arith.extui %544 : vector<32x8xi1> to vector<32x8xi32>
    %546 = arith.sitofp %545 : vector<32x8xi32> to vector<32x8xf32>
    %cst_78 = arith.constant dense<0.000000e+00> : vector<32x8xf32>
    %547 = tpu.matmul %0, %546, %cst_78 {dimension_numbers = #tpu.dot_dimension_numbers<[1], [0], [0], [1], [0, 0, 1, 1], [], []>} : vector<32x32xf32>, vector<32x8xf32>, vector<32x8xf32> -> vector<32x8xf32>
    %548 = arith.addf %547, %5 : vector<32x8xf32>
    %549 = vector.broadcast %cst_25 : f32 to vector<32x8xf32>
    %550 = arith.mulf %522, %549 : vector<32x8xf32>
    %551 = arith.addf %550, %548 : vector<32x8xf32>
    %552 = arith.select %524, %548, %551 : vector<32x8xi1>, vector<32x8xf32>
    %553 = vector.broadcast %cst_26 : f32 to vector<32x8xf32>
    %554 = arith.cmpf ogt, %552, %553 : vector<32x8xf32>
    %555 = arith.extui %554 : vector<32x8xi1> to vector<32x8xi32>
    %556 = arith.sitofp %555 : vector<32x8xi32> to vector<32x8xf32>
    %cst_79 = arith.constant dense<0.000000e+00> : vector<32x8xf32>
    %557 = tpu.matmul %1, %556, %cst_79 {dimension_numbers = #tpu.dot_dimension_numbers<[1], [0], [0], [1], [0, 0, 1, 1], [], []>} : vector<32x32xf32>, vector<32x8xf32>, vector<32x8xf32> -> vector<32x8xf32>
    %558 = arith.addf %557, %8 : vector<32x8xf32>
    %559 = vector.broadcast %cst_25 : f32 to vector<32x8xf32>
    %560 = arith.mulf %532, %559 : vector<32x8xf32>
    %561 = arith.addf %560, %558 : vector<32x8xf32>
    %562 = arith.select %534, %558, %561 : vector<32x8xi1>, vector<32x8xf32>
    %563 = vector.broadcast %cst_26 : f32 to vector<32x8xf32>
    %564 = arith.cmpf ogt, %562, %563 : vector<32x8xf32>
    %565 = arith.extui %564 : vector<32x8xi1> to vector<32x8xi32>
    %566 = arith.sitofp %565 : vector<32x8xi32> to vector<32x8xf32>
    %cst_80 = arith.constant dense<0.000000e+00> : vector<10x8xf32>
    %567 = tpu.matmul %2, %566, %cst_80 {dimension_numbers = #tpu.dot_dimension_numbers<[1], [0], [0], [1], [0, 0, 1, 1], [], []>} : vector<10x32xf32>, vector<32x8xf32>, vector<10x8xf32> -> vector<10x8xf32>
    %568 = arith.addf %538, %567 : vector<10x8xf32>
    %c18_i32 = arith.constant 18 : i32
    %569 = vector.broadcast %cst_25 : f32 to vector<32x8xf32>
    %570 = arith.mulf %542, %569 : vector<32x8xf32>
    %571 = arith.addf %570, %15 : vector<32x8xf32>
    %572 = arith.select %544, %15, %571 : vector<32x8xi1>, vector<32x8xf32>
    %573 = vector.broadcast %cst_26 : f32 to vector<32x8xf32>
    %574 = arith.cmpf ogt, %572, %573 : vector<32x8xf32>
    %575 = arith.extui %574 : vector<32x8xi1> to vector<32x8xi32>
    %576 = arith.sitofp %575 : vector<32x8xi32> to vector<32x8xf32>
    %cst_81 = arith.constant dense<0.000000e+00> : vector<32x8xf32>
    %577 = tpu.matmul %0, %576, %cst_81 {dimension_numbers = #tpu.dot_dimension_numbers<[1], [0], [0], [1], [0, 0, 1, 1], [], []>} : vector<32x32xf32>, vector<32x8xf32>, vector<32x8xf32> -> vector<32x8xf32>
    %578 = arith.addf %577, %5 : vector<32x8xf32>
    %579 = vector.broadcast %cst_25 : f32 to vector<32x8xf32>
    %580 = arith.mulf %552, %579 : vector<32x8xf32>
    %581 = arith.addf %580, %578 : vector<32x8xf32>
    %582 = arith.select %554, %578, %581 : vector<32x8xi1>, vector<32x8xf32>
    %583 = vector.broadcast %cst_26 : f32 to vector<32x8xf32>
    %584 = arith.cmpf ogt, %582, %583 : vector<32x8xf32>
    %585 = arith.extui %584 : vector<32x8xi1> to vector<32x8xi32>
    %586 = arith.sitofp %585 : vector<32x8xi32> to vector<32x8xf32>
    %cst_82 = arith.constant dense<0.000000e+00> : vector<32x8xf32>
    %587 = tpu.matmul %1, %586, %cst_82 {dimension_numbers = #tpu.dot_dimension_numbers<[1], [0], [0], [1], [0, 0, 1, 1], [], []>} : vector<32x32xf32>, vector<32x8xf32>, vector<32x8xf32> -> vector<32x8xf32>
    %588 = arith.addf %587, %8 : vector<32x8xf32>
    %589 = vector.broadcast %cst_25 : f32 to vector<32x8xf32>
    %590 = arith.mulf %562, %589 : vector<32x8xf32>
    %591 = arith.addf %590, %588 : vector<32x8xf32>
    %592 = arith.select %564, %588, %591 : vector<32x8xi1>, vector<32x8xf32>
    %593 = vector.broadcast %cst_26 : f32 to vector<32x8xf32>
    %594 = arith.cmpf ogt, %592, %593 : vector<32x8xf32>
    %595 = arith.extui %594 : vector<32x8xi1> to vector<32x8xi32>
    %596 = arith.sitofp %595 : vector<32x8xi32> to vector<32x8xf32>
    %cst_83 = arith.constant dense<0.000000e+00> : vector<10x8xf32>
    %597 = tpu.matmul %2, %596, %cst_83 {dimension_numbers = #tpu.dot_dimension_numbers<[1], [0], [0], [1], [0, 0, 1, 1], [], []>} : vector<10x32xf32>, vector<32x8xf32>, vector<10x8xf32> -> vector<10x8xf32>
    %598 = arith.addf %568, %597 : vector<10x8xf32>
    %c19_i32 = arith.constant 19 : i32
    %599 = vector.broadcast %cst_25 : f32 to vector<32x8xf32>
    %600 = arith.mulf %572, %599 : vector<32x8xf32>
    %601 = arith.addf %600, %15 : vector<32x8xf32>
    %602 = arith.select %574, %15, %601 : vector<32x8xi1>, vector<32x8xf32>
    %603 = vector.broadcast %cst_26 : f32 to vector<32x8xf32>
    %604 = arith.cmpf ogt, %602, %603 : vector<32x8xf32>
    %605 = arith.extui %604 : vector<32x8xi1> to vector<32x8xi32>
    %606 = arith.sitofp %605 : vector<32x8xi32> to vector<32x8xf32>
    %cst_84 = arith.constant dense<0.000000e+00> : vector<32x8xf32>
    %607 = tpu.matmul %0, %606, %cst_84 {dimension_numbers = #tpu.dot_dimension_numbers<[1], [0], [0], [1], [0, 0, 1, 1], [], []>} : vector<32x32xf32>, vector<32x8xf32>, vector<32x8xf32> -> vector<32x8xf32>
    %608 = arith.addf %607, %5 : vector<32x8xf32>
    %609 = vector.broadcast %cst_25 : f32 to vector<32x8xf32>
    %610 = arith.mulf %582, %609 : vector<32x8xf32>
    %611 = arith.addf %610, %608 : vector<32x8xf32>
    %612 = arith.select %584, %608, %611 : vector<32x8xi1>, vector<32x8xf32>
    %613 = vector.broadcast %cst_26 : f32 to vector<32x8xf32>
    %614 = arith.cmpf ogt, %612, %613 : vector<32x8xf32>
    %615 = arith.extui %614 : vector<32x8xi1> to vector<32x8xi32>
    %616 = arith.sitofp %615 : vector<32x8xi32> to vector<32x8xf32>
    %cst_85 = arith.constant dense<0.000000e+00> : vector<32x8xf32>
    %617 = tpu.matmul %1, %616, %cst_85 {dimension_numbers = #tpu.dot_dimension_numbers<[1], [0], [0], [1], [0, 0, 1, 1], [], []>} : vector<32x32xf32>, vector<32x8xf32>, vector<32x8xf32> -> vector<32x8xf32>
    %618 = arith.addf %617, %8 : vector<32x8xf32>
    %619 = vector.broadcast %cst_25 : f32 to vector<32x8xf32>
    %620 = arith.mulf %592, %619 : vector<32x8xf32>
    %621 = arith.addf %620, %618 : vector<32x8xf32>
    %622 = arith.select %594, %618, %621 : vector<32x8xi1>, vector<32x8xf32>
    %623 = vector.broadcast %cst_26 : f32 to vector<32x8xf32>
    %624 = arith.cmpf ogt, %622, %623 : vector<32x8xf32>
    %625 = arith.extui %624 : vector<32x8xi1> to vector<32x8xi32>
    %626 = arith.sitofp %625 : vector<32x8xi32> to vector<32x8xf32>
    %cst_86 = arith.constant dense<0.000000e+00> : vector<10x8xf32>
    %627 = tpu.matmul %2, %626, %cst_86 {dimension_numbers = #tpu.dot_dimension_numbers<[1], [0], [0], [1], [0, 0, 1, 1], [], []>} : vector<10x32xf32>, vector<32x8xf32>, vector<10x8xf32> -> vector<10x8xf32>
    %628 = arith.addf %598, %627 : vector<10x8xf32>
    %c20_i32 = arith.constant 20 : i32
    %629 = vector.broadcast %cst_25 : f32 to vector<32x8xf32>
    %630 = arith.mulf %602, %629 : vector<32x8xf32>
    %631 = arith.addf %630, %15 : vector<32x8xf32>
    %632 = arith.select %604, %15, %631 : vector<32x8xi1>, vector<32x8xf32>
    %633 = vector.broadcast %cst_26 : f32 to vector<32x8xf32>
    %634 = arith.cmpf ogt, %632, %633 : vector<32x8xf32>
    %635 = arith.extui %634 : vector<32x8xi1> to vector<32x8xi32>
    %636 = arith.sitofp %635 : vector<32x8xi32> to vector<32x8xf32>
    %cst_87 = arith.constant dense<0.000000e+00> : vector<32x8xf32>
    %637 = tpu.matmul %0, %636, %cst_87 {dimension_numbers = #tpu.dot_dimension_numbers<[1], [0], [0], [1], [0, 0, 1, 1], [], []>} : vector<32x32xf32>, vector<32x8xf32>, vector<32x8xf32> -> vector<32x8xf32>
    %638 = arith.addf %637, %5 : vector<32x8xf32>
    %639 = vector.broadcast %cst_25 : f32 to vector<32x8xf32>
    %640 = arith.mulf %612, %639 : vector<32x8xf32>
    %641 = arith.addf %640, %638 : vector<32x8xf32>
    %642 = arith.select %614, %638, %641 : vector<32x8xi1>, vector<32x8xf32>
    %643 = vector.broadcast %cst_26 : f32 to vector<32x8xf32>
    %644 = arith.cmpf ogt, %642, %643 : vector<32x8xf32>
    %645 = arith.extui %644 : vector<32x8xi1> to vector<32x8xi32>
    %646 = arith.sitofp %645 : vector<32x8xi32> to vector<32x8xf32>
    %cst_88 = arith.constant dense<0.000000e+00> : vector<32x8xf32>
    %647 = tpu.matmul %1, %646, %cst_88 {dimension_numbers = #tpu.dot_dimension_numbers<[1], [0], [0], [1], [0, 0, 1, 1], [], []>} : vector<32x32xf32>, vector<32x8xf32>, vector<32x8xf32> -> vector<32x8xf32>
    %648 = arith.addf %647, %8 : vector<32x8xf32>
    %649 = vector.broadcast %cst_25 : f32 to vector<32x8xf32>
    %650 = arith.mulf %622, %649 : vector<32x8xf32>
    %651 = arith.addf %650, %648 : vector<32x8xf32>
    %652 = arith.select %624, %648, %651 : vector<32x8xi1>, vector<32x8xf32>
    %653 = vector.broadcast %cst_26 : f32 to vector<32x8xf32>
    %654 = arith.cmpf ogt, %652, %653 : vector<32x8xf32>
    %655 = arith.extui %654 : vector<32x8xi1> to vector<32x8xi32>
    %656 = arith.sitofp %655 : vector<32x8xi32> to vector<32x8xf32>
    %cst_89 = arith.constant dense<0.000000e+00> : vector<10x8xf32>
    %657 = tpu.matmul %2, %656, %cst_89 {dimension_numbers = #tpu.dot_dimension_numbers<[1], [0], [0], [1], [0, 0, 1, 1], [], []>} : vector<10x32xf32>, vector<32x8xf32>, vector<10x8xf32> -> vector<10x8xf32>
    %658 = arith.addf %628, %657 : vector<10x8xf32>
    %c21_i32 = arith.constant 21 : i32
    %659 = vector.broadcast %cst_25 : f32 to vector<32x8xf32>
    %660 = arith.mulf %632, %659 : vector<32x8xf32>
    %661 = arith.addf %660, %15 : vector<32x8xf32>
    %662 = arith.select %634, %15, %661 : vector<32x8xi1>, vector<32x8xf32>
    %663 = vector.broadcast %cst_26 : f32 to vector<32x8xf32>
    %664 = arith.cmpf ogt, %662, %663 : vector<32x8xf32>
    %665 = arith.extui %664 : vector<32x8xi1> to vector<32x8xi32>
    %666 = arith.sitofp %665 : vector<32x8xi32> to vector<32x8xf32>
    %cst_90 = arith.constant dense<0.000000e+00> : vector<32x8xf32>
    %667 = tpu.matmul %0, %666, %cst_90 {dimension_numbers = #tpu.dot_dimension_numbers<[1], [0], [0], [1], [0, 0, 1, 1], [], []>} : vector<32x32xf32>, vector<32x8xf32>, vector<32x8xf32> -> vector<32x8xf32>
    %668 = arith.addf %667, %5 : vector<32x8xf32>
    %669 = vector.broadcast %cst_25 : f32 to vector<32x8xf32>
    %670 = arith.mulf %642, %669 : vector<32x8xf32>
    %671 = arith.addf %670, %668 : vector<32x8xf32>
    %672 = arith.select %644, %668, %671 : vector<32x8xi1>, vector<32x8xf32>
    %673 = vector.broadcast %cst_26 : f32 to vector<32x8xf32>
    %674 = arith.cmpf ogt, %672, %673 : vector<32x8xf32>
    %675 = arith.extui %674 : vector<32x8xi1> to vector<32x8xi32>
    %676 = arith.sitofp %675 : vector<32x8xi32> to vector<32x8xf32>
    %cst_91 = arith.constant dense<0.000000e+00> : vector<32x8xf32>
    %677 = tpu.matmul %1, %676, %cst_91 {dimension_numbers = #tpu.dot_dimension_numbers<[1], [0], [0], [1], [0, 0, 1, 1], [], []>} : vector<32x32xf32>, vector<32x8xf32>, vector<32x8xf32> -> vector<32x8xf32>
    %678 = arith.addf %677, %8 : vector<32x8xf32>
    %679 = vector.broadcast %cst_25 : f32 to vector<32x8xf32>
    %680 = arith.mulf %652, %679 : vector<32x8xf32>
    %681 = arith.addf %680, %678 : vector<32x8xf32>
    %682 = arith.select %654, %678, %681 : vector<32x8xi1>, vector<32x8xf32>
    %683 = vector.broadcast %cst_26 : f32 to vector<32x8xf32>
    %684 = arith.cmpf ogt, %682, %683 : vector<32x8xf32>
    %685 = arith.extui %684 : vector<32x8xi1> to vector<32x8xi32>
    %686 = arith.sitofp %685 : vector<32x8xi32> to vector<32x8xf32>
    %cst_92 = arith.constant dense<0.000000e+00> : vector<10x8xf32>
    %687 = tpu.matmul %2, %686, %cst_92 {dimension_numbers = #tpu.dot_dimension_numbers<[1], [0], [0], [1], [0, 0, 1, 1], [], []>} : vector<10x32xf32>, vector<32x8xf32>, vector<10x8xf32> -> vector<10x8xf32>
    %688 = arith.addf %658, %687 : vector<10x8xf32>
    %c22_i32 = arith.constant 22 : i32
    %689 = vector.broadcast %cst_25 : f32 to vector<32x8xf32>
    %690 = arith.mulf %662, %689 : vector<32x8xf32>
    %691 = arith.addf %690, %15 : vector<32x8xf32>
    %692 = arith.select %664, %15, %691 : vector<32x8xi1>, vector<32x8xf32>
    %693 = vector.broadcast %cst_26 : f32 to vector<32x8xf32>
    %694 = arith.cmpf ogt, %692, %693 : vector<32x8xf32>
    %695 = arith.extui %694 : vector<32x8xi1> to vector<32x8xi32>
    %696 = arith.sitofp %695 : vector<32x8xi32> to vector<32x8xf32>
    %cst_93 = arith.constant dense<0.000000e+00> : vector<32x8xf32>
    %697 = tpu.matmul %0, %696, %cst_93 {dimension_numbers = #tpu.dot_dimension_numbers<[1], [0], [0], [1], [0, 0, 1, 1], [], []>} : vector<32x32xf32>, vector<32x8xf32>, vector<32x8xf32> -> vector<32x8xf32>
    %698 = arith.addf %697, %5 : vector<32x8xf32>
    %699 = vector.broadcast %cst_25 : f32 to vector<32x8xf32>
    %700 = arith.mulf %672, %699 : vector<32x8xf32>
    %701 = arith.addf %700, %698 : vector<32x8xf32>
    %702 = arith.select %674, %698, %701 : vector<32x8xi1>, vector<32x8xf32>
    %703 = vector.broadcast %cst_26 : f32 to vector<32x8xf32>
    %704 = arith.cmpf ogt, %702, %703 : vector<32x8xf32>
    %705 = arith.extui %704 : vector<32x8xi1> to vector<32x8xi32>
    %706 = arith.sitofp %705 : vector<32x8xi32> to vector<32x8xf32>
    %cst_94 = arith.constant dense<0.000000e+00> : vector<32x8xf32>
    %707 = tpu.matmul %1, %706, %cst_94 {dimension_numbers = #tpu.dot_dimension_numbers<[1], [0], [0], [1], [0, 0, 1, 1], [], []>} : vector<32x32xf32>, vector<32x8xf32>, vector<32x8xf32> -> vector<32x8xf32>
    %708 = arith.addf %707, %8 : vector<32x8xf32>
    %709 = vector.broadcast %cst_25 : f32 to vector<32x8xf32>
    %710 = arith.mulf %682, %709 : vector<32x8xf32>
    %711 = arith.addf %710, %708 : vector<32x8xf32>
    %712 = arith.select %684, %708, %711 : vector<32x8xi1>, vector<32x8xf32>
    %713 = vector.broadcast %cst_26 : f32 to vector<32x8xf32>
    %714 = arith.cmpf ogt, %712, %713 : vector<32x8xf32>
    %715 = arith.extui %714 : vector<32x8xi1> to vector<32x8xi32>
    %716 = arith.sitofp %715 : vector<32x8xi32> to vector<32x8xf32>
    %cst_95 = arith.constant dense<0.000000e+00> : vector<10x8xf32>
    %717 = tpu.matmul %2, %716, %cst_95 {dimension_numbers = #tpu.dot_dimension_numbers<[1], [0], [0], [1], [0, 0, 1, 1], [], []>} : vector<10x32xf32>, vector<32x8xf32>, vector<10x8xf32> -> vector<10x8xf32>
    %718 = arith.addf %688, %717 : vector<10x8xf32>
    %c23_i32 = arith.constant 23 : i32
    %719 = vector.broadcast %cst_25 : f32 to vector<32x8xf32>
    %720 = arith.mulf %692, %719 : vector<32x8xf32>
    %721 = arith.addf %720, %15 : vector<32x8xf32>
    %722 = arith.select %694, %15, %721 : vector<32x8xi1>, vector<32x8xf32>
    %723 = vector.broadcast %cst_26 : f32 to vector<32x8xf32>
    %724 = arith.cmpf ogt, %722, %723 : vector<32x8xf32>
    %725 = arith.extui %724 : vector<32x8xi1> to vector<32x8xi32>
    %726 = arith.sitofp %725 : vector<32x8xi32> to vector<32x8xf32>
    %cst_96 = arith.constant dense<0.000000e+00> : vector<32x8xf32>
    %727 = tpu.matmul %0, %726, %cst_96 {dimension_numbers = #tpu.dot_dimension_numbers<[1], [0], [0], [1], [0, 0, 1, 1], [], []>} : vector<32x32xf32>, vector<32x8xf32>, vector<32x8xf32> -> vector<32x8xf32>
    %728 = arith.addf %727, %5 : vector<32x8xf32>
    %729 = vector.broadcast %cst_25 : f32 to vector<32x8xf32>
    %730 = arith.mulf %702, %729 : vector<32x8xf32>
    %731 = arith.addf %730, %728 : vector<32x8xf32>
    %732 = arith.select %704, %728, %731 : vector<32x8xi1>, vector<32x8xf32>
    %733 = vector.broadcast %cst_26 : f32 to vector<32x8xf32>
    %734 = arith.cmpf ogt, %732, %733 : vector<32x8xf32>
    %735 = arith.extui %734 : vector<32x8xi1> to vector<32x8xi32>
    %736 = arith.sitofp %735 : vector<32x8xi32> to vector<32x8xf32>
    %cst_97 = arith.constant dense<0.000000e+00> : vector<32x8xf32>
    %737 = tpu.matmul %1, %736, %cst_97 {dimension_numbers = #tpu.dot_dimension_numbers<[1], [0], [0], [1], [0, 0, 1, 1], [], []>} : vector<32x32xf32>, vector<32x8xf32>, vector<32x8xf32> -> vector<32x8xf32>
    %738 = arith.addf %737, %8 : vector<32x8xf32>
    %739 = vector.broadcast %cst_25 : f32 to vector<32x8xf32>
    %740 = arith.mulf %712, %739 : vector<32x8xf32>
    %741 = arith.addf %740, %738 : vector<32x8xf32>
    %742 = arith.select %714, %738, %741 : vector<32x8xi1>, vector<32x8xf32>
    %743 = vector.broadcast %cst_26 : f32 to vector<32x8xf32>
    %744 = arith.cmpf ogt, %742, %743 : vector<32x8xf32>
    %745 = arith.extui %744 : vector<32x8xi1> to vector<32x8xi32>
    %746 = arith.sitofp %745 : vector<32x8xi32> to vector<32x8xf32>
    %cst_98 = arith.constant dense<0.000000e+00> : vector<10x8xf32>
    %747 = tpu.matmul %2, %746, %cst_98 {dimension_numbers = #tpu.dot_dimension_numbers<[1], [0], [0], [1], [0, 0, 1, 1], [], []>} : vector<10x32xf32>, vector<32x8xf32>, vector<10x8xf32> -> vector<10x8xf32>
    %748 = arith.addf %718, %747 : vector<10x8xf32>
    %c24_i32 = arith.constant 24 : i32
    %749 = vector.broadcast %cst_25 : f32 to vector<32x8xf32>
    %750 = arith.mulf %722, %749 : vector<32x8xf32>
    %751 = arith.addf %750, %15 : vector<32x8xf32>
    %752 = arith.select %724, %15, %751 : vector<32x8xi1>, vector<32x8xf32>
    %753 = vector.broadcast %cst_26 : f32 to vector<32x8xf32>
    %754 = arith.cmpf ogt, %752, %753 : vector<32x8xf32>
    %755 = arith.extui %754 : vector<32x8xi1> to vector<32x8xi32>
    %756 = arith.sitofp %755 : vector<32x8xi32> to vector<32x8xf32>
    %cst_99 = arith.constant dense<0.000000e+00> : vector<32x8xf32>
    %757 = tpu.matmul %0, %756, %cst_99 {dimension_numbers = #tpu.dot_dimension_numbers<[1], [0], [0], [1], [0, 0, 1, 1], [], []>} : vector<32x32xf32>, vector<32x8xf32>, vector<32x8xf32> -> vector<32x8xf32>
    %758 = arith.addf %757, %5 : vector<32x8xf32>
    %759 = vector.broadcast %cst_25 : f32 to vector<32x8xf32>
    %760 = arith.mulf %732, %759 : vector<32x8xf32>
    %761 = arith.addf %760, %758 : vector<32x8xf32>
    %762 = arith.select %734, %758, %761 : vector<32x8xi1>, vector<32x8xf32>
    %763 = vector.broadcast %cst_26 : f32 to vector<32x8xf32>
    %764 = arith.cmpf ogt, %762, %763 : vector<32x8xf32>
    %765 = arith.extui %764 : vector<32x8xi1> to vector<32x8xi32>
    %766 = arith.sitofp %765 : vector<32x8xi32> to vector<32x8xf32>
    %cst_100 = arith.constant dense<0.000000e+00> : vector<32x8xf32>
    %767 = tpu.matmul %1, %766, %cst_100 {dimension_numbers = #tpu.dot_dimension_numbers<[1], [0], [0], [1], [0, 0, 1, 1], [], []>} : vector<32x32xf32>, vector<32x8xf32>, vector<32x8xf32> -> vector<32x8xf32>
    %768 = arith.addf %767, %8 : vector<32x8xf32>
    %769 = vector.broadcast %cst_25 : f32 to vector<32x8xf32>
    %770 = arith.mulf %742, %769 : vector<32x8xf32>
    %771 = arith.addf %770, %768 : vector<32x8xf32>
    %772 = arith.select %744, %768, %771 : vector<32x8xi1>, vector<32x8xf32>
    %773 = vector.broadcast %cst_26 : f32 to vector<32x8xf32>
    %774 = arith.cmpf ogt, %772, %773 : vector<32x8xf32>
    %775 = arith.extui %774 : vector<32x8xi1> to vector<32x8xi32>
    %776 = arith.sitofp %775 : vector<32x8xi32> to vector<32x8xf32>
    %cst_101 = arith.constant dense<0.000000e+00> : vector<10x8xf32>
    %777 = tpu.matmul %2, %776, %cst_101 {dimension_numbers = #tpu.dot_dimension_numbers<[1], [0], [0], [1], [0, 0, 1, 1], [], []>} : vector<10x32xf32>, vector<32x8xf32>, vector<10x8xf32> -> vector<10x8xf32>
    %778 = arith.addf %748, %777 : vector<10x8xf32>
    %c25_i32 = arith.constant 25 : i32
    %779 = vector.broadcast %cst_25 : f32 to vector<32x8xf32>
    %780 = arith.mulf %752, %779 : vector<32x8xf32>
    %781 = arith.addf %780, %15 : vector<32x8xf32>
    %782 = arith.select %754, %15, %781 : vector<32x8xi1>, vector<32x8xf32>
    %783 = vector.broadcast %cst_26 : f32 to vector<32x8xf32>
    %784 = arith.cmpf ogt, %782, %783 : vector<32x8xf32>
    %785 = arith.extui %784 : vector<32x8xi1> to vector<32x8xi32>
    %786 = arith.sitofp %785 : vector<32x8xi32> to vector<32x8xf32>
    %cst_102 = arith.constant dense<0.000000e+00> : vector<32x8xf32>
    %787 = tpu.matmul %0, %786, %cst_102 {dimension_numbers = #tpu.dot_dimension_numbers<[1], [0], [0], [1], [0, 0, 1, 1], [], []>} : vector<32x32xf32>, vector<32x8xf32>, vector<32x8xf32> -> vector<32x8xf32>
    %788 = arith.addf %787, %5 : vector<32x8xf32>
    %789 = vector.broadcast %cst_25 : f32 to vector<32x8xf32>
    %790 = arith.mulf %762, %789 : vector<32x8xf32>
    %791 = arith.addf %790, %788 : vector<32x8xf32>
    %792 = arith.select %764, %788, %791 : vector<32x8xi1>, vector<32x8xf32>
    %793 = vector.broadcast %cst_26 : f32 to vector<32x8xf32>
    %794 = arith.cmpf ogt, %792, %793 : vector<32x8xf32>
    %795 = arith.extui %794 : vector<32x8xi1> to vector<32x8xi32>
    %796 = arith.sitofp %795 : vector<32x8xi32> to vector<32x8xf32>
    %cst_103 = arith.constant dense<0.000000e+00> : vector<32x8xf32>
    %797 = tpu.matmul %1, %796, %cst_103 {dimension_numbers = #tpu.dot_dimension_numbers<[1], [0], [0], [1], [0, 0, 1, 1], [], []>} : vector<32x32xf32>, vector<32x8xf32>, vector<32x8xf32> -> vector<32x8xf32>
    %798 = arith.addf %797, %8 : vector<32x8xf32>
    %799 = vector.broadcast %cst_25 : f32 to vector<32x8xf32>
    %800 = arith.mulf %772, %799 : vector<32x8xf32>
    %801 = arith.addf %800, %798 : vector<32x8xf32>
    %802 = arith.select %774, %798, %801 : vector<32x8xi1>, vector<32x8xf32>
    %803 = vector.broadcast %cst_26 : f32 to vector<32x8xf32>
    %804 = arith.cmpf ogt, %802, %803 : vector<32x8xf32>
    %805 = arith.extui %804 : vector<32x8xi1> to vector<32x8xi32>
    %806 = arith.sitofp %805 : vector<32x8xi32> to vector<32x8xf32>
    %cst_104 = arith.constant dense<0.000000e+00> : vector<10x8xf32>
    %807 = tpu.matmul %2, %806, %cst_104 {dimension_numbers = #tpu.dot_dimension_numbers<[1], [0], [0], [1], [0, 0, 1, 1], [], []>} : vector<10x32xf32>, vector<32x8xf32>, vector<10x8xf32> -> vector<10x8xf32>
    %808 = arith.addf %778, %807 : vector<10x8xf32>
    %c26_i32 = arith.constant 26 : i32
    %809 = vector.broadcast %cst_25 : f32 to vector<32x8xf32>
    %810 = arith.mulf %782, %809 : vector<32x8xf32>
    %811 = arith.addf %810, %15 : vector<32x8xf32>
    %812 = arith.select %784, %15, %811 : vector<32x8xi1>, vector<32x8xf32>
    %813 = vector.broadcast %cst_26 : f32 to vector<32x8xf32>
    %814 = arith.cmpf ogt, %812, %813 : vector<32x8xf32>
    %815 = arith.extui %814 : vector<32x8xi1> to vector<32x8xi32>
    %816 = arith.sitofp %815 : vector<32x8xi32> to vector<32x8xf32>
    %cst_105 = arith.constant dense<0.000000e+00> : vector<32x8xf32>
    %817 = tpu.matmul %0, %816, %cst_105 {dimension_numbers = #tpu.dot_dimension_numbers<[1], [0], [0], [1], [0, 0, 1, 1], [], []>} : vector<32x32xf32>, vector<32x8xf32>, vector<32x8xf32> -> vector<32x8xf32>
    %818 = arith.addf %817, %5 : vector<32x8xf32>
    %819 = vector.broadcast %cst_25 : f32 to vector<32x8xf32>
    %820 = arith.mulf %792, %819 : vector<32x8xf32>
    %821 = arith.addf %820, %818 : vector<32x8xf32>
    %822 = arith.select %794, %818, %821 : vector<32x8xi1>, vector<32x8xf32>
    %823 = vector.broadcast %cst_26 : f32 to vector<32x8xf32>
    %824 = arith.cmpf ogt, %822, %823 : vector<32x8xf32>
    %825 = arith.extui %824 : vector<32x8xi1> to vector<32x8xi32>
    %826 = arith.sitofp %825 : vector<32x8xi32> to vector<32x8xf32>
    %cst_106 = arith.constant dense<0.000000e+00> : vector<32x8xf32>
    %827 = tpu.matmul %1, %826, %cst_106 {dimension_numbers = #tpu.dot_dimension_numbers<[1], [0], [0], [1], [0, 0, 1, 1], [], []>} : vector<32x32xf32>, vector<32x8xf32>, vector<32x8xf32> -> vector<32x8xf32>
    %828 = arith.addf %827, %8 : vector<32x8xf32>
    %829 = vector.broadcast %cst_25 : f32 to vector<32x8xf32>
    %830 = arith.mulf %802, %829 : vector<32x8xf32>
    %831 = arith.addf %830, %828 : vector<32x8xf32>
    %832 = arith.select %804, %828, %831 : vector<32x8xi1>, vector<32x8xf32>
    %833 = vector.broadcast %cst_26 : f32 to vector<32x8xf32>
    %834 = arith.cmpf ogt, %832, %833 : vector<32x8xf32>
    %835 = arith.extui %834 : vector<32x8xi1> to vector<32x8xi32>
    %836 = arith.sitofp %835 : vector<32x8xi32> to vector<32x8xf32>
    %cst_107 = arith.constant dense<0.000000e+00> : vector<10x8xf32>
    %837 = tpu.matmul %2, %836, %cst_107 {dimension_numbers = #tpu.dot_dimension_numbers<[1], [0], [0], [1], [0, 0, 1, 1], [], []>} : vector<10x32xf32>, vector<32x8xf32>, vector<10x8xf32> -> vector<10x8xf32>
    %838 = arith.addf %808, %837 : vector<10x8xf32>
    %c27_i32 = arith.constant 27 : i32
    %839 = vector.broadcast %cst_25 : f32 to vector<32x8xf32>
    %840 = arith.mulf %812, %839 : vector<32x8xf32>
    %841 = arith.addf %840, %15 : vector<32x8xf32>
    %842 = arith.select %814, %15, %841 : vector<32x8xi1>, vector<32x8xf32>
    %843 = vector.broadcast %cst_26 : f32 to vector<32x8xf32>
    %844 = arith.cmpf ogt, %842, %843 : vector<32x8xf32>
    %845 = arith.extui %844 : vector<32x8xi1> to vector<32x8xi32>
    %846 = arith.sitofp %845 : vector<32x8xi32> to vector<32x8xf32>
    %cst_108 = arith.constant dense<0.000000e+00> : vector<32x8xf32>
    %847 = tpu.matmul %0, %846, %cst_108 {dimension_numbers = #tpu.dot_dimension_numbers<[1], [0], [0], [1], [0, 0, 1, 1], [], []>} : vector<32x32xf32>, vector<32x8xf32>, vector<32x8xf32> -> vector<32x8xf32>
    %848 = arith.addf %847, %5 : vector<32x8xf32>
    %849 = vector.broadcast %cst_25 : f32 to vector<32x8xf32>
    %850 = arith.mulf %822, %849 : vector<32x8xf32>
    %851 = arith.addf %850, %848 : vector<32x8xf32>
    %852 = arith.select %824, %848, %851 : vector<32x8xi1>, vector<32x8xf32>
    %853 = vector.broadcast %cst_26 : f32 to vector<32x8xf32>
    %854 = arith.cmpf ogt, %852, %853 : vector<32x8xf32>
    %855 = arith.extui %854 : vector<32x8xi1> to vector<32x8xi32>
    %856 = arith.sitofp %855 : vector<32x8xi32> to vector<32x8xf32>
    %cst_109 = arith.constant dense<0.000000e+00> : vector<32x8xf32>
    %857 = tpu.matmul %1, %856, %cst_109 {dimension_numbers = #tpu.dot_dimension_numbers<[1], [0], [0], [1], [0, 0, 1, 1], [], []>} : vector<32x32xf32>, vector<32x8xf32>, vector<32x8xf32> -> vector<32x8xf32>
    %858 = arith.addf %857, %8 : vector<32x8xf32>
    %859 = vector.broadcast %cst_25 : f32 to vector<32x8xf32>
    %860 = arith.mulf %832, %859 : vector<32x8xf32>
    %861 = arith.addf %860, %858 : vector<32x8xf32>
    %862 = arith.select %834, %858, %861 : vector<32x8xi1>, vector<32x8xf32>
    %863 = vector.broadcast %cst_26 : f32 to vector<32x8xf32>
    %864 = arith.cmpf ogt, %862, %863 : vector<32x8xf32>
    %865 = arith.extui %864 : vector<32x8xi1> to vector<32x8xi32>
    %866 = arith.sitofp %865 : vector<32x8xi32> to vector<32x8xf32>
    %cst_110 = arith.constant dense<0.000000e+00> : vector<10x8xf32>
    %867 = tpu.matmul %2, %866, %cst_110 {dimension_numbers = #tpu.dot_dimension_numbers<[1], [0], [0], [1], [0, 0, 1, 1], [], []>} : vector<10x32xf32>, vector<32x8xf32>, vector<10x8xf32> -> vector<10x8xf32>
    %868 = arith.addf %838, %867 : vector<10x8xf32>
    %cst_111 = arith.constant 0.0357142873 : f32
    %869 = vector.broadcast %cst_111 : f32 to vector<10x8xf32>
    %870 = arith.mulf %868, %869 : vector<10x8xf32>
    %c0_112 = arith.constant 0 : index
    %c0_113 = arith.constant 0 : index
    %871 = vector.load %arg9[%c0_112, %c0_113] : memref<10x1xf32, #tpu.memory_space<vmem>>, vector<10x1xf32>
    %872 = vector.shape_cast %871 : vector<10x1xf32> to vector<10x1xf32>
    %873 = vector.broadcast %872 : vector<10x1xf32> to vector<10x8xf32>
    %874 = arith.addf %870, %873 : vector<10x8xf32>
    %c0_114 = arith.constant 0 : index
    %c0_115 = arith.constant 0 : index
    %875 = vector.load %arg10[%c0_114, %c0_115] : memref<10x8xf32, #tpu.memory_space<vmem>>, vector<10x8xf32>
    tpu.vector_store %arg10[%c0_114, %c0_115], %874 {strides = array<i32>} : memref<10x8xf32, #tpu.memory_space<vmem>>, vector<10x8xf32>,
    return
  }
  func.func @transform_0(%arg0: i32) -> (i32, i32) {
    %c0_i32 = arith.constant 0 : i32
    %c0_i32_0 = arith.constant 0 : i32
    return %c0_i32, %arg0 : i32, i32
  }
  func.func @transform_1(%arg0: i32) -> (i32, i32) {
    %c0_i32 = arith.constant 0 : i32
    %c0_i32_0 = arith.constant 0 : i32
    %c0_i32_1 = arith.constant 0 : i32
    return %c0_i32, %c0_i32_0 : i32, i32
  }
  func.func @transform_2(%arg0: i32) -> (i32, i32) {
    %c0_i32 = arith.constant 0 : i32
    %c0_i32_0 = arith.constant 0 : i32
    %c0_i32_1 = arith.constant 0 : i32
    return %c0_i32, %c0_i32_0 : i32, i32
  }
  func.func @transform_3(%arg0: i32) -> (i32, i32) {
    %c0_i32 = arith.constant 0 : i32
    %c0_i32_0 = arith.constant 0 : i32
    %c0_i32_1 = arith.constant 0 : i32
    return %c0_i32, %c0_i32_0 : i32, i32
  }
  func.func @transform_4(%arg0: i32) -> (i32, i32) {
    %c0_i32 = arith.constant 0 : i32
    %c0_i32_0 = arith.constant 0 : i32
    %c0_i32_1 = arith.constant 0 : i32
    return %c0_i32, %c0_i32_0 : i32, i32
  }
  func.func @transform_5(%arg0: i32) -> (i32, i32) {
    %c0_i32 = arith.constant 0 : i32
    %c0_i32_0 = arith.constant 0 : i32
    %c0_i32_1 = arith.constant 0 : i32
    return %c0_i32, %c0_i32_0 : i32, i32
  }
  func.func @transform_6(%arg0: i32) -> (i32, i32) {
    %c0_i32 = arith.constant 0 : i32
    %c0_i32_0 = arith.constant 0 : i32
    %c0_i32_1 = arith.constant 0 : i32
    return %c0_i32, %c0_i32_0 : i32, i32
  }
  func.func @transform_7(%arg0: i32) -> (i32, i32) {
    %c0_i32 = arith.constant 0 : i32
    %c0_i32_0 = arith.constant 0 : i32
    %c0_i32_1 = arith.constant 0 : i32
    return %c0_i32, %c0_i32_0 : i32, i32
  }
  func.func @transform_8(%arg0: i32) -> (i32, i32) {
    %c0_i32 = arith.constant 0 : i32
    %c0_i32_0 = arith.constant 0 : i32
    %c0_i32_1 = arith.constant 0 : i32
    return %c0_i32, %c0_i32_0 : i32, i32
  }
  func.func @transform_9(%arg0: i32) -> (i32, i32) {
    %c0_i32 = arith.constant 0 : i32
    %c0_i32_0 = arith.constant 0 : i32
    return %c0_i32, %arg0 : i32, i32
  }
}

</mosaic_0001>

<bundles_post_ra>
// kernel: tpu_custom_call.1
= control target key start
LH: loop header
LB: loop body
LE: loop exit
PB: predicated region body
PF: predicated region fallthrough
CT: control target
= control target key end

     0   :  { %vm135_vm0 = vcmask 1043456   ;;  %v5558_v0 = vmov 0   ;;  %vm122_vm1 = vcmask 228352   ;;  %v9869_v23 = vmov 1.0   ;;  %s9859_s2 = inlined_call_operand.vmem [shape: f32[32,1], index: 2, kind: input, shape index: {}]   ;;  %s9860_s0 = inlined_call_operand.vmem [shape: f32[28,8], index: 0, kind: input, shape index: {}]   ;;  %s9861_s1 = inlined_call_operand.vmem [shape: f32[32,28], index: 1, kind: input, shape index: {}]   ;;  %s9862_s4 = inlined_call_operand.vmem [shape: f32[32,1], index: 4, kind: input, shape index: {}]   ;;  %s9863_s6 = inlined_call_operand.vmem [shape: f32[32,1], index: 6, kind: input, shape index: {}]   ;;  %s9864_s8 = inlined_call_operand.vmem [shape: f32[10,1], index: 8, kind: input, shape index: {}]   ;;  %s9865_s3 = inlined_call_operand.vmem [shape: f32[32,32], index: 3, kind: input, shape index: {}]   ;;  %s9866_s5 = inlined_call_operand.vmem [shape: f32[32,32], index: 5, kind: input, shape index: {}]   ;;  %s9867_s7 = inlined_call_operand.vmem [shape: f32[10,32], index: 7, kind: input, shape index: {}]   ;;  %s9868_s9 = inlined_call_operand.vmem [shape: f32[10,8], index: 9, kind: output, shape index: {}]  }
   0x1   :  { %5516 = vset.pattern.permute.xlu1 %v5558_v0  ;;  %5515 = vset.pattern.permute.xlu0 %v5558_v0  ;;  %v101_v1 = vld [vmem:[%s9859_s2 + $0x18] sm:$0xff]  ;;  %v99_v2 = vld [vmem:[%s9859_s2 + $0x8] sm:$0xff]  ;;  %v92_v4 = vld [vmem:[%s9860_s0 + $0x10] sm:$0xff]  ;;  %vm189_vm5 = vcmask 261120  }
   0x2   :  { %v93_v3 = vld [vmem:[%s9860_s0 + $0x18] sm:$0xf]  ;;  %119 = vperm.xlu0 %5515, %v101_v1   ;;  %109 = vperm.xlu1 %5516, %v99_v2   ;;  %v91_v5 = vld [vmem:[%s9860_s0 + $0x8] sm:$0xff]  ;;  %v90_v6 = vld [vmem:[%s9860_s0] sm:$0xff] }
   0x3   :  { %4548 = vmatpush.msk.msra.mxu0 %vm135_vm0, %v93_v3  ;;  %5505 = vmatpush.msk.msra.mxu1 %vm135_vm0, %v93_v3  ;;  %v94_v7 = vld [vmem:[%s9861_s1] sm:$0xff]  ;;  %v97_v8 = vld [vmem:[%s9861_s1 + $0x18] sm:$0xff]  ;;  %v100_v9 = vld [vmem:[%s9859_s2 + $0x10] sm:$0xff] }
   0x4   :  { %5517 = vset.pattern.permute.xlu2 %v5558_v0  ;;  %v98_v10 = vld [vmem:[%s9859_s2] sm:$0xff]  ;;  %v95_v11 = vld [vmem:[%s9861_s1 + $0x8] sm:$0xff]  ;;  %v96_v14 = vld [vmem:[%s9861_s1 + $0x10] sm:$0xff] }
   0x5   :  { %152 = vmatpush.msra.mxu0 %v92_v4  ;;  %5506 = vmatpush.msra.mxu1 %v92_v4  ;;  %v43_v12 = vld [vmem:[%s9862_s4 + $0x8] sm:$0xff]  ;;  %v42_v13 = vld [vmem:[%s9862_s4] sm:$0xff]  ;;  %v68_v15 = vld [vmem:[%s9863_s6 + $0x10] sm:$0xff] }
   0x6   :  { %v67_v16 = vld [vmem:[%s9863_s6 + $0x8] sm:$0xff]  ;;  %v4526_v17 = vld [vmem:[%s9864_s8] sm:$0xff]  ;;  %v45_v30 = vld [vmem:[%s9862_s4 + $0x18] sm:$0xff] }
   0x7   :  { %153 = vmatpush.msra.mxu0 %v91_v5  ;;  %5507 = vmatpush.msra.mxu1 %v91_v5  ;;  %v4527_v18 = vld [vmem:[%s9864_s8 + $0x8] sm:$0x3]  ;;  %v5694_v33 = vld [vmem:[%s9865_s3] sm:$0xff]  ;;  %v44_v34 = vld [vmem:[%s9862_s4 + $0x10] sm:$0xff] }
   0x8   :  { %63 = vperm.xlu2 %5517, %v45_v30   ;;  %v5708_v35 = vld [vmem:[%s9865_s3 + $0x8] sm:$0xff]  ;;  %v69_v36 = vld [vmem:[%s9863_s6 + $0x18] sm:$0xff]  ;;  %v5718_v37 = vld [vmem:[%s9865_s3 + $0x10] sm:$0xff] }
   0x9   :  { %154 = vmatpush.msra.mxu0 %v90_v6  ;;  %5508 = vmatpush.msra.mxu1 %v90_v6  ;;  %v66_v38 = vld [vmem:[%s9863_s6] sm:$0xff]  ;;  %v5728_v39 = vld [vmem:[%s9865_s3 + $0x18] sm:$0xff] }
   0xa   :  { %4549 = vmatmul.msk.f32.vlgmr.msra.gmra.mxu0 %vm122_vm1, %v94_v7  ;;  %4552 = vmatmul.msk.f32.vlgmr.msra.gmra.mxu1 %vm122_vm1, %v97_v8  ;;  %v5790_v63 = vld [vmem:[%s9866_s5] sm:$0xff]  ;;  %v5795_v0 = vld [vmem:[%s9866_s5 + $0x18] sm:$0xff] }
   0xb   :  { %114 = vperm.xlu0 %5515, %v100_v9   ;;  %104 = vperm.xlu1 %5516, %v98_v10   ;;  %v5826_v10 = vld [vmem:[%s9866_s5 + $0x8] sm:$0xff] }
  0x10   :  { %58 = vperm.xlu2 %5517, %v44_v34  }
  0x12   :  { %4550 = vmatmul.msk.f32.gmra.mxu0 %vm122_vm1, %v95_v11 }
  0x13   :  { %53 = vperm.xlu0 %5515, %v43_v12   ;;  %48 = vperm.xlu1 %5516, %v42_v13  }
  0x18   :  { %87 = vperm.xlu2 %5517, %v69_v36  }
  0x1a   :  { %4551 = vmatmul.msk.f32.gmra.mxu0 %vm122_vm1, %v96_v14 }
  0x1b   :  { %82 = vperm.xlu0 %5515, %v68_v15   ;;  %77 = vperm.xlu1 %5516, %v67_v16   ;;  %v5859_v15 = vld [vmem:[%s9866_s5 + $0x10] sm:$0xff] }
  0x20   :  { %72 = vperm.xlu2 %5517, %v66_v38  }
  0x23   :  { %4530 = vperm.xlu0 %5515, %v4526_v17   ;;  %4535 = vperm.xlu1 %5516, %v4527_v18  }
  0x62   :  { %v5732_v42 = vpop.permute.xlu2 %63 }
  0x6a   :  { %v5736_v46 = vpop.permute.xlu2 %58 }
  0x72   :  { %v5880_v16 = vpop.permute.xlu2 %87 }
  0x74   :  { %v120_v19 = vpop.permute.xlu0 %119  ;;  %v110_v24 = vpop.permute.xlu1 %109 }
  0x7a   :  { %v5899_v34 = vpop.permute.xlu2 %72 }
  0x7d   :  { %v115_v26 = vpop.permute.xlu0 %114  ;;  %v105_v31 = vpop.permute.xlu1 %104 }
  0x85   :  { %v5746_v52 = vpop.permute.xlu0 %53  ;;  %v5754_v56 = vpop.permute.xlu1 %48 }
  0x87   :  { %v156_v20 = vpop.f32.mrf.mxu0  ;;  %v165_v21 = vpop.f32.mrf.mxu1 }
  0x88   :  { %v5668_v22 = vadd.f32 %v165_v21, %v120_v19  ;;  %v5681_v32 = vadd.f32 %v156_v20, %v105_v31 }
  0x8a   :  { %vm180_vm2 = vcmp.gt.f32.partialorder %v5668_v22, 0.5  ;;  %vm177_vm6 = vcmp.gt.f32.partialorder %v5681_v32, 0.5  ;;  %v315_v44 = vmul.f32 0.2, %v5668_v22  ;;  %v312_v54 = vmul.f32 0.2, %v5681_v32 }
  0x8b   :  { %4557 = vmatpush.msk.msrb.mxu1 %vm180_vm2, %v9869_v23 }
  0x8c   :  { %v319_v48 = vadd.f32 %v315_v44, %v5668_v22  ;;  %v316_v61 = vadd.f32 %v312_v54, %v5681_v32 }
  0x8e   :  { %v323_v57 = vsel %vm180_vm2, %v5668_v22, %v319_v48  ;;  %v320_v3 = vsel %vm177_vm6, %v5681_v32, %v316_v61 }
  0x8f   :  { %v159_v25 = vpop.f32.mrf.mxu0  ;;  %v497_v62 = vmul.f32 0.2, %v323_v57  ;;  %vm327_vm11 = vcmp.gt.f32.partialorder %v323_v57, 0.5  ;;  %v494_v7 = vmul.f32 0.2, %v320_v3  ;;  %vm324_vm14 = vcmp.gt.f32.partialorder %v320_v3, 0.5 }
  0x90   :  { %v5674_v28 = vadd.f32 %v159_v25, %v110_v24  ;;  %v5889_v24 = vpop.permute.xlu0 %82  ;;  %v5891_v25 = vpop.permute.xlu1 %77 }
  0x91   :  { %v501_v4 = vadd.f32 %v497_v62, %v5668_v22  ;;  %v498_v12 = vadd.f32 %v494_v7, %v5681_v32 }
  0x92   :  { %vm178_vm4 = vcmp.gt.f32.partialorder %v5674_v28, 0.5  ;;  %v313_v49 = vmul.f32 0.2, %v5674_v28 }
  0x93   :  { %v5819_v8 = vsel %vm327_vm11, %v5668_v22, %v501_v4  ;;  %v5846_v14 = vsel %vm324_vm14, %v5681_v32, %v498_v12 }
  0x94   :  { %v317_v58 = vadd.f32 %v313_v49, %v5674_v28  ;;  %vm509_vm15 = vcmp.gt.f32.partialorder %v5819_v8, 0.5  ;;  %vm506_vm2 = vcmp.gt.f32.partialorder %v5846_v14, 0.5 }
  0x96   :  { %v321_v1 = vsel %vm178_vm4, %v5674_v28, %v317_v58  ;;  %v652_v58 = vmul.f32 0.2, %v5819_v8 }
  0x97   :  { %v162_v27 = vpop.f32.mrf.mxu0  ;;  %v495_v5 = vmul.f32 0.2, %v321_v1  ;;  %vm325_vm13 = vcmp.gt.f32.partialorder %v321_v1, 0.5 }
  0x98   :  { %v5676_v29 = vadd.f32 %v162_v27, %v115_v26  ;;  %v656_v4 = vadd.f32 %v652_v58, %v5668_v22 }
  0x99   :  { %v499_v9 = vadd.f32 %v495_v5, %v5674_v28 }
  0x9a   :  { %vm179_vm3 = vcmp.gt.f32.partialorder %v5676_v29, 0.5  ;;  %v314_v45 = vmul.f32 0.2, %v5676_v29 }
  0x9b   :  { %4558 = vmatpush.msk.msrb.mxu1 %vm179_vm3, %v9869_v23  ;;  %v5835_v13 = vsel %vm325_vm13, %v5674_v28, %v499_v9 }
  0x9c   :  { %v318_v53 = vadd.f32 %v314_v45, %v5676_v29  ;;  %vm507_vm1 = vcmp.gt.f32.partialorder %v5835_v13, 0.5  ;;  %v650_v5 = vmul.f32 0.2, %v5835_v13 }
  0x9d   :  { %4559 = vmatpush.msk.msrb.mxu1 %vm178_vm4, %v9869_v23 }
  0x9e   :  { %v322_v60 = vsel %vm179_vm3, %v5676_v29, %v318_v53  ;;  %v654_v12 = vadd.f32 %v650_v5, %v5674_v28 }
  0x9f   :  { %4560 = vmatpush.msk.msrb.mxu1 %vm177_vm6, %v9869_v23  ;;  %v496_v2 = vmul.f32 0.2, %v322_v60  ;;  %vm326_vm12 = vcmp.gt.f32.partialorder %v322_v60, 0.5 }
  0xa0   :  { %4561 = vmatmul.msk.f32.vlgmr.msrb.gmra.mxu1 %vm189_vm5, %v5694_v33  ;;  %v5969_v8 = vsel %vm507_vm1, %v5674_v28, %v654_v12 }
  0xa1   :  { %v500_v6 = vadd.f32 %v496_v2, %v5676_v29 }
  0xa3   :  { %v5829_v11 = vsel %vm326_vm12, %v5676_v29, %v500_v6 }
  0xa4   :  { %vm508_vm0 = vcmp.gt.f32.partialorder %v5829_v11, 0.5  ;;  %v651_v62 = vmul.f32 0.2, %v5829_v11 }
  0xa8   :  { %4562 = vmatmul.msk.f32.gmra.mxu1 %vm189_vm5, %v5708_v35 }
  0xb0   :  { %4563 = vmatmul.msk.f32.gmra.mxu1 %vm189_vm5, %v5718_v37 }
  0xb8   :  { %4564 = vmatmul.msk.f32.gmra.mxu1 %vm189_vm5, %v5728_v39 }
 0x11d   :  { %v219_v40 = vpop.f32.mrf.mxu1 }
 0x11e   :  { %v5767_v59 = vadd.f32 %v219_v40, %v5754_v56 }
 0x120   :  { %vm239_vm10 = vcmp.gt.f32.partialorder %v5767_v59, 0.5  ;;  %v365_v45 = vmul.f32 0.2, %v5767_v59 }
 0x125   :  { %v222_v41 = vpop.f32.mrf.mxu1 }
 0x126   :  { %v5751_v55 = vadd.f32 %v222_v41, %v5746_v52 }
 0x128   :  { %vm240_vm9 = vcmp.gt.f32.partialorder %v5751_v55, 0.5  ;;  %v366_v48 = vmul.f32 0.2, %v5751_v55 }
 0x12d   :  { %v225_v43 = vpop.f32.mrf.mxu1 }
 0x12e   :  { %v5741_v50 = vadd.f32 %v225_v43, %v5736_v46 }
 0x130   :  { %vm241_vm8 = vcmp.gt.f32.partialorder %v5741_v50, 0.5  ;;  %v367_v43 = vmul.f32 0.2, %v5741_v50  ;;  %v649_v50 = vmul.f32 0.2, %v5846_v14 }
 0x135   :  { %v228_v47 = vpop.f32.mrf.mxu1 }
 0x136   :  { %v5744_v51 = vadd.f32 %v228_v47, %v5732_v42 }
 0x138   :  { %vm242_vm7 = vcmp.gt.f32.partialorder %v5744_v51, 0.5  ;;  %v368_v49 = vmul.f32 0.2, %v5744_v51  ;;  %v655_v51 = vadd.f32 %v651_v62, %v5676_v29 }
 0x139   :  { %4569 = vmatpush.msk.msra.mxu2 %vm242_vm7, %v9869_v23  ;;  %5509 = vmatpush.msk.msra.mxu3 %vm242_vm7, %v9869_v23 }
 0x13b   :  { %4570 = vmatpush.msk.msra.mxu2 %vm241_vm8, %v9869_v23  ;;  %5510 = vmatpush.msk.msra.mxu3 %vm241_vm8, %v9869_v23 }
 0x13d   :  { %4571 = vmatpush.msk.msra.mxu2 %vm240_vm9, %v9869_v23  ;;  %5511 = vmatpush.msk.msra.mxu3 %vm240_vm9, %v9869_v23 }
 0x13f   :  { %4572 = vmatpush.msk.msra.mxu2 %vm239_vm10, %v9869_v23  ;;  %5512 = vmatpush.msk.msra.mxu3 %vm239_vm10, %v9869_v23 }
 0x140   :  { %4573 = vmatmul.msk.f32.vlgmr.msra.gmra.mxu2 %vm189_vm5, %v5790_v63  ;;  %4576 = vmatmul.msk.f32.vlgmr.msra.gmra.mxu3 %vm189_vm5, %v5795_v0 }
 0x141   :  { %4585 = vmatpush.msk.msrb.mxu3 %vm327_vm11, %v9869_v23 }
 0x143   :  { %4586 = vmatpush.msk.msrb.mxu3 %vm326_vm12, %v9869_v23 }
 0x145   :  { %4587 = vmatpush.msk.msrb.mxu3 %vm325_vm13, %v9869_v23 }
 0x147   :  { %4588 = vmatpush.msk.msrb.mxu3 %vm324_vm14, %v9869_v23  ;;  %vm662_vm14 = vcmp.gt.f32.partialorder %v5969_v8, 0.5 }
 0x148   :  { %4574 = vmatmul.msk.f32.gmra.mxu2 %vm189_vm5, %v5826_v10  ;;  %4589 = vmatmul.msk.f32.vlgmr.msrb.gmra.mxu3 %vm189_vm5, %v5694_v33 }
 0x149   :  { %4625 = vmatpush.msk.msra.mxu3 %vm509_vm15, %v9869_v23 }
 0x14b   :  { %4626 = vmatpush.msk.msra.mxu3 %vm508_vm0, %v9869_v23 }
 0x14d   :  { %4627 = vmatpush.msk.msra.mxu3 %vm507_vm1, %v9869_v23 }
 0x14f   :  { %4628 = vmatpush.msk.msra.mxu3 %vm506_vm2, %v9869_v23 }
 0x150   :  { %4575 = vmatmul.msk.f32.gmra.mxu2 %vm189_vm5, %v5859_v15  ;;  %4590 = vmatmul.msk.f32.gmra.mxu3 %vm189_vm5, %v5708_v35 }
 0x158   :  { %4591 = vmatmul.msk.f32.gmra.mxu3 %vm189_vm5, %v5718_v37 }
 0x160   :  { %4592 = vmatmul.msk.f32.gmra.mxu3 %vm189_vm5, %v5728_v39 }
 0x168   :  { %4629 = vmatmul.msk.f32.vlgmr.msra.gmra.mxu3 %vm189_vm5, %v5694_v33 }
 0x170   :  { %4630 = vmatmul.msk.f32.gmra.mxu3 %vm189_vm5, %v5708_v35 }
 0x178   :  { %4631 = vmatmul.msk.f32.gmra.mxu3 %vm189_vm5, %v5718_v37 }
 0x180   :  { %4632 = vmatmul.msk.f32.gmra.mxu3 %vm189_vm5, %v5728_v39 }
 0x1c3   :  { %v280_v17 = vpop.f32.mrf.mxu2  ;;  %v289_v18 = vpop.f32.mrf.mxu3 }
 0x1c4   :  { %v5883_v19 = vadd.f32 %v289_v18, %v5880_v16  ;;  %v5902_v36 = vadd.f32 %v280_v17, %v5899_v34  ;;  %v5949_v17 = vsel %vm509_vm15, %v5668_v22, %v656_v4  ;;  %v653_v18 = vadd.f32 %v649_v50, %v5681_v32 }
 0x1c6   :  { %vm303_vm3 = vcmp.gt.f32.partialorder %v5883_v19, 0.5  ;;  %vm300_vm11 = vcmp.gt.f32.partialorder %v5902_v36, 0.5  ;;  %v421_v4 = vmul.f32 0.2, %v5883_v19 }
 0x1c7   :  { %4615 = vmatpush.msk.msrb.mxu2 %vm303_vm3, %v9869_v23 }
 0x1cb   :  { %v283_v20 = vpop.f32.mrf.mxu2  ;;  %v353_v21 = vpop.f32.mrf.mxu3 }
 0x1cc   :  { %v5894_v27 = vadd.f32 %v283_v20, %v5891_v25  ;;  %v354_v41 = vadd.f32 %v353_v21, %v5754_v56  ;;  %v5958_v21 = vsel %vm508_vm0, %v5676_v29, %v655_v51 }
 0x1ce   :  { %vm301_vm6 = vcmp.gt.f32.partialorder %v5894_v27, 0.5  ;;  %v369_v57 = vadd.f32 %v365_v45, %v354_v41 }
 0x1d0   :  { %v373_v3 = vsel %vm239_vm10, %v354_v41, %v369_v57  ;;  %vm663_vm10 = vcmp.gt.f32.partialorder %v5958_v21, 0.5  ;;  %v6017_v57 = vld [vmem:[%s9867_s7] sm:$0xff] }
 0x1d1   :  { %v547_v59 = vmul.f32 0.2, %v373_v3 }
 0x1d3   :  { %v286_v26 = vpop.f32.mrf.mxu2  ;;  %v356_v31 = vpop.f32.mrf.mxu3 }
 0x1d4   :  { %v5897_v30 = vadd.f32 %v286_v26, %v5889_v24  ;;  %v357_v44 = vadd.f32 %v356_v31, %v5746_v52 }
 0x1d6   :  { %vm302_vm4 = vcmp.gt.f32.partialorder %v5897_v30, 0.5  ;;  %v370_v60 = vadd.f32 %v366_v48, %v357_v44 }
 0x1d7   :  { %4616 = vmatpush.msk.msrb.mxu2 %vm302_vm4, %v9869_v23 }
 0x1d8   :  { %v374_v6 = vsel %vm240_vm9, %v357_v44, %v370_v60  ;;  %vm664_vm9 = vcmp.gt.f32.partialorder %v5949_v17, 0.5  ;;  %v6024_v60 = vld [vmem:[%s9867_s7 + $0x8] sm:$0x3] }
 0x1d9   :  { %4617 = vmatpush.msk.msrb.mxu2 %vm301_vm6, %v9869_v23  ;;  %v548_v11 = vmul.f32 0.2, %v374_v6 }
 0x1db   :  { %4618 = vmatpush.msk.msrb.mxu2 %vm300_vm11, %v9869_v23  ;;  %v359_v38 = vpop.f32.mrf.mxu3 }
 0x1dc   :  { %v360_v40 = vadd.f32 %v359_v38, %v5736_v46  ;;  %v5979_v38 = vsel %vm506_vm2, %v5681_v32, %v653_v18  ;;  %4619 = vmatmul.msk.f32.vlgmr.msrb.gmra.mxu2 %vm189_vm5, %v6017_v57 }
 0x1dd   :  { %vm661_vm15 = vcmp.gt.f32.partialorder %v5979_v38, 0.5 }
 0x1de   :  { %v371_v53 = vadd.f32 %v367_v43, %v360_v40 }
 0x1e0   :  { %v375_v2 = vsel %vm241_vm8, %v360_v40, %v371_v53  ;;  %vm377_vm8 = vcmp.gt.f32.partialorder %v373_v3, 0.5 }
 0x1e1   :  { %vm379_vm13 = vcmp.gt.f32.partialorder %v375_v2, 0.5  ;;  %v549_v41 = vmul.f32 0.2, %v375_v2  ;;  %v420_v2 = vmul.f32 0.2, %v5897_v30 }
 0x1e3   :  { %v362_v47 = vpop.f32.mrf.mxu3 }
 0x1e4   :  { %v363_v54 = vadd.f32 %v362_v47, %v5732_v42  ;;  %4620 = vmatmul.msk.f32.gmra.mxu2 %vm189_vm5, %v6024_v60 }
 0x1e6   :  { %v372_v61 = vadd.f32 %v368_v49, %v363_v54 }
 0x1e8   :  { %v376_v1 = vsel %vm242_vm7, %v363_v54, %v372_v61  ;;  %vm378_vm7 = vcmp.gt.f32.partialorder %v374_v6, 0.5  ;;  %v419_v6 = vmul.f32 0.2, %v5894_v27 }
 0x1e9   :  { %vm380_vm12 = vcmp.gt.f32.partialorder %v376_v1, 0.5  ;;  %v550_v48 = vmul.f32 0.2, %v376_v1 }
 0x1ea   :  { %4597 = vmatpush.msk.msrb.mxu0 %vm380_vm12, %v9869_v23 }
 0x1eb   :  { %v535_v7 = vpop.f32.mrf.mxu3 }
 0x1ec   :  { %v536_v9 = vadd.f32 %v535_v7, %v5754_v56  ;;  %4598 = vmatpush.msk.msrb.mxu0 %vm379_vm13, %v9869_v23 }
 0x1ee   :  { %4599 = vmatpush.msk.msrb.mxu0 %vm378_vm7, %v9869_v23  ;;  %v551_v55 = vadd.f32 %v547_v59, %v536_v9 }
 0x1f0   :  { %4600 = vmatpush.msk.msrb.mxu0 %vm377_vm8, %v9869_v23  ;;  %v5953_v20 = vsel %vm377_vm8, %v536_v9, %v551_v55  ;;  %v418_v9 = vmul.f32 0.2, %v5902_v36 }
 0x1f1   :  { %4601 = vmatmul.msk.f32.vlgmr.msrb.gmra.mxu0 %vm189_vm5, %v5790_v63  ;;  %v702_v19 = vmul.f32 0.2, %v5953_v20 }
 0x1f2   :  { %4659 = vmatpush.msk.msra.mxu0 %vm664_vm9, %v9869_v23 }
 0x1f3   :  { %v538_v26 = vpop.f32.mrf.mxu3 }
 0x1f4   :  { %v539_v31 = vadd.f32 %v538_v26, %v5746_v52  ;;  %4660 = vmatpush.msk.msra.mxu0 %vm663_vm10, %v9869_v23 }
 0x1f6   :  { %v552_v13 = vadd.f32 %v548_v11, %v539_v31  ;;  %4661 = vmatpush.msk.msra.mxu0 %vm662_vm14, %v9869_v23 }
 0x1f8   :  { %v5987_v40 = vsel %vm378_vm7, %v539_v31, %v552_v13  ;;  %4662 = vmatpush.msk.msra.mxu0 %vm661_vm15, %v9869_v23 }
 0x1f9   :  { %4602 = vmatmul.msk.f32.gmra.mxu0 %vm189_vm5, %v5826_v10 }
 0x1fb   :  { %v541_v14 = vpop.f32.mrf.mxu3 }
 0x1fc   :  { %v542_v43 = vadd.f32 %v541_v14, %v5736_v46  ;;  %v807_v14 = vmul.f32 0.2, %v5949_v17 }
 0x1fe   :  { %v553_v44 = vadd.f32 %v549_v41, %v542_v43  ;;  %v806_v41 = vmul.f32 0.2, %v5958_v21 }
 0x200   :  { %v5996_v45 = vsel %vm379_vm13, %v542_v43, %v553_v44  ;;  %v811_v43 = vadd.f32 %v807_v14, %v5668_v22  ;;  %v805_v44 = vmul.f32 0.2, %v5969_v8 }
 0x201   :  { %4603 = vmatmul.msk.f32.gmra.mxu0 %vm189_vm5, %v5859_v15 }
 0x203   :  { %v544_v47 = vpop.f32.mrf.mxu3 }
 0x204   :  { %v545_v49 = vadd.f32 %v544_v47, %v5732_v42  ;;  %v810_v47 = vadd.f32 %v806_v41, %v5676_v29 }
 0x206   :  { %v554_v53 = vadd.f32 %v550_v48, %v545_v49  ;;  %v804_v48 = vmul.f32 0.2, %v5979_v38 }
 0x208   :  { %v6002_v54 = vsel %vm380_vm12, %v545_v49, %v554_v53  ;;  %vm560_vm12 = vcmp.gt.f32.partialorder %v5987_v40, 0.5 }
 0x209   :  { %4604 = vmatmul.msk.f32.gmra.mxu0 %vm189_vm5, %v5795_v0 }
 0x211   :  { %4663 = vmatmul.msk.f32.vlgmr.msra.gmra.mxu0 %vm189_vm5, %v5694_v33 }
 0x219   :  { %4664 = vmatmul.msk.f32.gmra.mxu0 %vm189_vm5, %v5708_v35 }
 0x221   :  { %4665 = vmatmul.msk.f32.gmra.mxu0 %vm189_vm5, %v5718_v37 }
 0x229   :  { %4666 = vmatmul.msk.f32.gmra.mxu0 %vm189_vm5, %v5728_v39 }
 0x26e   :  { %v406_v58 = vpop.f32.mrf.mxu0 }
 0x26f   :  { %v407_v7 = vadd.f32 %v406_v58, %v5899_v34  ;;  %v703_v58 = vmul.f32 0.2, %v5987_v40  ;;  %v704_v40 = vmul.f32 0.2, %v5996_v45 }
 0x271   :  { %v422_v55 = vadd.f32 %v418_v9, %v407_v7 }
 0x273   :  { %v6060_v30 = vsel %vm300_vm11, %v407_v7, %v422_v55  ;;  %vm561_vm11 = vcmp.gt.f32.partialorder %v5996_v45, 0.5 }
 0x276   :  { %v409_v61 = vpop.f32.mrf.mxu0 }
 0x277   :  { %v410_v3 = vadd.f32 %v409_v61, %v5891_v25  ;;  %v809_v61 = vadd.f32 %v805_v44, %v5674_v28 }
 0x279   :  { %v423_v59 = vadd.f32 %v419_v6, %v410_v3  ;;  %v6119_v17 = vsel %vm662_vm14, %v5674_v28, %v809_v61 }
 0x27a   :  { %vm817_vm8 = vcmp.gt.f32.partialorder %v6119_v17, 0.5 }
 0x27b   :  { %v6050_v11 = vsel %vm301_vm6, %v410_v3, %v423_v59  ;;  %vm562_vm6 = vcmp.gt.f32.partialorder %v6002_v54, 0.5  ;;  %v6105_v3 = vsel %vm663_vm10, %v5676_v29, %v810_v47 }
 0x27c   :  { %vm431_vm2 = vcmp.gt.f32.partialorder %v6050_v11, 0.5  ;;  %vm818_vm7 = vcmp.gt.f32.partialorder %v6105_v3, 0.5  ;;  %v601_v14 = vmul.f32 0.2, %v6050_v11 }
 0x27e   :  { %v412_v62 = vpop.f32.mrf.mxu0 }
 0x27f   :  { %v413_v1 = vadd.f32 %v412_v62, %v5889_v24  ;;  %v6098_v62 = vsel %vm664_vm9, %v5668_v22, %v811_v43 }
 0x280   :  { %vm819_vm13 = vcmp.gt.f32.partialorder %v6098_v62, 0.5 }
 0x281   :  { %v424_v51 = vadd.f32 %v420_v2, %v413_v1  ;;  %v808_v2 = vadd.f32 %v804_v48, %v5681_v32  ;;  %v600_v48 = vmul.f32 0.2, %v6060_v30 }
 0x283   :  { %v6042_v26 = vsel %vm302_vm4, %v413_v1, %v424_v51  ;;  %vm559_vm4 = vcmp.gt.f32.partialorder %v5953_v20, 0.5  ;;  %v6130_v21 = vsel %vm661_vm15, %v5681_v32, %v808_v2  ;;  %v705_v51 = vmul.f32 0.2, %v6002_v54 }
 0x284   :  { %vm432_vm1 = vcmp.gt.f32.partialorder %v6042_v26, 0.5  ;;  %vm816_vm9 = vcmp.gt.f32.partialorder %v6130_v21, 0.5 }
 0x286   :  { %v415_v5 = vpop.f32.mrf.mxu0 }
 0x287   :  { %v416_v50 = vadd.f32 %v415_v5, %v5880_v16 }
 0x289   :  { %v425_v12 = vadd.f32 %v421_v4, %v416_v50 }
 0x28b   :  { %v6038_v18 = vsel %vm303_vm3, %v416_v50, %v425_v12  ;;  %vm430_vm3 = vcmp.gt.f32.partialorder %v6060_v30, 0.5 }
 0x28c   :  { %vm433_vm0 = vcmp.gt.f32.partialorder %v6038_v18, 0.5  ;;  %v603_v47 = vmul.f32 0.2, %v6038_v18 }
 0x28d   :  { %4609 = vmatpush.msk.msra.mxu1 %vm433_vm0, %v9869_v23 }
 0x28e   :  { %v690_v31 = vpop.f32.mrf.mxu0 }
 0x28f   :  { %v691_v13 = vadd.f32 %v690_v31, %v5754_v56  ;;  %4610 = vmatpush.msk.msra.mxu1 %vm432_vm1, %v9869_v23 }
 0x291   :  { %v706_v27 = vadd.f32 %v702_v19, %v691_v13  ;;  %4611 = vmatpush.msk.msra.mxu1 %vm431_vm2, %v9869_v23  ;;  %v602_v19 = vmul.f32 0.2, %v6042_v26 }
 0x293   :  { %4612 = vmatpush.msk.msra.mxu1 %vm430_vm3, %v9869_v23  ;;  %v6075_v36 = vsel %vm559_vm4, %v691_v13, %v706_v27 }
 0x294   :  { %4613 = vmatmul.msk.f32.vlgmr.msra.gmra.mxu1 %vm189_vm5, %v6017_v57 }
 0x295   :  { %4637 = vmatpush.msk.msrb.mxu1 %vm562_vm6, %v9869_v23 }
 0x296   :  { %v693_v49 = vpop.f32.mrf.mxu0 }
 0x297   :  { %4638 = vmatpush.msk.msrb.mxu1 %vm561_vm11, %v9869_v23  ;;  %v694_v53 = vadd.f32 %v693_v49, %v5746_v52 }
 0x299   :  { %v707_v1 = vadd.f32 %v703_v58, %v694_v53  ;;  %4639 = vmatpush.msk.msrb.mxu1 %vm560_vm12, %v9869_v23 }
 0x29b   :  { %v6107_v4 = vsel %vm560_vm12, %v694_v53, %v707_v1  ;;  %4640 = vmatpush.msk.msrb.mxu1 %vm559_vm4, %v9869_v23 }
 0x29c   :  { %4614 = vmatmul.msk.f32.gmra.mxu1 %vm189_vm5, %v6024_v60  ;;  %vm715_vm4 = vcmp.gt.f32.partialorder %v6107_v4, 0.5 }
 0x29d   :  { %4693 = vmatpush.msk.msra.mxu1 %vm819_vm13, %v9869_v23 }
 0x29e   :  { %v696_v20 = vpop.f32.mrf.mxu0 }
 0x29f   :  { %4694 = vmatpush.msk.msra.mxu1 %vm818_vm7, %v9869_v23  ;;  %v697_v8 = vadd.f32 %v696_v20, %v5736_v46 }
 0x2a1   :  { %4695 = vmatpush.msk.msra.mxu1 %vm817_vm8, %v9869_v23  ;;  %v708_v5 = vadd.f32 %v704_v40, %v697_v8  ;;  %v857_v40 = vmul.f32 0.2, %v6075_v36 }
 0x2a3   :  { %4696 = vmatpush.msk.msra.mxu1 %vm816_vm9, %v9869_v23  ;;  %v6144_v38 = vsel %vm561_vm11, %v697_v8, %v708_v5  ;;  %v962_v8 = vmul.f32 0.2, %v6098_v62  ;;  %v961_v5 = vmul.f32 0.2, %v6105_v3 }
 0x2a4   :  { %4641 = vmatmul.msk.f32.vlgmr.msrb.gmra.mxu1 %vm189_vm5, %v5790_v63 }
 0x2a6   :  { %v699_v6 = vpop.f32.mrf.mxu0 }
 0x2a7   :  { %v700_v7 = vadd.f32 %v699_v6, %v5732_v42  ;;  %v966_v6 = vadd.f32 %v962_v8, %v5668_v22 }
 0x2a9   :  { %v709_v50 = vadd.f32 %v705_v51, %v700_v7  ;;  %v965_v51 = vadd.f32 %v961_v5, %v5676_v29 }
 0x2ab   :  { %v6152_v9 = vsel %vm562_vm6, %v700_v7, %v709_v50  ;;  %v960_v7 = vmul.f32 0.2, %v6119_v17  ;;  %v959_v50 = vmul.f32 0.2, %v6130_v21 }
 0x2ac   :  { %4642 = vmatmul.msk.f32.gmra.mxu1 %vm189_vm5, %v5826_v10 }
 0x2b4   :  { %4643 = vmatmul.msk.f32.gmra.mxu1 %vm189_vm5, %v5859_v15 }
 0x2bc   :  { %4644 = vmatmul.msk.f32.gmra.mxu1 %vm189_vm5, %v5795_v0 }
 0x2c4   :  { %4697 = vmatmul.msk.f32.vlgmr.msra.gmra.mxu1 %vm189_vm5, %v5694_v33 }
 0x2cc   :  { %4698 = vmatmul.msk.f32.gmra.mxu1 %vm189_vm5, %v5708_v35 }
 0x2d4   :  { %4699 = vmatmul.msk.f32.gmra.mxu1 %vm189_vm5, %v5718_v37 }
 0x2dc   :  { %4700 = vmatmul.msk.f32.gmra.mxu1 %vm189_vm5, %v5728_v39 }
 0x311   :  { %v6168_v45 = vpop.f32.mrf.mxu1 }
 0x319   :  { %v6170_v54 = vpop.f32.mrf.mxu1 }
 0x321   :  { %v588_v59 = vpop.f32.mrf.mxu1 }
 0x322   :  { %v589_v41 = vadd.f32 %v588_v59, %v5899_v34 }
 0x324   :  { %v604_v58 = vadd.f32 %v600_v48, %v589_v41  ;;  %v860_v48 = vmul.f32 0.2, %v6152_v9 }
 0x326   :  { %v6204_v26 = vsel %vm430_vm3, %v589_v41, %v604_v58  ;;  %vm716_vm3 = vcmp.gt.f32.partialorder %v6144_v38, 0.5 }
 0x329   :  { %v591_v12 = vpop.f32.mrf.mxu1 }
 0x32a   :  { %v592_v13 = vadd.f32 %v591_v12, %v5891_v25 }
 0x32c   :  { %v605_v49 = vadd.f32 %v601_v14, %v592_v13  ;;  %v963_v14 = vadd.f32 %v959_v50, %v5681_v32 }
 0x32e   :  { %v6194_v2 = vsel %vm431_vm2, %v592_v13, %v605_v49  ;;  %vm717_vm2 = vcmp.gt.f32.partialorder %v6152_v9, 0.5  ;;  %v6274_v3 = vsel %vm816_vm9, %v5681_v32, %v963_v14 }
 0x32f   :  { %vm613_vm15 = vcmp.gt.f32.partialorder %v6194_v2, 0.5 }
 0x331   :  { %v594_v55 = vpop.f32.mrf.mxu1 }
 0x332   :  { %v595_v31 = vadd.f32 %v594_v55, %v5889_v24  ;;  %v858_v55 = vmul.f32 0.2, %v6107_v4  ;;  %v859_v4 = vmul.f32 0.2, %v6144_v38  ;;  %v6312_v38 = vpop.f32.mrf.mxu2 }
 0x334   :  { %v606_v43 = vadd.f32 %v602_v19, %v595_v31  ;;  %v6242_v19 = vsel %vm819_vm13, %v5668_v22, %v966_v6  ;;  %vm971_vm13 = vcmp.gt.f32.partialorder %v6274_v3, 0.5 }
 0x335   :  { %vm974_vm6 = vcmp.gt.f32.partialorder %v6242_v19, 0.5 }
 0x336   :  { %v6186_v1 = vsel %vm432_vm1, %v595_v31, %v606_v43  ;;  %vm714_vm1 = vcmp.gt.f32.partialorder %v6075_v36, 0.5  ;;  %v964_v31 = vadd.f32 %v960_v7, %v5674_v28  ;;  %v756_v7 = vmul.f32 0.2, %v6194_v2 }
 0x337   :  { %vm614_vm14 = vcmp.gt.f32.partialorder %v6186_v1, 0.5  ;;  %v757_v5 = vmul.f32 0.2, %v6186_v1 }
 0x338   :  { %v6263_v62 = vsel %vm817_vm8, %v5674_v28, %v964_v31  ;;  %v755_v31 = vmul.f32 0.2, %v6204_v26 }
 0x339   :  { %v597_v27 = vpop.f32.mrf.mxu1  ;;  %vm972_vm12 = vcmp.gt.f32.partialorder %v6263_v62, 0.5 }
 0x33a   :  { %v598_v44 = vadd.f32 %v597_v27, %v5880_v16  ;;  %v6249_v27 = vsel %vm818_vm7, %v5676_v29, %v965_v51  ;;  %v6314_v9 = vpop.f32.mrf.mxu2 }
 0x33b   :  { %vm973_vm11 = vcmp.gt.f32.partialorder %v6249_v27, 0.5 }
 0x33c   :  { %v607_v53 = vadd.f32 %v603_v47, %v598_v44 }
 0x33e   :  { %v6182_v61 = vsel %vm433_vm0, %v598_v44, %v607_v53  ;;  %vm612_vm0 = vcmp.gt.f32.partialorder %v6204_v26, 0.5 }
 0x33f   :  { %vm615_vm10 = vcmp.gt.f32.partialorder %v6182_v61, 0.5 }
 0x340   :  { %4649 = vmatpush.msk.msra.mxu2 %vm615_vm10, %v9869_v23 }
 0x341   :  { %v845_v20 = vpop.f32.mrf.mxu1 }
 0x342   :  { %v846_v18 = vadd.f32 %v845_v20, %v5754_v56  ;;  %4650 = vmatpush.msk.msra.mxu2 %vm614_vm14, %v9869_v23 }
 0x344   :  { %v861_v11 = vadd.f32 %v857_v40, %v846_v18  ;;  %4651 = vmatpush.msk.msra.mxu2 %vm613_vm15, %v9869_v23 }
 0x346   :  { %4652 = vmatpush.msk.msra.mxu2 %vm612_vm0, %v9869_v23  ;;  %v6219_v30 = vsel %vm714_vm1, %v846_v18, %v861_v11 }
 0x347   :  { %4653 = vmatmul.msk.f32.vlgmr.msra.gmra.mxu2 %vm189_vm5, %v6017_v57 }
 0x348   :  { %4671 = vmatpush.msk.msrb.mxu2 %vm717_vm2, %v9869_v23 }
 0x349   :  { %v848_v59 = vpop.f32.mrf.mxu1 }
 0x34a   :  { %4672 = vmatpush.msk.msrb.mxu2 %vm716_vm3, %v9869_v23  ;;  %v849_v12 = vadd.f32 %v848_v59, %v5746_v52 }
 0x34c   :  { %v862_v13 = vadd.f32 %v858_v55, %v849_v12  ;;  %4673 = vmatpush.msk.msrb.mxu2 %vm715_vm4, %v9869_v23  ;;  %v758_v55 = vmul.f32 0.2, %v6182_v61 }
 0x34e   :  { %v6251_v41 = vsel %vm715_vm4, %v849_v12, %v862_v13  ;;  %4674 = vmatpush.msk.msrb.mxu2 %vm714_vm1, %v9869_v23 }
 0x34f   :  { %4654 = vmatmul.msk.f32.gmra.mxu2 %vm189_vm5, %v6024_v60  ;;  %vm870_vm1 = vcmp.gt.f32.partialorder %v6251_v41, 0.5 }
 0x350   :  { %4727 = vmatpush.msk.msra.mxu2 %vm974_vm6, %v9869_v23 }
 0x351   :  { %v851_v36 = vpop.f32.mrf.mxu1 }
 0x352   :  { %4728 = vmatpush.msk.msra.mxu2 %vm973_vm11, %v9869_v23  ;;  %v852_v17 = vadd.f32 %v851_v36, %v5736_v46 }
 0x354   :  { %4729 = vmatpush.msk.msra.mxu2 %vm972_vm12, %v9869_v23  ;;  %v863_v43 = vadd.f32 %v859_v4, %v852_v17 }
 0x356   :  { %4730 = vmatpush.msk.msra.mxu2 %vm971_vm13, %v9869_v23  ;;  %v6288_v21 = vsel %vm716_vm3, %v852_v17, %v863_v43 }
 0x357   :  { %4675 = vmatmul.msk.f32.vlgmr.msrb.gmra.mxu2 %vm189_vm5, %v5790_v63 }
 0x359   :  { %v854_v44 = vpop.f32.mrf.mxu1 }
 0x35a   :  { %v855_v47 = vadd.f32 %v854_v44, %v5732_v42 }
 0x35c   :  { %v864_v49 = vadd.f32 %v860_v48, %v855_v47  ;;  %v1117_v48 = vmul.f32 0.2, %v6242_v19 }
 0x35e   :  { %v6296_v53 = vsel %vm717_vm2, %v855_v47, %v864_v49  ;;  %v1012_v47 = vmul.f32 0.2, %v6219_v30  ;;  %v1116_v49 = vmul.f32 0.2, %v6249_v27 }
 0x35f   :  { %4676 = vmatmul.msk.f32.gmra.mxu2 %vm189_vm5, %v5826_v10 }
 0x367   :  { %4677 = vmatmul.msk.f32.gmra.mxu2 %vm189_vm5, %v5859_v15 }
 0x36f   :  { %4678 = vmatmul.msk.f32.gmra.mxu2 %vm189_vm5, %v5795_v0 }
 0x377   :  { %4731 = vmatmul.msk.f32.vlgmr.msra.gmra.mxu2 %vm189_vm5, %v5694_v33 }
 0x37f   :  { %4732 = vmatmul.msk.f32.gmra.mxu2 %vm189_vm5, %v5708_v35 }
 0x387   :  { %4733 = vmatmul.msk.f32.gmra.mxu2 %vm189_vm5, %v5718_v37 }
 0x38f   :  { %4734 = vmatmul.msk.f32.gmra.mxu2 %vm189_vm5, %v5728_v39 }
 0x3ca   :  { %v6316_v58 = vpop.f32.mrf.mxu2 }
 0x3d2   :  { %v6318_v20 = vpop.f32.mrf.mxu2 }
 0x3da   :  { %v743_v18 = vpop.f32.mrf.mxu2 }
 0x3db   :  { %v744_v50 = vadd.f32 %v743_v18, %v5899_v34  ;;  %v1121_v18 = vadd.f32 %v1117_v48, %v5668_v22 }
 0x3dd   :  { %v759_v36 = vadd.f32 %v755_v31, %v744_v50 }
 0x3df   :  { %v6352_v1 = vsel %vm612_vm0, %v744_v50, %v759_v36  ;;  %vm871_vm0 = vcmp.gt.f32.partialorder %v6288_v21, 0.5  ;;  %v6390_v50 = vsel %vm974_vm6, %v5668_v22, %v1121_v18 }
 0x3e0   :  { %vm1129_vm2 = vcmp.gt.f32.partialorder %v6390_v50, 0.5 }
 0x3e2   :  { %v746_v40 = vpop.f32.mrf.mxu2 }
 0x3e3   :  { %v747_v6 = vadd.f32 %v746_v40, %v5891_v25  ;;  %v1115_v40 = vmul.f32 0.2, %v6263_v62 }
 0x3e5   :  { %v760_v13 = vadd.f32 %v756_v7, %v747_v6  ;;  %v1013_v7 = vmul.f32 0.2, %v6251_v41  ;;  %v1014_v41 = vmul.f32 0.2, %v6288_v21 }
 0x3e7   :  { %v6342_v43 = vsel %vm613_vm15, %v747_v6, %v760_v13  ;;  %vm872_vm15 = vcmp.gt.f32.partialorder %v6296_v53, 0.5 }
 0x3e8   :  { %vm768_vm9 = vcmp.gt.f32.partialorder %v6342_v43, 0.5 }
 0x3ea   :  { %v749_v8 = vpop.f32.mrf.mxu2 }
 0x3eb   :  { %v750_v11 = vadd.f32 %v749_v8, %v5889_v24  ;;  %v1120_v8 = vadd.f32 %v1116_v49, %v5676_v29 }
 0x3ed   :  { %v761_v59 = vadd.f32 %v757_v5, %v750_v11 }
 0x3ef   :  { %v6334_v17 = vsel %vm614_vm14, %v750_v11, %v761_v59  ;;  %vm869_vm14 = vcmp.gt.f32.partialorder %v6219_v30, 0.5  ;;  %v1114_v11 = vmul.f32 0.2, %v6274_v3 }
 0x3f0   :  { %vm769_vm8 = vcmp.gt.f32.partialorder %v6334_v17, 0.5 }
 0x3f2   :  { %v752_v51 = vpop.f32.mrf.mxu2 }
 0x3f3   :  { %v753_v12 = vadd.f32 %v752_v51, %v5880_v16  ;;  %v1119_v51 = vadd.f32 %v1115_v40, %v5674_v28 }
 0x3f5   :  { %v762_v14 = vadd.f32 %v758_v55, %v753_v12  ;;  %v6397_v55 = vsel %vm973_vm11, %v5676_v29, %v1120_v8  ;;  %v6411_v19 = vsel %vm972_vm12, %v5674_v28, %v1119_v51 }
 0x3f6   :  { %vm1128_vm3 = vcmp.gt.f32.partialorder %v6397_v55, 0.5  ;;  %vm1127_vm4 = vcmp.gt.f32.partialorder %v6411_v19, 0.5 }
 0x3f7   :  { %v6330_v4 = vsel %vm615_vm10, %v753_v12, %v762_v14  ;;  %vm767_vm10 = vcmp.gt.f32.partialorder %v6352_v1, 0.5  ;;  %v1118_v12 = vadd.f32 %v1114_v11, %v5681_v32 }
 0x3f8   :  { %vm770_vm7 = vcmp.gt.f32.partialorder %v6330_v4, 0.5 }
 0x3f9   :  { %4683 = vmatpush.msk.msrb.mxu3 %vm770_vm7, %v9869_v23  ;;  %v6422_v27 = vsel %vm971_vm13, %v5681_v32, %v1118_v12 }
 0x3fa   :  { %v1000_v44 = vpop.f32.mrf.mxu2  ;;  %vm1126_vm6 = vcmp.gt.f32.partialorder %v6422_v27, 0.5 }
 0x3fb   :  { %v1001_v61 = vadd.f32 %v1000_v44, %v5754_v56  ;;  %4684 = vmatpush.msk.msrb.mxu3 %vm769_vm8, %v9869_v23  ;;  %v1015_v44 = vmul.f32 0.2, %v6296_v53 }
 0x3fd   :  { %v1016_v2 = vadd.f32 %v1012_v47, %v1001_v61  ;;  %4685 = vmatpush.msk.msrb.mxu3 %vm768_vm9, %v9869_v23 }
 0x3ff   :  { %4686 = vmatpush.msk.msrb.mxu3 %vm767_vm10, %v9869_v23  ;;  %v6367_v26 = vsel %vm869_vm14, %v1001_v61, %v1016_v2 }
 0x400   :  { %4687 = vmatmul.msk.f32.vlgmr.msrb.gmra.mxu3 %vm189_vm5, %v6017_v57 }
 0x401   :  { %4705 = vmatpush.msk.msra.mxu3 %vm872_vm15, %v9869_v23 }
 0x402   :  { %v1003_v5 = vpop.f32.mrf.mxu2 }
 0x403   :  { %4706 = vmatpush.msk.msra.mxu3 %vm871_vm0, %v9869_v23  ;;  %v1004_v6 = vadd.f32 %v1003_v5, %v5746_v52  ;;  %v913_v5 = vmul.f32 0.2, %v6330_v4 }
 0x405   :  { %v1017_v59 = vadd.f32 %v1013_v7, %v1004_v6  ;;  %4707 = vmatpush.msk.msra.mxu3 %vm870_vm1, %v9869_v23 }
 0x407   :  { %v6399_v31 = vsel %vm870_vm1, %v1004_v6, %v1017_v59  ;;  %4708 = vmatpush.msk.msra.mxu3 %vm869_vm14, %v9869_v23  ;;  %v910_v6 = vmul.f32 0.2, %v6352_v1 }
 0x408   :  { %4688 = vmatmul.msk.f32.gmra.mxu3 %vm189_vm5, %v6024_v60  ;;  %vm1025_vm14 = vcmp.gt.f32.partialorder %v6399_v31, 0.5 }
 0x409   :  { %4761 = vmatpush.msk.msrb.mxu3 %vm1129_vm2, %v9869_v23 }
 0x40a   :  { %v1006_v30 = vpop.f32.mrf.mxu2 }
 0x40b   :  { %4762 = vmatpush.msk.msrb.mxu3 %vm1128_vm3, %v9869_v23  ;;  %v1007_v62 = vadd.f32 %v1006_v30, %v5736_v46 }
 0x40d   :  { %4763 = vmatpush.msk.msrb.mxu3 %vm1127_vm4, %v9869_v23  ;;  %v1018_v13 = vadd.f32 %v1014_v41, %v1007_v62 }
 0x40f   :  { %4764 = vmatpush.msk.msrb.mxu3 %vm1126_vm6, %v9869_v23  ;;  %v6436_v3 = vsel %vm871_vm0, %v1007_v62, %v1018_v13  ;;  %v1167_v13 = vmul.f32 0.2, %v6367_v26 }
 0x410   :  { %4709 = vmatmul.msk.f32.vlgmr.msra.gmra.mxu3 %vm189_vm5, %v5790_v63 }
 0x412   :  { %v1009_v14 = vpop.f32.mrf.mxu2 }
 0x413   :  { %v1010_v36 = vadd.f32 %v1009_v14, %v5732_v42  ;;  %v1272_v14 = vmul.f32 0.2, %v6390_v50 }
 0x415   :  { %v1019_v61 = vadd.f32 %v1015_v44, %v1010_v36  ;;  %v1276_v44 = vadd.f32 %v1272_v14, %v5668_v22 }
 0x417   :  { %v6444_v47 = vsel %vm872_vm15, %v1010_v36, %v1019_v61  ;;  %v1271_v36 = vmul.f32 0.2, %v6397_v55  ;;  %v1270_v61 = vmul.f32 0.2, %v6411_v19 }
 0x418   :  { %4710 = vmatmul.msk.f32.gmra.mxu3 %vm189_vm5, %v5826_v10 }
 0x420   :  { %4711 = vmatmul.msk.f32.gmra.mxu3 %vm189_vm5, %v5859_v15 }
 0x428   :  { %4712 = vmatmul.msk.f32.gmra.mxu3 %vm189_vm5, %v5795_v0 }
 0x430   :  { %4765 = vmatmul.msk.f32.vlgmr.msrb.gmra.mxu3 %vm189_vm5, %v5694_v33  ;;  %v912_v33 = vmul.f32 0.2, %v6334_v17 }
 0x438   :  { %4766 = vmatmul.msk.f32.gmra.mxu3 %vm189_vm5, %v5708_v35  ;;  %v911_v35 = vmul.f32 0.2, %v6342_v43 }
 0x440   :  { %4767 = vmatmul.msk.f32.gmra.mxu3 %vm189_vm5, %v5718_v37 }
 0x448   :  { %4768 = vmatmul.msk.f32.gmra.mxu3 %vm189_vm5, %v5728_v39 }
 0x483   :  { %v6460_v21 = vpop.f32.mrf.mxu3 }
 0x48b   :  { %v6462_v53 = vpop.f32.mrf.mxu3 }
 0x493   :  { %v898_v48 = vpop.f32.mrf.mxu3 }
 0x494   :  { %v899_v37 = vadd.f32 %v898_v48, %v5899_v34  ;;  %v1275_v48 = vadd.f32 %v1271_v36, %v5676_v29 }
 0x496   :  { %v914_v59 = vadd.f32 %v910_v6, %v899_v37 }
 0x498   :  { %v6496_v17 = vsel %vm767_vm10, %v899_v37, %v914_v59  ;;  %vm1026_vm10 = vcmp.gt.f32.partialorder %v6436_v3, 0.5 }
 0x49b   :  { %v901_v2 = vpop.f32.mrf.mxu3 }
 0x49c   :  { %v902_v40 = vadd.f32 %v901_v2, %v5891_v25  ;;  %v1269_v2 = vmul.f32 0.2, %v6422_v27 }
 0x49e   :  { %v915_v7 = vadd.f32 %v911_v35, %v902_v40  ;;  %v6534_v35 = vsel %vm1129_vm2, %v5668_v22, %v1276_v44  ;;  %v1273_v37 = vadd.f32 %v1269_v2, %v5681_v32 }
 0x49f   :  { %vm1284_vm15 = vcmp.gt.f32.partialorder %v6534_v35, 0.5 }
 0x4a0   :  { %v6486_v41 = vsel %vm768_vm9, %v902_v40, %v915_v7  ;;  %vm1027_vm9 = vcmp.gt.f32.partialorder %v6444_v47, 0.5  ;;  %v1274_v40 = vadd.f32 %v1270_v61, %v5674_v28  ;;  %v6566_v55 = vsel %vm1126_vm6, %v5681_v32, %v1273_v37 }
 0x4a1   :  { %vm923_vm13 = vcmp.gt.f32.partialorder %v6486_v41, 0.5  ;;  %vm1281_vm2 = vcmp.gt.f32.partialorder %v6566_v55, 0.5  ;;  %v1066_v61 = vmul.f32 0.2, %v6486_v41 }
 0x4a2   :  { %v6555_v50 = vsel %vm1127_vm4, %v5674_v28, %v1274_v40  ;;  %v1065_v40 = vmul.f32 0.2, %v6496_v17 }
 0x4a3   :  { %v904_v49 = vpop.f32.mrf.mxu3  ;;  %vm1282_vm1 = vcmp.gt.f32.partialorder %v6555_v50, 0.5 }
 0x4a4   :  { %v905_v18 = vadd.f32 %v904_v49, %v5889_v24 }
 0x4a6   :  { %v916_v11 = vadd.f32 %v912_v33, %v905_v18  ;;  %v1168_v33 = vmul.f32 0.2, %v6399_v31  ;;  %v1169_v31 = vmul.f32 0.2, %v6436_v3  ;;  %v6606_v3 = vld [vmem:[%s9865_s3 + $0x8] sm:$0xff] }
 0x4a8   :  { %v6478_v30 = vsel %vm769_vm8, %v905_v18, %v916_v11  ;;  %vm1024_vm8 = vcmp.gt.f32.partialorder %v6367_v26, 0.5  ;;  %v6541_v11 = vsel %vm1128_vm3, %v5676_v29, %v1275_v48 }
 0x4a9   :  { %vm924_vm12 = vcmp.gt.f32.partialorder %v6478_v30, 0.5  ;;  %vm1283_vm0 = vcmp.gt.f32.partialorder %v6541_v11, 0.5  ;;  %v1067_v36 = vmul.f32 0.2, %v6478_v30 }
 0x4ab   :  { %v907_v8 = vpop.f32.mrf.mxu3 }
 0x4ac   :  { %v908_v39 = vadd.f32 %v907_v8, %v5880_v16 }
 0x4ae   :  { %v917_v51 = vadd.f32 %v913_v5, %v908_v39 }
 0x4b0   :  { %v6474_v12 = vsel %vm770_vm7, %v908_v39, %v917_v51  ;;  %vm922_vm7 = vcmp.gt.f32.partialorder %v6496_v17, 0.5  ;;  %v1170_v51 = vmul.f32 0.2, %v6444_v47 }
 0x4b1   :  { %vm925_vm11 = vcmp.gt.f32.partialorder %v6474_v12, 0.5 }
 0x4b2   :  { %4717 = vmatpush.msk.msrb.mxu0 %vm925_vm11, %v9869_v23 }
 0x4b3   :  { %v1155_v62 = vpop.f32.mrf.mxu3 }
 0x4b4   :  { %v1156_v4 = vadd.f32 %v1155_v62, %v5754_v56  ;;  %4718 = vmatpush.msk.msrb.mxu0 %vm924_vm12, %v9869_v23 }
 0x4b6   :  { %v1171_v43 = vadd.f32 %v1167_v13, %v1156_v4  ;;  %4719 = vmatpush.msk.msrb.mxu0 %vm923_vm13, %v9869_v23 }
 0x4b8   :  { %4720 = vmatpush.msk.msrb.mxu0 %vm922_vm7, %v9869_v23  ;;  %v6511_v1 = vsel %vm1024_vm8, %v1156_v4, %v1171_v43 }
 0x4b9   :  { %4721 = vmatmul.msk.f32.vlgmr.msrb.gmra.mxu0 %vm189_vm5, %v6017_v57 }
 0x4ba   :  { %4739 = vmatpush.msk.msra.mxu0 %vm1027_vm9, %v9869_v23 }
 0x4bb   :  { %v1158_v49 = vpop.f32.mrf.mxu3 }
 0x4bc   :  { %4740 = vmatpush.msk.msra.mxu0 %vm1026_vm10, %v9869_v23  ;;  %v1159_v18 = vadd.f32 %v1158_v49, %v5746_v52 }
 0x4be   :  { %v1172_v8 = vadd.f32 %v1168_v33, %v1159_v18  ;;  %4741 = vmatpush.msk.msra.mxu0 %vm1025_vm14, %v9869_v23  ;;  %v1068_v33 = vmul.f32 0.2, %v6474_v12 }
 0x4c0   :  { %v6543_v39 = vsel %vm1025_vm14, %v1159_v18, %v1172_v8  ;;  %4742 = vmatpush.msk.msra.mxu0 %vm1024_vm8, %v9869_v23 }
 0x4c1   :  { %4722 = vmatmul.msk.f32.gmra.mxu0 %vm189_vm5, %v6024_v60  ;;  %vm1180_vm8 = vcmp.gt.f32.partialorder %v6543_v39, 0.5 }
 0x4c2   :  { %4795 = vmatpush.msk.msrb.mxu0 %vm1284_vm15, %v9869_v23 }
 0x4c3   :  { %v1161_v26 = vpop.f32.mrf.mxu3 }
 0x4c4   :  { %4796 = vmatpush.msk.msrb.mxu0 %vm1283_vm0, %v9869_v23  ;;  %v1162_v19 = vadd.f32 %v1161_v26, %v5736_v46 }
 0x4c6   :  { %4797 = vmatpush.msk.msrb.mxu0 %vm1282_vm1, %v9869_v23  ;;  %v1173_v5 = vadd.f32 %v1169_v31, %v1162_v19 }
 0x4c8   :  { %4798 = vmatpush.msk.msrb.mxu0 %vm1281_vm2, %v9869_v23  ;;  %v6580_v27 = vsel %vm1026_vm10, %v1162_v19, %v1173_v5 }
 0x4c9   :  { %4743 = vmatmul.msk.f32.vlgmr.msra.gmra.mxu0 %vm189_vm5, %v5790_v63  ;;  %v6599_v63 = vld [vmem:[%s9865_s3] sm:$0xff] }
 0x4cb   :  { %v1164_v6 = vpop.f32.mrf.mxu3 }
 0x4cc   :  { %v1165_v7 = vadd.f32 %v1164_v6, %v5732_v42 }
 0x4ce   :  { %v1174_v59 = vadd.f32 %v1170_v51, %v1165_v7  ;;  %v1427_v51 = vmul.f32 0.2, %v6534_v35 }
 0x4d0   :  { %v6588_v62 = vsel %vm1027_vm9, %v1165_v7, %v1174_v59  ;;  %v1322_v7 = vmul.f32 0.2, %v6511_v1  ;;  %v1426_v59 = vmul.f32 0.2, %v6541_v11 }
 0x4d1   :  { %4744 = vmatmul.msk.f32.gmra.mxu0 %vm189_vm5, %v5826_v10  ;;  %v6620_v10 = vld [vmem:[%s9865_s3 + $0x18] sm:$0xff] }
 0x4d9   :  { %4745 = vmatmul.msk.f32.gmra.mxu0 %vm189_vm5, %v5859_v15 }
 0x4e1   :  { %4746 = vmatmul.msk.f32.gmra.mxu0 %vm189_vm5, %v5795_v0  ;;  %v6613_v0 = vld [vmem:[%s9865_s3 + $0x10] sm:$0xff] }
 0x4e9   :  { %4799 = vmatmul.msk.f32.vlgmr.msrb.gmra.mxu0 %vm189_vm5, %v6599_v63 }
 0x4f1   :  { %4800 = vmatmul.msk.f32.gmra.mxu0 %vm189_vm5, %v6606_v3 }
 0x4f9   :  { %4801 = vmatmul.msk.f32.gmra.mxu0 %vm189_vm5, %v6613_v0 }
 0x501   :  { %4802 = vmatmul.msk.f32.gmra.mxu0 %vm189_vm5, %v6620_v10 }
 0x536   :  { %v6624_v15 = vpop.f32.mrf.mxu0 }
 0x53e   :  { %v6626_v47 = vpop.f32.mrf.mxu0 }
 0x53f   :  { %9871 = vst [vmem:[#allocation2_spill] sm:$0xff] %v6626_v47 }
 0x546   :  { %v1053_v4 = vpop.f32.mrf.mxu0 }
 0x547   :  { %v1054_v2 = vadd.f32 %v1053_v4, %v5899_v34  ;;  %v1431_v4 = vadd.f32 %v1427_v51, %v5668_v22 }
 0x549   :  { %v1069_v26 = vadd.f32 %v1065_v40, %v1054_v2 }
 0x54b   :  { %v6660_v30 = vsel %vm922_vm7, %v1054_v2, %v1069_v26  ;;  %vm1181_vm7 = vcmp.gt.f32.partialorder %v6580_v27, 0.5  ;;  %v6698_v2 = vsel %vm1284_vm15, %v5668_v22, %v1431_v4 }
 0x54c   :  { %vm1439_vm9 = vcmp.gt.f32.partialorder %v6698_v2, 0.5 }
 0x54e   :  { %v1056_v13 = vpop.f32.mrf.mxu0 }
 0x54f   :  { %v1057_v44 = vadd.f32 %v1056_v13, %v5891_v25  ;;  %v1425_v13 = vmul.f32 0.2, %v6555_v50 }
 0x551   :  { %v1070_v8 = vadd.f32 %v1066_v61, %v1057_v44  ;;  %v1323_v61 = vmul.f32 0.2, %v6543_v39  ;;  %v1324_v39 = vmul.f32 0.2, %v6580_v27  ;;  %v6762_v27 = vld [vmem:[%s9866_s5 + $0x8] sm:$0xff] }
 0x553   :  { %v6650_v5 = vsel %vm923_vm13, %v1057_v44, %v1070_v8  ;;  %vm1182_vm13 = vcmp.gt.f32.partialorder %v6588_v62, 0.5 }
 0x554   :  { %vm1078_vm6 = vcmp.gt.f32.partialorder %v6650_v5, 0.5 }
 0x556   :  { %v1059_v14 = vpop.f32.mrf.mxu0 }
 0x557   :  { %v1060_v43 = vadd.f32 %v1059_v14, %v5889_v24  ;;  %v1430_v14 = vadd.f32 %v1426_v59, %v5676_v29 }
 0x559   :  { %v1071_v49 = vadd.f32 %v1067_v36, %v1060_v43 }
 0x55b   :  { %v6642_v19 = vsel %vm924_vm12, %v1060_v43, %v1071_v49  ;;  %vm1179_vm12 = vcmp.gt.f32.partialorder %v6511_v1, 0.5  ;;  %v1424_v43 = vmul.f32 0.2, %v6566_v55 }
 0x55c   :  { %vm1079_vm4 = vcmp.gt.f32.partialorder %v6642_v19, 0.5 }
 0x55e   :  { %v1062_v48 = vpop.f32.mrf.mxu0 }
 0x55f   :  { %v1063_v18 = vadd.f32 %v1062_v48, %v5880_v16  ;;  %v1429_v48 = vadd.f32 %v1425_v13, %v5674_v28 }
 0x561   :  { %v1072_v37 = vadd.f32 %v1068_v33, %v1063_v18  ;;  %v6705_v33 = vsel %vm1283_vm0, %v5676_v29, %v1430_v14  ;;  %v6719_v35 = vsel %vm1282_vm1, %v5674_v28, %v1429_v48  ;;  %v1221_v48 = vmul.f32 0.2, %v6650_v5 }
 0x562   :  { %vm1438_vm10 = vcmp.gt.f32.partialorder %v6705_v33, 0.5  ;;  %vm1437_vm14 = vcmp.gt.f32.partialorder %v6719_v35, 0.5 }
 0x563   :  { %v6638_v31 = vsel %vm925_vm11, %v1063_v18, %v1072_v37  ;;  %vm1077_vm11 = vcmp.gt.f32.partialorder %v6660_v30, 0.5  ;;  %v1428_v18 = vadd.f32 %v1424_v43, %v5681_v32  ;;  %v6749_v37 = vld [vmem:[%s9866_s5] sm:$0xff] }
 0x564   :  { %vm1080_vm3 = vcmp.gt.f32.partialorder %v6638_v31, 0.5 }
 0x565   :  { %4751 = vmatpush.msk.msrb.mxu1 %vm1080_vm3, %v9869_v23  ;;  %v6730_v11 = vsel %vm1281_vm2, %v5681_v32, %v1428_v18 }
 0x566   :  { %v1310_v6 = vpop.f32.mrf.mxu0  ;;  %vm1436_vm15 = vcmp.gt.f32.partialorder %v6730_v11, 0.5 }
 0x567   :  { %v1311_v12 = vadd.f32 %v1310_v6, %v5754_v56  ;;  %4752 = vmatpush.msk.msrb.mxu1 %vm1079_vm4, %v9869_v23 }
 0x569   :  { %v1326_v41 = vadd.f32 %v1322_v7, %v1311_v12  ;;  %4753 = vmatpush.msk.msrb.mxu1 %vm1078_vm6, %v9869_v23 }
 0x56b   :  { %4754 = vmatpush.msk.msrb.mxu1 %vm1077_vm11, %v9869_v23  ;;  %v6675_v17 = vsel %vm1179_vm12, %v1311_v12, %v1326_v41  ;;  %v1325_v12 = vmul.f32 0.2, %v6588_v62  ;;  %v6769_v41 = vld [vmem:[%s9866_s5 + $0x10] sm:$0xff]  ;;  %v6776_v62 = vld [vmem:[%s9866_s5 + $0x18] sm:$0xff] }
 0x56c   :  { %4755 = vmatmul.msk.f32.vlgmr.msrb.gmra.mxu1 %vm189_vm5, %v6017_v57 }
 0x56d   :  { %4773 = vmatpush.msk.msra.mxu1 %vm1182_vm13, %v9869_v23 }
 0x56e   :  { %v1313_v36 = vpop.f32.mrf.mxu0 }
 0x56f   :  { %4774 = vmatpush.msk.msra.mxu1 %vm1181_vm7, %v9869_v23  ;;  %v1314_v44 = vadd.f32 %v1313_v36, %v5746_v52 }
 0x571   :  { %v1327_v49 = vadd.f32 %v1323_v61, %v1314_v44  ;;  %4775 = vmatpush.msk.msra.mxu1 %vm1180_vm8, %v9869_v23 }
 0x573   :  { %v6707_v40 = vsel %vm1180_vm8, %v1314_v44, %v1327_v49  ;;  %4776 = vmatpush.msk.msra.mxu1 %vm1179_vm12, %v9869_v23  ;;  %v1222_v44 = vmul.f32 0.2, %v6642_v19 }
 0x574   :  { %4756 = vmatmul.msk.f32.gmra.mxu1 %vm189_vm5, %v6024_v60  ;;  %vm1335_vm12 = vcmp.gt.f32.partialorder %v6707_v40, 0.5 }
 0x575   :  { %4829 = vmatpush.msk.msrb.mxu1 %vm1439_vm9, %v9869_v23 }
 0x576   :  { %v1316_v1 = vpop.f32.mrf.mxu0 }
 0x577   :  { %4830 = vmatpush.msk.msrb.mxu1 %vm1438_vm10, %v9869_v23  ;;  %v1317_v50 = vadd.f32 %v1316_v1, %v5736_v46 }
 0x579   :  { %4831 = vmatpush.msk.msrb.mxu1 %vm1437_vm14, %v9869_v23  ;;  %v1328_v8 = vadd.f32 %v1324_v39, %v1317_v50 }
 0x57b   :  { %4832 = vmatpush.msk.msrb.mxu1 %vm1436_vm15, %v9869_v23  ;;  %v6744_v55 = vsel %vm1181_vm7, %v1317_v50, %v1328_v8  ;;  %v1223_v50 = vmul.f32 0.2, %v6638_v31  ;;  %v1220_v8 = vmul.f32 0.2, %v6660_v30 }
 0x57c   :  { %4777 = vmatmul.msk.f32.vlgmr.msra.gmra.mxu1 %vm189_vm5, %v6749_v37 }
 0x57e   :  { %v1319_v26 = vpop.f32.mrf.mxu0 }
 0x57f   :  { %v1320_v6 = vadd.f32 %v1319_v26, %v5732_v42 }
 0x581   :  { %v1329_v7 = vadd.f32 %v1325_v12, %v1320_v6 }
 0x583   :  { %v6757_v51 = vsel %vm1182_vm13, %v1320_v6, %v1329_v7 }
 0x584   :  { %4778 = vmatmul.msk.f32.gmra.mxu1 %vm189_vm5, %v6762_v27 }
 0x58c   :  { %4779 = vmatmul.msk.f32.gmra.mxu1 %vm189_vm5, %v6769_v41 }
 0x594   :  { %4780 = vmatmul.msk.f32.gmra.mxu1 %vm189_vm5, %v6776_v62 }
 0x59c   :  { %4833 = vmatmul.msk.f32.vlgmr.msrb.gmra.mxu1 %vm189_vm5, %v6599_v63 }
 0x5a4   :  { %4834 = vmatmul.msk.f32.gmra.mxu1 %vm189_vm5, %v6606_v3 }
 0x5ac   :  { %4835 = vmatmul.msk.f32.gmra.mxu1 %vm189_vm5, %v6613_v0 }
 0x5b4   :  { %4836 = vmatmul.msk.f32.gmra.mxu1 %vm189_vm5, %v6620_v10 }
 0x5e9   :  { %v6788_v59 = vpop.f32.mrf.mxu1 }
 0x5f1   :  { %v6790_v4 = vpop.f32.mrf.mxu1 }
 0x5f2   :  { %9872 = vst [vmem:[#allocation3_spill] sm:$0xff] %v6790_v4 }
 0x5f9   :  { %v1208_v13 = vpop.f32.mrf.mxu1 }
 0x5fa   :  { %v1209_v18 = vadd.f32 %v1208_v13, %v5899_v34 }
 0x5fc   :  { %v1224_v12 = vadd.f32 %v1220_v8, %v1209_v18 }
 0x5fe   :  { %v6824_v19 = vsel %vm1077_vm11, %v1209_v18, %v1224_v12  ;;  %vm1336_vm11 = vcmp.gt.f32.partialorder %v6744_v55, 0.5 }
 0x601   :  { %v1211_v14 = vpop.f32.mrf.mxu1 }
 0x602   :  { %v1212_v61 = vadd.f32 %v1211_v14, %v5891_v25 }
 0x604   :  { %v1225_v26 = vadd.f32 %v1221_v48, %v1212_v61 }
 0x606   :  { %v6814_v13 = vsel %vm1078_vm6, %v1212_v61, %v1225_v26  ;;  %v1581_v61 = vmul.f32 0.2, %v6705_v33  ;;  %vm1337_vm6 = vcmp.gt.f32.partialorder %v6757_v51, 0.5 }
 0x607   :  { %vm1233_vm2 = vcmp.gt.f32.partialorder %v6814_v13, 0.5 }
 0x608   :  { %v1585_v18 = vadd.f32 %v1581_v61, %v5676_v29 }
 0x609   :  { %v1214_v43 = vpop.f32.mrf.mxu1 }
 0x60a   :  { %v1215_v36 = vadd.f32 %v1214_v43, %v5889_v24 }
 0x60c   :  { %v1226_v1 = vadd.f32 %v1222_v44, %v1215_v36  ;;  %v1477_v44 = vmul.f32 0.2, %v6675_v17 }
 0x60e   :  { %v6806_v14 = vsel %vm1079_vm4, %v1215_v36, %v1226_v1  ;;  %v1582_v36 = vmul.f32 0.2, %v6698_v2  ;;  %vm1334_vm4 = vcmp.gt.f32.partialorder %v6675_v17, 0.5  ;;  %v1579_v1 = vmul.f32 0.2, %v6730_v11 }
 0x60f   :  { %vm1234_vm1 = vcmp.gt.f32.partialorder %v6806_v14, 0.5 }
 0x610   :  { %v1586_v48 = vadd.f32 %v1582_v36, %v5668_v22  ;;  %v1583_v12 = vadd.f32 %v1579_v1, %v5681_v32 }
 0x611   :  { %v1217_v49 = vpop.f32.mrf.mxu1 }
 0x612   :  { %v1218_v39 = vadd.f32 %v1217_v49, %v5880_v16  ;;  %v1580_v49 = vmul.f32 0.2, %v6719_v35  ;;  %v6862_v26 = vsel %vm1439_vm9, %v5668_v22, %v1586_v48  ;;  %v6894_v33 = vsel %vm1436_vm15, %v5681_v32, %v1583_v12 }
 0x613   :  { %vm1594_vm13 = vcmp.gt.f32.partialorder %v6862_v26, 0.5  ;;  %vm1591_vm9 = vcmp.gt.f32.partialorder %v6894_v33, 0.5 }
 0x614   :  { %v1227_v6 = vadd.f32 %v1223_v50, %v1218_v39  ;;  %v1584_v8 = vadd.f32 %v1580_v49, %v5674_v28 }
 0x616   :  { %v6802_v7 = vsel %vm1080_vm3, %v1218_v39, %v1227_v6  ;;  %vm1232_vm3 = vcmp.gt.f32.partialorder %v6824_v19, 0.5  ;;  %v6883_v2 = vsel %vm1437_vm14, %v5674_v28, %v1584_v8  ;;  %v1376_v8 = vmul.f32 0.2, %v6814_v13 }
 0x617   :  { %vm1235_vm0 = vcmp.gt.f32.partialorder %v6802_v7, 0.5  ;;  %vm1592_vm8 = vcmp.gt.f32.partialorder %v6883_v2, 0.5 }
 0x618   :  { %4785 = vmatpush.msk.msrb.mxu2 %vm1235_vm0, %v9869_v23 }
 0x619   :  { %v1465_v43 = vpop.f32.mrf.mxu1 }
 0x61a   :  { %v1466_v31 = vadd.f32 %v1465_v43, %v5754_v56  ;;  %4786 = vmatpush.msk.msrb.mxu2 %vm1234_vm1, %v9869_v23  ;;  %v6869_v43 = vsel %vm1438_vm10, %v5676_v29, %v1585_v18 }
 0x61b   :  { %vm1593_vm7 = vcmp.gt.f32.partialorder %v6869_v43, 0.5 }
 0x61c   :  { %v1481_v5 = vadd.f32 %v1477_v44, %v1466_v31  ;;  %4787 = vmatpush.msk.msrb.mxu2 %vm1233_vm2, %v9869_v23 }
 0x61e   :  { %4788 = vmatpush.msk.msrb.mxu2 %vm1232_vm3, %v9869_v23  ;;  %v6839_v30 = vsel %vm1334_vm4, %v1466_v31, %v1481_v5  ;;  %v1480_v5 = vmul.f32 0.2, %v6757_v51 }
 0x61f   :  { %4789 = vmatmul.msk.f32.vlgmr.msrb.gmra.mxu2 %vm189_vm5, %v6017_v57  ;;  %v1478_v57 = vmul.f32 0.2, %v6707_v40  ;;  %v1479_v40 = vmul.f32 0.2, %v6744_v55 }
 0x620   :  { %4807 = vmatpush.msk.msra.mxu2 %vm1337_vm6, %v9869_v23 }
 0x621   :  { %v1468_v39 = vpop.f32.mrf.mxu1 }
 0x622   :  { %4808 = vmatpush.msk.msra.mxu2 %vm1336_vm11, %v9869_v23  ;;  %v1469_v50 = vadd.f32 %v1468_v39, %v5746_v52 }
 0x624   :  { %v1482_v6 = vadd.f32 %v1478_v57, %v1469_v50  ;;  %4809 = vmatpush.msk.msra.mxu2 %vm1335_vm12, %v9869_v23 }
 0x626   :  { %v6871_v31 = vsel %vm1335_vm12, %v1469_v50, %v1482_v6  ;;  %4810 = vmatpush.msk.msra.mxu2 %vm1334_vm4, %v9869_v23  ;;  %v1377_v50 = vmul.f32 0.2, %v6806_v14 }
 0x627   :  { %4790 = vmatmul.msk.f32.gmra.mxu2 %vm189_vm5, %v6024_v60  ;;  %vm1490_vm4 = vcmp.gt.f32.partialorder %v6871_v31, 0.5 }
 0x628   :  { %4863 = vmatpush.msk.msrb.mxu2 %vm1594_vm13, %v9869_v23 }
 0x629   :  { %v1471_v17 = vpop.f32.mrf.mxu1 }
 0x62a   :  { %4864 = vmatpush.msk.msrb.mxu2 %vm1593_vm7, %v9869_v23  ;;  %v1472_v35 = vadd.f32 %v1471_v17, %v5736_v46 }
 0x62c   :  { %4865 = vmatpush.msk.msrb.mxu2 %vm1592_vm8, %v9869_v23  ;;  %v1483_v60 = vadd.f32 %v1479_v40, %v1472_v35 }
 0x62e   :  { %4866 = vmatpush.msk.msrb.mxu2 %vm1591_vm9, %v9869_v23  ;;  %v6908_v11 = vsel %vm1336_vm11, %v1472_v35, %v1483_v60  ;;  %v1378_v35 = vmul.f32 0.2, %v6802_v7  ;;  %v1375_v60 = vmul.f32 0.2, %v6824_v19 }
 0x62f   :  { %4811 = vmatmul.msk.f32.vlgmr.msra.gmra.mxu2 %vm189_vm5, %v6749_v37 }
 0x631   :  { %v1474_v44 = vpop.f32.mrf.mxu1 }
 0x632   :  { %v1475_v36 = vadd.f32 %v1474_v44, %v5732_v42 }
 0x634   :  { %v1484_v61 = vadd.f32 %v1480_v5, %v1475_v36 }
 0x636   :  { %v6916_v48 = vsel %vm1337_vm6, %v1475_v36, %v1484_v61 }
 0x637   :  { %4812 = vmatmul.msk.f32.gmra.mxu2 %vm189_vm5, %v6762_v27 }
 0x63f   :  { %4813 = vmatmul.msk.f32.gmra.mxu2 %vm189_vm5, %v6769_v41 }
 0x647   :  { %4814 = vmatmul.msk.f32.gmra.mxu2 %vm189_vm5, %v6776_v62 }
 0x64f   :  { %4867 = vmatmul.msk.f32.vlgmr.msrb.gmra.mxu2 %vm189_vm5, %v6599_v63 }
 0x657   :  { %4868 = vmatmul.msk.f32.gmra.mxu2 %vm189_vm5, %v6606_v3 }
 0x65f   :  { %4869 = vmatmul.msk.f32.gmra.mxu2 %vm189_vm5, %v6613_v0 }
 0x667   :  { %4870 = vmatmul.msk.f32.gmra.mxu2 %vm189_vm5, %v6620_v10 }
 0x6a2   :  { %v6932_v55 = vpop.f32.mrf.mxu2 }
 0x6aa   :  { %v6934_v51 = vpop.f32.mrf.mxu2 }
 0x6ab   :  { %9873 = vst [vmem:[#allocation4_spill] sm:$0xff] %v6934_v51 }
 0x6b2   :  { %v1363_v49 = vpop.f32.mrf.mxu2 }
 0x6b3   :  { %v1364_v12 = vadd.f32 %v1363_v49, %v5899_v34 }
 0x6b5   :  { %v1379_v5 = vadd.f32 %v1375_v60, %v1364_v12 }
 0x6b7   :  { %v6968_v14 = vsel %vm1232_vm3, %v1364_v12, %v1379_v5  ;;  %v6990_v12 = vld [vmem:[%s9867_s7] sm:$0xff]  ;;  %vm1491_vm3 = vcmp.gt.f32.partialorder %v6908_v11, 0.5 }
 0x6ba   :  { %v1366_v18 = vpop.f32.mrf.mxu2 }
 0x6bb   :  { %v1367_v57 = vadd.f32 %v1366_v18, %v5891_v25 }
 0x6bd   :  { %v1380_v44 = vadd.f32 %v1376_v8, %v1367_v57 }
 0x6bf   :  { %v6958_v49 = vsel %vm1233_vm2, %v1367_v57, %v1380_v44  ;;  %v1736_v57 = vmul.f32 0.2, %v6869_v43  ;;  %vm1492_vm2 = vcmp.gt.f32.partialorder %v6916_v48, 0.5  ;;  %v1633_v44 = vmul.f32 0.2, %v6871_v31 }
 0x6c0   :  { %vm1388_vm15 = vcmp.gt.f32.partialorder %v6958_v49, 0.5  ;;  %v7037_v43 = vld [vmem:[%s9867_s7 + $0x8] sm:$0x3] }
 0x6c2   :  { %v1369_v1 = vpop.f32.mrf.mxu2 }
 0x6c3   :  { %v1370_v39 = vadd.f32 %v1369_v1, %v5889_v24 }
 0x6c5   :  { %v1381_v17 = vadd.f32 %v1377_v50, %v1370_v39  ;;  %v1632_v50 = vmul.f32 0.2, %v6839_v30 }
 0x6c7   :  { %v6950_v18 = vsel %vm1234_vm1, %v1370_v39, %v1381_v17  ;;  %v1737_v39 = vmul.f32 0.2, %v6862_v26  ;;  %vm1489_vm1 = vcmp.gt.f32.partialorder %v6839_v30, 0.5  ;;  %v1740_v17 = vadd.f32 %v1736_v57, %v5676_v29 }
 0x6c8   :  { %vm1389_vm14 = vcmp.gt.f32.partialorder %v6950_v18, 0.5 }
 0x6c9   :  { %v1741_v8 = vadd.f32 %v1737_v39, %v5668_v22 }
 0x6ca   :  { %v1372_v6 = vpop.f32.mrf.mxu2 }
 0x6cb   :  { %v1373_v40 = vadd.f32 %v1372_v6, %v5880_v16  ;;  %v1735_v6 = vmul.f32 0.2, %v6883_v2  ;;  %v7011_v5 = vsel %vm1594_vm13, %v5668_v22, %v1741_v8  ;;  %v1634_v2 = vmul.f32 0.2, %v6908_v11 }
 0x6cc   :  { %vm1749_vm6 = vcmp.gt.f32.partialorder %v7011_v5, 0.5 }
 0x6cd   :  { %v1382_v36 = vadd.f32 %v1378_v35, %v1373_v40 }
 0x6cf   :  { %v6946_v61 = vsel %vm1235_vm0, %v1373_v40, %v1382_v36  ;;  %vm1387_vm0 = vcmp.gt.f32.partialorder %v6968_v14, 0.5  ;;  %v1734_v40 = vmul.f32 0.2, %v6894_v33  ;;  %v1739_v36 = vadd.f32 %v1735_v6, %v5674_v28 }
 0x6d0   :  { %vm1390_vm10 = vcmp.gt.f32.partialorder %v6946_v61, 0.5 }
 0x6d1   :  { %4819 = vmatpush.msk.msra.mxu3 %vm1390_vm10, %v9869_v23  ;;  %v7032_v26 = vsel %vm1592_vm8, %v5674_v28, %v1739_v36 }
 0x6d2   :  { %v1620_v1 = vpop.f32.mrf.mxu2  ;;  %vm1747_vm12 = vcmp.gt.f32.partialorder %v7032_v26, 0.5 }
 0x6d3   :  { %v1621_v7 = vadd.f32 %v1620_v1, %v5754_v56  ;;  %4820 = vmatpush.msk.msra.mxu3 %vm1389_vm14, %v9869_v23 }
 0x6d5   :  { %v1636_v13 = vadd.f32 %v1632_v50, %v1621_v7  ;;  %4821 = vmatpush.msk.msra.mxu3 %vm1388_vm15, %v9869_v23  ;;  %v7018_v50 = vsel %vm1593_vm7, %v5676_v29, %v1740_v17  ;;  %v1635_v17 = vmul.f32 0.2, %v6916_v48 }
 0x6d6   :  { %vm1748_vm11 = vcmp.gt.f32.partialorder %v7018_v50, 0.5 }
 0x6d7   :  { %4822 = vmatpush.msk.msra.mxu3 %vm1387_vm0, %v9869_v23  ;;  %v6983_v19 = vsel %vm1489_vm1, %v1621_v7, %v1636_v13  ;;  %v1738_v7 = vadd.f32 %v1734_v40, %v5681_v32 }
 0x6d8   :  { %4823 = vmatmul.msk.f32.vlgmr.msra.gmra.mxu3 %vm189_vm5, %v6990_v12 }
 0x6d9   :  { %4841 = vmatpush.msk.msrb.mxu3 %vm1492_vm2, %v9869_v23  ;;  %v7048_v31 = vsel %vm1591_vm9, %v5681_v32, %v1738_v7  ;;  %v1532_v7 = vmul.f32 0.2, %v6950_v18 }
 0x6da   :  { %v1623_v35 = vpop.f32.mrf.mxu2  ;;  %vm1746_vm13 = vcmp.gt.f32.partialorder %v7048_v31, 0.5 }
 0x6db   :  { %4842 = vmatpush.msk.msrb.mxu3 %vm1491_vm3, %v9869_v23  ;;  %v1624_v60 = vadd.f32 %v1623_v35, %v5746_v52 }
 0x6dd   :  { %v1637_v1 = vadd.f32 %v1633_v44, %v1624_v60  ;;  %4843 = vmatpush.msk.msrb.mxu3 %vm1490_vm4, %v9869_v23 }
 0x6df   :  { %v7020_v39 = vsel %vm1490_vm4, %v1624_v60, %v1637_v1  ;;  %4844 = vmatpush.msk.msrb.mxu3 %vm1489_vm1, %v9869_v23 }
 0x6e0   :  { %4824 = vmatmul.msk.f32.gmra.mxu3 %vm189_vm5, %v7037_v43  ;;  %vm1645_vm1 = vcmp.gt.f32.partialorder %v7020_v39, 0.5 }
 0x6e1   :  { %4897 = vmatpush.msk.msra.mxu3 %vm1749_vm6, %v9869_v23 }
 0x6e2   :  { %v1626_v30 = vpop.f32.mrf.mxu2 }
 0x6e3   :  { %4898 = vmatpush.msk.msra.mxu3 %vm1748_vm11, %v9869_v23  ;;  %v1627_v13 = vadd.f32 %v1626_v30, %v5736_v46 }
 0x6e5   :  { %4899 = vmatpush.msk.msra.mxu3 %vm1747_vm12, %v9869_v23  ;;  %v1638_v57 = vadd.f32 %v1634_v2, %v1627_v13  ;;  %v1531_v2 = vmul.f32 0.2, %v6958_v49  ;;  %v1891_v49 = vmul.f32 0.2, %v7018_v50 }
 0x6e7   :  { %4900 = vmatpush.msk.msra.mxu3 %vm1746_vm13, %v9869_v23  ;;  %v7062_v33 = vsel %vm1491_vm3, %v1627_v13, %v1638_v57 }
 0x6e8   :  { %4845 = vmatmul.msk.f32.vlgmr.msrb.gmra.mxu3 %vm189_vm5, %v6749_v37 }
 0x6ea   :  { %v1629_v8 = vpop.f32.mrf.mxu2 }
 0x6eb   :  { %v1630_v6 = vadd.f32 %v1629_v8, %v5732_v42 }
 0x6ed   :  { %v1639_v40 = vadd.f32 %v1635_v17, %v1630_v6  ;;  %v1533_v17 = vmul.f32 0.2, %v6946_v61 }
 0x6ef   :  { %v7070_v35 = vsel %vm1492_vm2, %v1630_v6, %v1639_v40  ;;  %v1530_v40 = vmul.f32 0.2, %v6968_v14 }
 0x6f0   :  { %4846 = vmatmul.msk.f32.gmra.mxu3 %vm189_vm5, %v6762_v27 }
 0x6f8   :  { %4847 = vmatmul.msk.f32.gmra.mxu3 %vm189_vm5, %v6769_v41 }
 0x700   :  { %4848 = vmatmul.msk.f32.gmra.mxu3 %vm189_vm5, %v6776_v62 }
 0x708   :  { %4901 = vmatmul.msk.f32.vlgmr.msra.gmra.mxu3 %vm189_vm5, %v6599_v63 }
 0x710   :  { %4902 = vmatmul.msk.f32.gmra.mxu3 %vm189_vm5, %v6606_v3 }
 0x718   :  { %4903 = vmatmul.msk.f32.gmra.mxu3 %vm189_vm5, %v6613_v0 }
 0x720   :  { %4904 = vmatmul.msk.f32.gmra.mxu3 %vm189_vm5, %v6620_v10 }
 0x75b   :  { %v7086_v11 = vpop.f32.mrf.mxu3 }
 0x763   :  { %v7088_v48 = vpop.f32.mrf.mxu3 }
 0x764   :  { %9874 = vst [vmem:[#allocation5_spill] sm:$0xff] %v7088_v48 }
 0x76b   :  { %v1518_v60 = vpop.f32.mrf.mxu3 }
 0x76c   :  { %v1519_v57 = vadd.f32 %v1518_v60, %v5899_v34  ;;  %v9875_v60 = vmov 1.0  }
 0x76e   :  { %v1534_v51 = vadd.f32 %v1530_v40, %v1519_v57 }
 0x770   :  { %v7122_v18 = vsel %vm1387_vm0, %v1519_v57, %v1534_v51  ;;  %v1889_v57 = vmul.f32 0.2, %v7048_v31  ;;  %vm1646_vm0 = vcmp.gt.f32.partialorder %v7062_v33, 0.5 }
 0x773   :  { %v1521_v44 = vpop.f32.mrf.mxu3 }
 0x774   :  { %v1522_v30 = vadd.f32 %v1521_v44, %v5891_v25 }
 0x776   :  { %v1535_v23 = vadd.f32 %v1531_v2, %v1522_v30 }
 0x77b   :  { %v1524_v36 = vpop.f32.mrf.mxu3 }
 0x77c   :  { %v1525_v1 = vadd.f32 %v1524_v36, %v5889_v24 }
 0x77e   :  { %v1536_v8 = vadd.f32 %v1532_v7, %v1525_v1  ;;  %v7112_v7 = vsel %vm1388_vm15, %v1522_v30, %v1535_v23  ;;  %v1890_v30 = vmul.f32 0.2, %v7032_v26  ;;  %vm1647_vm15 = vcmp.gt.f32.partialorder %v7070_v35, 0.5 }
 0x77f   :  { %vm1543_vm9 = vcmp.gt.f32.partialorder %v7112_v7, 0.5 }
 0x780   :  { %v7104_v44 = vsel %vm1389_vm14, %v1525_v1, %v1536_v8  ;;  %v1892_v1 = vmul.f32 0.2, %v7011_v5  ;;  %vm1644_vm14 = vcmp.gt.f32.partialorder %v6983_v19, 0.5  ;;  %v1894_v40 = vadd.f32 %v1890_v30, %v5674_v28 }
 0x781   :  { %vm1544_vm8 = vcmp.gt.f32.partialorder %v7104_v44, 0.5 }
 0x782   :  { %v1896_v14 = vadd.f32 %v1892_v1, %v5668_v22  ;;  %v7181_v5 = vsel %vm1747_vm12, %v5674_v28, %v1894_v40 }
 0x783   :  { %v1527_v13 = vpop.f32.mrf.mxu3  ;;  %vm1902_vm4 = vcmp.gt.f32.partialorder %v7181_v5, 0.5 }
 0x784   :  { %v1528_v6 = vadd.f32 %v1527_v13, %v5880_v16  ;;  %v1895_v13 = vadd.f32 %v1891_v49, %v5676_v29 }
 0x786   :  { %v1537_v48 = vadd.f32 %v1533_v17, %v1528_v6  ;;  %v1788_v17 = vmul.f32 0.2, %v7020_v39  ;;  %v7167_v1 = vsel %vm1748_vm11, %v5676_v29, %v1895_v13  ;;  %v1789_v39 = vmul.f32 0.2, %v7062_v33 }
 0x787   :  { %vm1903_vm3 = vcmp.gt.f32.partialorder %v7167_v1, 0.5  ;;  %v1790_v13 = vmul.f32 0.2, %v7070_v35 }
 0x788   :  { %v7100_v36 = vsel %vm1390_vm10, %v1528_v6, %v1537_v48  ;;  %v1787_v48 = vmul.f32 0.2, %v6983_v19  ;;  %vm1542_vm10 = vcmp.gt.f32.partialorder %v7122_v18, 0.5 }
 0x789   :  { %vm1545_vm7 = vcmp.gt.f32.partialorder %v7100_v36, 0.5 }
 0x78a   :  { %4853 = vmatpush.msk.msra.mxu0 %vm1545_vm7, %v9875_v60 }
 0x78b   :  { %v1775_v2 = vpop.f32.mrf.mxu3 }
 0x78c   :  { %v1776_v61 = vadd.f32 %v1775_v2, %v5754_v56  ;;  %4854 = vmatpush.msk.msra.mxu0 %vm1544_vm8, %v9875_v60  ;;  %v7160_v2 = vsel %vm1749_vm6, %v5668_v22, %v1896_v14 }
 0x78d   :  { %vm1904_vm2 = vcmp.gt.f32.partialorder %v7160_v2, 0.5 }
 0x78e   :  { %v1791_v23 = vadd.f32 %v1787_v48, %v1776_v61  ;;  %4855 = vmatpush.msk.msra.mxu0 %vm1543_vm9, %v9875_v60  ;;  %v1893_v48 = vadd.f32 %v1889_v57, %v5681_v32 }
 0x790   :  { %4856 = vmatpush.msk.msra.mxu0 %vm1542_vm10, %v9875_v60  ;;  %v7137_v51 = vsel %vm1644_vm14, %v1776_v61, %v1791_v23  ;;  %v7192_v50 = vsel %vm1746_vm13, %v5681_v32, %v1893_v48  ;;  %v1687_v48 = vmul.f32 0.2, %v7104_v44 }
 0x791   :  { %4857 = vmatmul.msk.f32.vlgmr.msra.gmra.mxu0 %vm189_vm5, %v6990_v12  ;;  %vm1901_vm6 = vcmp.gt.f32.partialorder %v7192_v50, 0.5 }
 0x792   :  { %4875 = vmatpush.msk.msrb.mxu0 %vm1647_vm15, %v9875_v60 }
 0x793   :  { %v1778_v8 = vpop.f32.mrf.mxu3 }
 0x794   :  { %4876 = vmatpush.msk.msrb.mxu0 %vm1646_vm0, %v9875_v60  ;;  %v1779_v6 = vadd.f32 %v1778_v8, %v5746_v52 }
 0x796   :  { %v1792_v61 = vadd.f32 %v1788_v17, %v1779_v6  ;;  %4877 = vmatpush.msk.msrb.mxu0 %vm1645_vm1, %v9875_v60 }
 0x798   :  { %v7169_v23 = vsel %vm1645_vm1, %v1779_v6, %v1792_v61  ;;  %4878 = vmatpush.msk.msrb.mxu0 %vm1644_vm14, %v9875_v60 }
 0x799   :  { %4858 = vmatmul.msk.f32.gmra.mxu0 %vm189_vm5, %v7037_v43  ;;  %vm1800_vm14 = vcmp.gt.f32.partialorder %v7169_v23, 0.5 }
 0x79a   :  { %4931 = vmatpush.msk.msra.mxu0 %vm1904_vm2, %v9875_v60 }
 0x79b   :  { %v1781_v19 = vpop.f32.mrf.mxu3 }
 0x79c   :  { %4932 = vmatpush.msk.msra.mxu0 %vm1903_vm3, %v9875_v60  ;;  %v1782_v26 = vadd.f32 %v1781_v19, %v5736_v46 }
 0x79e   :  { %4933 = vmatpush.msk.msra.mxu0 %vm1902_vm4, %v9875_v60  ;;  %v1793_v49 = vadd.f32 %v1789_v39, %v1782_v26  ;;  %v1686_v39 = vmul.f32 0.2, %v7112_v7 }
 0x7a0   :  { %4934 = vmatpush.msk.msra.mxu0 %vm1901_vm6, %v9875_v60  ;;  %v7206_v31 = vsel %vm1646_vm0, %v1782_v26, %v1793_v49 }
 0x7a1   :  { %4879 = vmatmul.msk.f32.vlgmr.msrb.gmra.mxu0 %vm189_vm5, %v6749_v37 }
 0x7a3   :  { %v1784_v14 = vpop.f32.mrf.mxu3 }
 0x7a4   :  { %v1785_v30 = vadd.f32 %v1784_v14, %v5732_v42 }
 0x7a6   :  { %v1794_v57 = vadd.f32 %v1790_v13, %v1785_v30  ;;  %v1688_v13 = vmul.f32 0.2, %v7100_v36  ;;  %v1942_v36 = vmul.f32 0.2, %v7137_v51 }
 0x7a8   :  { %v7214_v8 = vsel %vm1647_vm15, %v1785_v30, %v1794_v57  ;;  %v1685_v57 = vmul.f32 0.2, %v7122_v18 }
 0x7a9   :  { %4880 = vmatmul.msk.f32.gmra.mxu0 %vm189_vm5, %v6762_v27 }
 0x7b1   :  { %4881 = vmatmul.msk.f32.gmra.mxu0 %vm189_vm5, %v6769_v41 }
 0x7b9   :  { %4882 = vmatmul.msk.f32.gmra.mxu0 %vm189_vm5, %v6776_v62 }
 0x7c1   :  { %4935 = vmatmul.msk.f32.vlgmr.msra.gmra.mxu0 %vm189_vm5, %v6599_v63 }
 0x7c9   :  { %4936 = vmatmul.msk.f32.gmra.mxu0 %vm189_vm5, %v6606_v3 }
 0x7d1   :  { %4937 = vmatmul.msk.f32.gmra.mxu0 %vm189_vm5, %v6613_v0 }
 0x7d9   :  { %4938 = vmatmul.msk.f32.gmra.mxu0 %vm189_vm5, %v6620_v10 }
 0x80e   :  { %v7230_v33 = vpop.f32.mrf.mxu0 }
 0x816   :  { %v7232_v35 = vpop.f32.mrf.mxu0 }
 0x817   :  { %9876 = vst [vmem:[#allocation6_spill] sm:$0xff] %v7232_v35 }
 0x81e   :  { %v1673_v6 = vpop.f32.mrf.mxu0 }
 0x81f   :  { %v1674_v49 = vadd.f32 %v1673_v6, %v5899_v34 }
 0x821   :  { %v1689_v47 = vadd.f32 %v1685_v57, %v1674_v49 }
 0x823   :  { %v7266_v44 = vsel %vm1542_vm10, %v1674_v49, %v1689_v47  ;;  %vm1801_vm10 = vcmp.gt.f32.partialorder %v7206_v31, 0.5 }
 0x826   :  { %v1676_v17 = vpop.f32.mrf.mxu0 }
 0x827   :  { %v1677_v19 = vadd.f32 %v1676_v17, %v5891_v25 }
 0x829   :  { %v1690_v35 = vadd.f32 %v1686_v39, %v1677_v19 }
 0x82b   :  { %v7256_v6 = vsel %vm1543_vm9, %v1677_v19, %v1690_v35  ;;  %v2046_v35 = vmul.f32 0.2, %v7167_v1  ;;  %v2045_v19 = vmul.f32 0.2, %v7181_v5  ;;  %vm1802_vm9 = vcmp.gt.f32.partialorder %v7214_v8, 0.5 }
 0x82c   :  { %vm1698_vm13 = vcmp.gt.f32.partialorder %v7256_v6, 0.5 }
 0x82d   :  { %v2050_v39 = vadd.f32 %v2046_v35, %v5676_v29 }
 0x82e   :  { %v1679_v40 = vpop.f32.mrf.mxu0 }
 0x82f   :  { %v1680_v61 = vadd.f32 %v1679_v40, %v5889_v24 }
 0x831   :  { %v1691_v14 = vadd.f32 %v1687_v48, %v1680_v61 }
 0x833   :  { %v7248_v17 = vsel %vm1544_vm8, %v1680_v61, %v1691_v14  ;;  %v2047_v61 = vmul.f32 0.2, %v7160_v2  ;;  %vm1799_vm8 = vcmp.gt.f32.partialorder %v7137_v51, 0.5 }
 0x834   :  { %vm1699_vm12 = vcmp.gt.f32.partialorder %v7248_v17, 0.5 }
 0x835   :  { %v2051_v18 = vadd.f32 %v2047_v61, %v5668_v22 }
 0x836   :  { %v1682_v26 = vpop.f32.mrf.mxu0 }
 0x837   :  { %v1683_v30 = vadd.f32 %v1682_v26, %v5880_v16  ;;  %v2044_v26 = vmul.f32 0.2, %v7192_v50  ;;  %v7304_v57 = vsel %vm1904_vm2, %v5668_v22, %v2051_v18 }
 0x838   :  { %vm2059_vm15 = vcmp.gt.f32.partialorder %v7304_v57, 0.5 }
 0x839   :  { %v1692_v4 = vadd.f32 %v1688_v13, %v1683_v30  ;;  %v2049_v13 = vadd.f32 %v2045_v19, %v5674_v28  ;;  %v1945_v19 = vmul.f32 0.2, %v7214_v8 }
 0x83b   :  { %v7244_v40 = vsel %vm1545_vm7, %v1683_v30, %v1692_v4  ;;  %vm1697_vm7 = vcmp.gt.f32.partialorder %v7266_v44, 0.5  ;;  %v1943_v30 = vmul.f32 0.2, %v7169_v23  ;;  %v7325_v2 = vsel %vm1902_vm4, %v5674_v28, %v2049_v13 }
 0x83c   :  { %vm1700_vm11 = vcmp.gt.f32.partialorder %v7244_v40, 0.5  ;;  %v1944_v23 = vmul.f32 0.2, %v7206_v31  ;;  %vm2057_vm1 = vcmp.gt.f32.partialorder %v7325_v2, 0.5 }
 0x83d   :  { %4887 = vmatpush.msk.msra.mxu1 %vm1700_vm11, %v9875_v60 }
 0x83e   :  { %v1930_v48 = vpop.f32.mrf.mxu0 }
 0x83f   :  { %v1931_v4 = vadd.f32 %v1930_v48, %v5754_v56  ;;  %4888 = vmatpush.msk.msra.mxu1 %vm1699_vm12, %v9875_v60 }
 0x841   :  { %v1946_v7 = vadd.f32 %v1942_v36, %v1931_v4  ;;  %4889 = vmatpush.msk.msra.mxu1 %vm1698_vm13, %v9875_v60  ;;  %v7311_v36 = vsel %vm1903_vm3, %v5676_v29, %v2050_v39 }
 0x842   :  { %vm2058_vm0 = vcmp.gt.f32.partialorder %v7311_v36, 0.5 }
 0x843   :  { %4890 = vmatpush.msk.msra.mxu1 %vm1697_vm7, %v9875_v60  ;;  %v7281_v47 = vsel %vm1799_vm8, %v1931_v4, %v1946_v7  ;;  %v2048_v4 = vadd.f32 %v2044_v26, %v5681_v32 }
 0x844   :  { %4891 = vmatmul.msk.f32.vlgmr.msra.gmra.mxu1 %vm189_vm5, %v6990_v12 }
 0x845   :  { %4909 = vmatpush.msk.msrb.mxu1 %vm1802_vm9, %v9875_v60  ;;  %v7336_v1 = vsel %vm1901_vm6, %v5681_v32, %v2048_v4 }
 0x846   :  { %v1933_v49 = vpop.f32.mrf.mxu0  ;;  %vm2056_vm2 = vcmp.gt.f32.partialorder %v7336_v1, 0.5 }
 0x847   :  { %4910 = vmatpush.msk.msrb.mxu1 %vm1801_vm10, %v9875_v60  ;;  %v1934_v14 = vadd.f32 %v1933_v49, %v5746_v52 }
 0x849   :  { %v1947_v48 = vadd.f32 %v1943_v30, %v1934_v14  ;;  %4911 = vmatpush.msk.msrb.mxu1 %vm1800_vm14, %v9875_v60 }
 0x84b   :  { %v7313_v61 = vsel %vm1800_vm14, %v1934_v14, %v1947_v48  ;;  %4912 = vmatpush.msk.msrb.mxu1 %vm1799_vm8, %v9875_v60 }
 0x84c   :  { %4892 = vmatmul.msk.f32.gmra.mxu1 %vm189_vm5, %v7037_v43  ;;  %vm1955_vm8 = vcmp.gt.f32.partialorder %v7313_v61, 0.5 }
 0x84d   :  { %4965 = vmatpush.msk.msra.mxu1 %vm2059_vm15, %v9875_v60 }
 0x84e   :  { %v1936_v51 = vpop.f32.mrf.mxu0 }
 0x84f   :  { %4966 = vmatpush.msk.msra.mxu1 %vm2058_vm0, %v9875_v60  ;;  %v1937_v5 = vadd.f32 %v1936_v51, %v5736_v46 }
 0x851   :  { %4967 = vmatpush.msk.msra.mxu1 %vm2057_vm1, %v9875_v60  ;;  %v1948_v7 = vadd.f32 %v1944_v23, %v1937_v5  ;;  %v1843_v23 = vmul.f32 0.2, %v7244_v40 }
 0x853   :  { %4968 = vmatpush.msk.msra.mxu1 %vm2056_vm2, %v9875_v60  ;;  %v7350_v50 = vsel %vm1801_vm10, %v1937_v5, %v1948_v7  ;;  %v1840_v5 = vmul.f32 0.2, %v7266_v44 }
 0x854   :  { %4913 = vmatmul.msk.f32.vlgmr.msrb.gmra.mxu1 %vm189_vm5, %v6749_v37 }
 0x856   :  { %v1939_v35 = vpop.f32.mrf.mxu0 }
 0x857   :  { %v1940_v18 = vadd.f32 %v1939_v35, %v5732_v42 }
 0x859   :  { %v1949_v39 = vadd.f32 %v1945_v19, %v1940_v18 }
 0x85b   :  { %v7358_v26 = vsel %vm1802_vm9, %v1940_v18, %v1949_v39 }
 0x85c   :  { %4914 = vmatmul.msk.f32.gmra.mxu1 %vm189_vm5, %v6762_v27 }
 0x864   :  { %4915 = vmatmul.msk.f32.gmra.mxu1 %vm189_vm5, %v6769_v41 }
 0x86c   :  { %4916 = vmatmul.msk.f32.gmra.mxu1 %vm189_vm5, %v6776_v62 }
 0x874   :  { %4969 = vmatmul.msk.f32.vlgmr.msra.gmra.mxu1 %vm189_vm5, %v6599_v63  ;;  %v1842_v63 = vmul.f32 0.2, %v7248_v17 }
 0x87c   :  { %4970 = vmatmul.msk.f32.gmra.mxu1 %vm189_vm5, %v6606_v3  ;;  %v1841_v3 = vmul.f32 0.2, %v7256_v6 }
 0x884   :  { %4971 = vmatmul.msk.f32.gmra.mxu1 %vm189_vm5, %v6613_v0 }
 0x88c   :  { %4972 = vmatmul.msk.f32.gmra.mxu1 %vm189_vm5, %v6620_v10 }
 0x8c1   :  { %v7374_v31 = vpop.f32.mrf.mxu1 }
 0x8c2   :  { %9877 = vst [vmem:[#allocation7_spill] sm:$0xff] %v7374_v31 }
 0x8c9   :  { %v7376_v8 = vpop.f32.mrf.mxu1 }
 0x8ca   :  { %9878 = vst [vmem:[#allocation8_spill] sm:$0xff] %v7376_v8 }
 0x8d1   :  { %v1828_v49 = vpop.f32.mrf.mxu1 }
 0x8d2   :  { %v1829_v0 = vadd.f32 %v1828_v49, %v5899_v34 }
 0x8d4   :  { %v1844_v18 = vadd.f32 %v1840_v5, %v1829_v0 }
 0x8d6   :  { %v7410_v17 = vsel %vm1697_vm7, %v1829_v0, %v1844_v18  ;;  %v2199_v0 = vmul.f32 0.2, %v7336_v1  ;;  %vm1956_vm7 = vcmp.gt.f32.partialorder %v7350_v50, 0.5 }
 0x8d8   :  { %v2203_v18 = vadd.f32 %v2199_v0, %v5681_v32 }
 0x8d9   :  { %v1831_v14 = vpop.f32.mrf.mxu1 }
 0x8da   :  { %v1832_v48 = vadd.f32 %v1831_v14, %v5891_v25 }
 0x8dc   :  { %v1845_v7 = vadd.f32 %v1841_v3, %v1832_v48  ;;  %v2200_v3 = vmul.f32 0.2, %v7325_v2 }
 0x8de   :  { %v7400_v49 = vsel %vm1698_vm13, %v1832_v48, %v1845_v7  ;;  %vm1957_vm13 = vcmp.gt.f32.partialorder %v7358_v26, 0.5  ;;  %v2204_v5 = vadd.f32 %v2200_v3, %v5674_v28 }
 0x8df   :  { %vm1853_vm6 = vcmp.gt.f32.partialorder %v7400_v49, 0.5 }
 0x8e1   :  { %v1834_v30 = vpop.f32.mrf.mxu1 }
 0x8e2   :  { %v1835_v13 = vadd.f32 %v1834_v30, %v5889_v24  ;;  %v2097_v30 = vmul.f32 0.2, %v7281_v47 }
 0x8e4   :  { %v1846_v51 = vadd.f32 %v1842_v63, %v1835_v13  ;;  %v2201_v63 = vmul.f32 0.2, %v7311_v36  ;;  %v7480_v36 = vsel %vm2056_vm2, %v5681_v32, %v2203_v18 }
 0x8e6   :  { %v7392_v39 = vsel %vm1699_vm12, %v1835_v13, %v1846_v51  ;;  %v2202_v13 = vmul.f32 0.2, %v7304_v57  ;;  %vm1954_vm12 = vcmp.gt.f32.partialorder %v7281_v47, 0.5  ;;  %v7469_v57 = vsel %vm2057_vm1, %v5674_v28, %v2204_v5 }
 0x8e7   :  { %vm1854_vm4 = vcmp.gt.f32.partialorder %v7392_v39, 0.5  ;;  %vm2212_vm14 = vcmp.gt.f32.partialorder %v7469_v57, 0.5 }
 0x8e8   :  { %v2206_v48 = vadd.f32 %v2202_v13, %v5668_v22 }
 0x8e9   :  { %v1837_v4 = vpop.f32.mrf.mxu1 }
 0x8ea   :  { %v1838_v10 = vadd.f32 %v1837_v4, %v5880_v16  ;;  %v2205_v4 = vadd.f32 %v2201_v63, %v5676_v29  ;;  %v7448_v7 = vsel %vm2059_vm15, %v5668_v22, %v2206_v48  ;;  %vm2211_vm15 = vcmp.gt.f32.partialorder %v7480_v36, 0.5 }
 0x8eb   :  { %vm2214_vm9 = vcmp.gt.f32.partialorder %v7448_v7, 0.5  ;;  %v2100_v63 = vmul.f32 0.2, %v7358_v26 }
 0x8ec   :  { %v1847_v35 = vadd.f32 %v1843_v23, %v1838_v10  ;;  %v2098_v23 = vmul.f32 0.2, %v7313_v61  ;;  %v2099_v61 = vmul.f32 0.2, %v7350_v50  ;;  %v7520_v50 = vld [vmem:[%s9865_s3 + $0x8] sm:$0xff] }
 0x8ee   :  { %v7388_v19 = vsel %vm1700_vm11, %v1838_v10, %v1847_v35  ;;  %vm1852_vm11 = vcmp.gt.f32.partialorder %v7410_v17, 0.5 }
 0x8ef   :  { %vm1855_vm3 = vcmp.gt.f32.partialorder %v7388_v19, 0.5 }
 0x8f0   :  { %4921 = vmatpush.msk.msra.mxu2 %vm1855_vm3, %v9875_v60 }
 0x8f1   :  { %v2085_v14 = vpop.f32.mrf.mxu1 }
 0x8f2   :  { %v2086_v40 = vadd.f32 %v2085_v14, %v5754_v56  ;;  %4922 = vmatpush.msk.msra.mxu2 %vm1854_vm4, %v9875_v60  ;;  %v7455_v14 = vsel %vm2058_vm0, %v5676_v29, %v2205_v4 }
 0x8f3   :  { %vm2213_vm10 = vcmp.gt.f32.partialorder %v7455_v14, 0.5 }
 0x8f4   :  { %v2101_v6 = vadd.f32 %v2097_v30, %v2086_v40  ;;  %4923 = vmatpush.msk.msra.mxu2 %vm1853_vm6, %v9875_v60 }
 0x8f6   :  { %4924 = vmatpush.msk.msra.mxu2 %vm1852_vm11, %v9875_v60  ;;  %v7425_v44 = vsel %vm1954_vm12, %v2086_v40, %v2101_v6 }
 0x8f7   :  { %4925 = vmatmul.msk.f32.vlgmr.msra.gmra.mxu2 %vm189_vm5, %v6990_v12 }
 0x8f8   :  { %4943 = vmatpush.msk.msrb.mxu2 %vm1957_vm13, %v9875_v60 }
 0x8f9   :  { %v2088_v51 = vpop.f32.mrf.mxu1 }
 0x8fa   :  { %4944 = vmatpush.msk.msrb.mxu2 %vm1956_vm7, %v9875_v60  ;;  %v2089_v10 = vadd.f32 %v2088_v51, %v5746_v52 }
 0x8fc   :  { %v2102_v35 = vadd.f32 %v2098_v23, %v2089_v10  ;;  %4945 = vmatpush.msk.msrb.mxu2 %vm1955_vm8, %v9875_v60  ;;  %v1997_v23 = vmul.f32 0.2, %v7392_v39 }
 0x8fe   :  { %v7457_v40 = vsel %vm1955_vm8, %v2089_v10, %v2102_v35  ;;  %4946 = vmatpush.msk.msrb.mxu2 %vm1954_vm12, %v9875_v60  ;;  %v1996_v35 = vmul.f32 0.2, %v7400_v49 }
 0x8ff   :  { %4926 = vmatmul.msk.f32.gmra.mxu2 %vm189_vm5, %v7037_v43  ;;  %vm2110_vm12 = vcmp.gt.f32.partialorder %v7457_v40, 0.5 }
 0x900   :  { %4999 = vmatpush.msk.msra.mxu2 %vm2214_vm9, %v9875_v60 }
 0x901   :  { %v2091_v47 = vpop.f32.mrf.mxu1 }
 0x902   :  { %5000 = vmatpush.msk.msra.mxu2 %vm2213_vm10, %v9875_v60  ;;  %v2092_v2 = vadd.f32 %v2091_v47, %v5736_v46 }
 0x904   :  { %5001 = vmatpush.msk.msra.mxu2 %vm2212_vm14, %v9875_v60  ;;  %v2103_v30 = vadd.f32 %v2099_v61, %v2092_v2 }
 0x906   :  { %5002 = vmatpush.msk.msra.mxu2 %vm2211_vm15, %v9875_v60  ;;  %v7494_v1 = vsel %vm1956_vm7, %v2092_v2, %v2103_v30  ;;  %v1998_v30 = vmul.f32 0.2, %v7388_v19 }
 0x907   :  { %4947 = vmatmul.msk.f32.vlgmr.msrb.gmra.mxu2 %vm189_vm5, %v6749_v37  ;;  %v7513_v37 = vld [vmem:[%s9865_s3] sm:$0xff] }
 0x909   :  { %v2094_v13 = vpop.f32.mrf.mxu1 }
 0x90a   :  { %v2095_v6 = vadd.f32 %v2094_v13, %v5732_v42  ;;  %v1995_v13 = vmul.f32 0.2, %v7410_v17 }
 0x90c   :  { %v2104_v48 = vadd.f32 %v2100_v63, %v2095_v6 }
 0x90e   :  { %v7502_v3 = vsel %vm1957_vm13, %v2095_v6, %v2104_v48 }
 0x90f   :  { %4948 = vmatmul.msk.f32.gmra.mxu2 %vm189_vm5, %v6762_v27  ;;  %v7527_v27 = vld [vmem:[%s9865_s3 + $0x10] sm:$0xff] }
 0x917   :  { %4949 = vmatmul.msk.f32.gmra.mxu2 %vm189_vm5, %v6769_v41  ;;  %v7534_v41 = vld [vmem:[%s9865_s3 + $0x18] sm:$0xff] }
 0x91f   :  { %4950 = vmatmul.msk.f32.gmra.mxu2 %vm189_vm5, %v6776_v62 }
 0x927   :  { %5003 = vmatmul.msk.f32.vlgmr.msra.gmra.mxu2 %vm189_vm5, %v7513_v37 }
 0x92f   :  { %5004 = vmatmul.msk.f32.gmra.mxu2 %vm189_vm5, %v7520_v50 }
 0x937   :  { %5005 = vmatmul.msk.f32.gmra.mxu2 %vm189_vm5, %v7527_v27 }
 0x93f   :  { %5006 = vmatmul.msk.f32.gmra.mxu2 %vm189_vm5, %v7534_v41 }
 0x97a   :  { %v7538_v62 = vpop.f32.mrf.mxu2 }
 0x97b   :  { %9879 = vst [vmem:[#allocation9_spill] sm:$0xff] %v7538_v62 }
 0x982   :  { %v7540_v26 = vpop.f32.mrf.mxu2 }
 0x983   :  { %9880 = vst [vmem:[#allocation10_spill] sm:$0xff] %v7540_v26 }
 0x98a   :  { %v1983_v4 = vpop.f32.mrf.mxu2 }
 0x98b   :  { %v1984_v47 = vadd.f32 %v1983_v4, %v5899_v34 }
 0x98d   :  { %v1999_v48 = vadd.f32 %v1995_v13, %v1984_v47 }
 0x98f   :  { %v7574_v39 = vsel %vm1852_vm11, %v1984_v47, %v1999_v48  ;;  %v2355_v47 = vmul.f32 0.2, %v7469_v57  ;;  %vm2111_vm11 = vcmp.gt.f32.partialorder %v7494_v1, 0.5 }
 0x992   :  { %v1986_v0 = vpop.f32.mrf.mxu2 }
 0x993   :  { %v1987_v5 = vadd.f32 %v1986_v0, %v5891_v25 }
 0x995   :  { %v2000_v6 = vadd.f32 %v1996_v35, %v1987_v5  ;;  %v2252_v35 = vmul.f32 0.2, %v7425_v44 }
 0x997   :  { %v7564_v4 = vsel %vm1853_vm6, %v1987_v5, %v2000_v6  ;;  %v2356_v5 = vmul.f32 0.2, %v7455_v14  ;;  %vm2112_vm6 = vcmp.gt.f32.partialorder %v7502_v3, 0.5  ;;  %v2253_v6 = vmul.f32 0.2, %v7457_v40 }
 0x998   :  { %vm2008_vm2 = vcmp.gt.f32.partialorder %v7564_v4, 0.5  ;;  %v2254_v40 = vmul.f32 0.2, %v7494_v1  ;;  %v7676_v1 = vld [vmem:[%s9866_s5 + $0x8] sm:$0xff] }
 0x99a   :  { %v1989_v51 = vpop.f32.mrf.mxu2 }
 0x99b   :  { %v1990_v10 = vadd.f32 %v1989_v51, %v5889_v24 }
 0x99d   :  { %v2001_v61 = vadd.f32 %v1997_v23, %v1990_v10 }
 0x99f   :  { %v7556_v0 = vsel %vm1854_vm4, %v1990_v10, %v2001_v61  ;;  %v2357_v10 = vmul.f32 0.2, %v7448_v7  ;;  %vm2109_vm4 = vcmp.gt.f32.partialorder %v7425_v44, 0.5  ;;  %v2360_v61 = vadd.f32 %v2356_v5, %v5676_v29  ;;  %v7663_v5 = vld [vmem:[%s9866_s5] sm:$0xff] }
 0x9a0   :  { %vm2009_vm1 = vcmp.gt.f32.partialorder %v7556_v0, 0.5 }
 0x9a2   :  { %v1992_v18 = vpop.f32.mrf.mxu2 }
 0x9a3   :  { %v1993_v2 = vadd.f32 %v1992_v18, %v5880_v16  ;;  %v2361_v18 = vadd.f32 %v2357_v10, %v5668_v22 }
 0x9a5   :  { %v2002_v63 = vadd.f32 %v1998_v30, %v1993_v2  ;;  %v7612_v48 = vsel %vm2214_vm9, %v5668_v22, %v2361_v18 }
 0x9a6   :  { %vm2369_vm13 = vcmp.gt.f32.partialorder %v7612_v48, 0.5 }
 0x9a7   :  { %v7552_v51 = vsel %vm1855_vm3, %v1993_v2, %v2002_v63  ;;  %vm2007_vm3 = vcmp.gt.f32.partialorder %v7574_v39, 0.5  ;;  %v2354_v2 = vmul.f32 0.2, %v7480_v36  ;;  %v2359_v63 = vadd.f32 %v2355_v47, %v5674_v28 }
 0x9a8   :  { %vm2010_vm0 = vcmp.gt.f32.partialorder %v7552_v51, 0.5  ;;  %v2153_v8 = vmul.f32 0.2, %v7552_v51 }
 0x9a9   :  { %4955 = vmatpush.msk.msrb.mxu3 %vm2010_vm0, %v9875_v60  ;;  %v7633_v7 = vsel %vm2212_vm14, %v5674_v28, %v2359_v63 }
 0x9aa   :  { %v2240_v23 = vpop.f32.mrf.mxu2  ;;  %vm2367_vm8 = vcmp.gt.f32.partialorder %v7633_v7, 0.5 }
 0x9ab   :  { %v2241_v19 = vadd.f32 %v2240_v23, %v5754_v56  ;;  %4956 = vmatpush.msk.msrb.mxu3 %vm2009_vm1, %v9875_v60 }
 0x9ad   :  { %v2256_v49 = vadd.f32 %v2252_v35, %v2241_v19  ;;  %4957 = vmatpush.msk.msrb.mxu3 %vm2008_vm2, %v9875_v60  ;;  %v7619_v35 = vsel %vm2213_vm10, %v5676_v29, %v2360_v61  ;;  %v2255_v61 = vmul.f32 0.2, %v7502_v3  ;;  %v7690_v3 = vld [vmem:[%s9866_s5 + $0x18] sm:$0xff] }
 0x9ae   :  { %vm2368_vm7 = vcmp.gt.f32.partialorder %v7619_v35, 0.5 }
 0x9af   :  { %4958 = vmatpush.msk.msrb.mxu3 %vm2007_vm3, %v9875_v60  ;;  %v7589_v17 = vsel %vm2109_vm4, %v2241_v19, %v2256_v49  ;;  %v2358_v19 = vadd.f32 %v2354_v2, %v5681_v32 }
 0x9b0   :  { %4959 = vmatmul.msk.f32.vlgmr.msrb.gmra.mxu3 %vm189_vm5, %v6990_v12 }
 0x9b1   :  { %4977 = vmatpush.msk.msra.mxu3 %vm2112_vm6, %v9875_v60  ;;  %v7644_v14 = vsel %vm2211_vm15, %v5681_v32, %v2358_v19 }
 0x9b2   :  { %v2243_v30 = vpop.f32.mrf.mxu2  ;;  %vm2366_vm9 = vcmp.gt.f32.partialorder %v7644_v14, 0.5 }
 0x9b3   :  { %4978 = vmatpush.msk.msra.mxu3 %vm2111_vm11, %v9875_v60  ;;  %v2244_v13 = vadd.f32 %v2243_v30, %v5746_v52 }
 0x9b5   :  { %v2257_v23 = vadd.f32 %v2253_v6, %v2244_v13  ;;  %4979 = vmatpush.msk.msra.mxu3 %vm2110_vm12, %v9875_v60 }
 0x9b7   :  { %v7621_v10 = vsel %vm2110_vm12, %v2244_v13, %v2257_v23  ;;  %4980 = vmatpush.msk.msra.mxu3 %vm2109_vm4, %v9875_v60  ;;  %v7683_v13 = vld [vmem:[%s9866_s5 + $0x10] sm:$0xff] }
 0x9b8   :  { %4960 = vmatmul.msk.f32.gmra.mxu3 %vm189_vm5, %v7037_v43  ;;  %vm2265_vm4 = vcmp.gt.f32.partialorder %v7621_v10, 0.5 }
 0x9b9   :  { %5033 = vmatpush.msk.msrb.mxu3 %vm2369_vm13, %v9875_v60 }
 0x9ba   :  { %v2246_v44 = vpop.f32.mrf.mxu2 }
 0x9bb   :  { %5034 = vmatpush.msk.msrb.mxu3 %vm2368_vm7, %v9875_v60  ;;  %v2247_v57 = vadd.f32 %v2246_v44, %v5736_v46 }
 0x9bd   :  { %5035 = vmatpush.msk.msrb.mxu3 %vm2367_vm8, %v9875_v60  ;;  %v2258_v49 = vadd.f32 %v2254_v40, %v2247_v57 }
 0x9bf   :  { %5036 = vmatpush.msk.msrb.mxu3 %vm2366_vm9, %v9875_v60  ;;  %v7658_v36 = vsel %vm2111_vm11, %v2247_v57, %v2258_v49  ;;  %v2152_v57 = vmul.f32 0.2, %v7556_v0  ;;  %v2512_v0 = vmul.f32 0.2, %v7612_v48 }
 0x9c0   :  { %4981 = vmatmul.msk.f32.vlgmr.msra.gmra.mxu3 %vm189_vm5, %v7663_v5 }
 0x9c2   :  { %v2249_v18 = vpop.f32.mrf.mxu2 }
 0x9c3   :  { %v2250_v47 = vadd.f32 %v2249_v18, %v5732_v42  ;;  %v2151_v18 = vmul.f32 0.2, %v7564_v4 }
 0x9c5   :  { %v2259_v2 = vadd.f32 %v2255_v61, %v2250_v47 }
 0x9c7   :  { %v7671_v30 = vsel %vm2112_vm6, %v2250_v47, %v2259_v2 }
 0x9c8   :  { %4982 = vmatmul.msk.f32.gmra.mxu3 %vm189_vm5, %v7676_v1 }
 0x9d0   :  { %4983 = vmatmul.msk.f32.gmra.mxu3 %vm189_vm5, %v7683_v13 }
 0x9d8   :  { %4984 = vmatmul.msk.f32.gmra.mxu3 %vm189_vm5, %v7690_v3 }
 0x9e0   :  { %5037 = vmatmul.msk.f32.vlgmr.msrb.gmra.mxu3 %vm189_vm5, %v7513_v37 }
 0x9e8   :  { %5038 = vmatmul.msk.f32.gmra.mxu3 %vm189_vm5, %v7520_v50 }
 0x9f0   :  { %5039 = vmatmul.msk.f32.gmra.mxu3 %vm189_vm5, %v7527_v27 }
 0x9f8   :  { %5040 = vmatmul.msk.f32.gmra.mxu3 %vm189_vm5, %v7534_v41 }
 0xa33   :  { %v7702_v6 = vpop.f32.mrf.mxu3 }
 0xa34   :  { %9881 = vst [vmem:[#allocation11_spill] sm:$0xff] %v7702_v6 }
 0xa3b   :  { %v7704_v63 = vpop.f32.mrf.mxu3 }
 0xa3c   :  { %9882 = vst [vmem:[#allocation12_spill] sm:$0xff] %v7704_v63  ;;  %v2150_v63 = vmul.f32 0.2, %v7574_v39  ;;  %v2516_v39 = vadd.f32 %v2512_v0, %v5668_v22 }
 0xa43   :  { %v2138_v23 = vpop.f32.mrf.mxu3 }
 0xa44   :  { %v2139_v61 = vadd.f32 %v2138_v23, %v5899_v34 }
 0xa46   :  { %v2154_v31 = vadd.f32 %v2150_v63, %v2139_v61  ;;  %v2510_v63 = vmul.f32 0.2, %v7633_v7 }
 0xa48   :  { %v7738_v51 = vsel %vm2007_vm3, %v2139_v61, %v2154_v31  ;;  %vm2266_vm3 = vcmp.gt.f32.partialorder %v7658_v36, 0.5  ;;  %v7776_v61 = vsel %vm2369_vm13, %v5668_v22, %v2516_v39 }
 0xa49   :  { %vm2524_vm6 = vcmp.gt.f32.partialorder %v7776_v61, 0.5 }
 0xa4b   :  { %v2141_v19 = vpop.f32.mrf.mxu3 }
 0xa4c   :  { %v2142_v49 = vadd.f32 %v2141_v19, %v5891_v25 }
 0xa4e   :  { %v2155_v6 = vadd.f32 %v2151_v18, %v2142_v49 }
 0xa50   :  { %v7728_v23 = vsel %vm2008_vm2, %v2142_v49, %v2155_v6  ;;  %v2511_v6 = vmul.f32 0.2, %v7619_v35  ;;  %vm2267_vm2 = vcmp.gt.f32.partialorder %v7671_v30, 0.5 }
 0xa51   :  { %vm2163_vm15 = vcmp.gt.f32.partialorder %v7728_v23, 0.5 }
 0xa53   :  { %v2144_v44 = vpop.f32.mrf.mxu3 }
 0xa54   :  { %v2145_v40 = vadd.f32 %v2144_v44, %v5889_v24 }
 0xa56   :  { %v2156_v2 = vadd.f32 %v2152_v57, %v2145_v40  ;;  %v2509_v57 = vmul.f32 0.2, %v7644_v14 }
 0xa58   :  { %v7720_v19 = vsel %vm2009_vm1, %v2145_v40, %v2156_v2  ;;  %vm2264_vm1 = vcmp.gt.f32.partialorder %v7589_v17, 0.5  ;;  %v2515_v40 = vadd.f32 %v2511_v6, %v5676_v29  ;;  %v2410_v6 = vmul.f32 0.2, %v7671_v30 }
 0xa59   :  { %vm2164_vm14 = vcmp.gt.f32.partialorder %v7720_v19, 0.5 }
 0xa5b   :  { %v2147_v47 = vpop.f32.mrf.mxu3 }
 0xa5c   :  { %v2148_v26 = vadd.f32 %v2147_v47, %v5880_v16  ;;  %v2514_v47 = vadd.f32 %v2510_v63, %v5674_v28 }
 0xa5e   :  { %v2157_v62 = vadd.f32 %v2153_v8, %v2148_v26  ;;  %v7797_v48 = vsel %vm2367_vm8, %v5674_v28, %v2514_v47 }
 0xa5f   :  { %vm2522_vm12 = vcmp.gt.f32.partialorder %v7797_v48, 0.5 }
 0xa60   :  { %v7716_v44 = vsel %vm2010_vm0, %v2148_v26, %v2157_v62  ;;  %v2407_v26 = vmul.f32 0.2, %v7589_v17  ;;  %vm2162_vm0 = vcmp.gt.f32.partialorder %v7738_v51, 0.5 }
 0xa61   :  { %vm2165_vm10 = vcmp.gt.f32.partialorder %v7716_v44, 0.5 }
 0xa62   :  { %4989 = vmatpush.msk.msrb.mxu0 %vm2165_vm10, %v9875_v60 }
 0xa63   :  { %v2395_v8 = vpop.f32.mrf.mxu3 }
 0xa64   :  { %v2396_v62 = vadd.f32 %v2395_v8, %v5754_v56  ;;  %4990 = vmatpush.msk.msrb.mxu0 %vm2164_vm14, %v9875_v60  ;;  %v2513_v8 = vadd.f32 %v2509_v57, %v5681_v32 }
 0xa66   :  { %v2411_v4 = vadd.f32 %v2407_v26, %v2396_v62  ;;  %4991 = vmatpush.msk.msrb.mxu0 %vm2163_vm15, %v9875_v60  ;;  %v7808_v35 = vsel %vm2366_vm9, %v5681_v32, %v2513_v8 }
 0xa67   :  { %vm2521_vm13 = vcmp.gt.f32.partialorder %v7808_v35, 0.5 }
 0xa68   :  { %4992 = vmatpush.msk.msrb.mxu0 %vm2162_vm0, %v9875_v60  ;;  %v7753_v31 = vsel %vm2264_vm1, %v2396_v62, %v2411_v4  ;;  %v7783_v62 = vsel %vm2368_vm7, %v5676_v29, %v2515_v40 }
 0xa69   :  { %4993 = vmatmul.msk.f32.vlgmr.msrb.gmra.mxu0 %vm189_vm5, %v6990_v12  ;;  %v2408_v12 = vmul.f32 0.2, %v7621_v10  ;;  %vm2523_vm11 = vcmp.gt.f32.partialorder %v7783_v62, 0.5  ;;  %v2409_v10 = vmul.f32 0.2, %v7658_v36 }
 0xa6a   :  { %5011 = vmatpush.msk.msra.mxu0 %vm2267_vm2, %v9875_v60 }
 0xa6b   :  { %v2398_v49 = vpop.f32.mrf.mxu3 }
 0xa6c   :  { %5012 = vmatpush.msk.msra.mxu0 %vm2266_vm3, %v9875_v60  ;;  %v2399_v18 = vadd.f32 %v2398_v49, %v5746_v52 }
 0xa6e   :  { %v2412_v2 = vadd.f32 %v2408_v12, %v2399_v18  ;;  %5013 = vmatpush.msk.msra.mxu0 %vm2265_vm4, %v9875_v60  ;;  %v2307_v12 = vmul.f32 0.2, %v7720_v19 }
 0xa70   :  { %v7785_v26 = vsel %vm2265_vm4, %v2399_v18, %v2412_v2  ;;  %5014 = vmatpush.msk.msra.mxu0 %vm2264_vm1, %v9875_v60  ;;  %v2306_v2 = vmul.f32 0.2, %v7728_v23 }
 0xa71   :  { %4994 = vmatmul.msk.f32.gmra.mxu0 %vm189_vm5, %v7037_v43  ;;  %vm2420_vm1 = vcmp.gt.f32.partialorder %v7785_v26, 0.5 }
 0xa72   :  { %5067 = vmatpush.msk.msrb.mxu0 %vm2524_vm6, %v9875_v60 }
 0xa73   :  { %v2401_v17 = vpop.f32.mrf.mxu3 }
 0xa74   :  { %5068 = vmatpush.msk.msrb.mxu0 %vm2523_vm11, %v9875_v60  ;;  %v2402_v7 = vadd.f32 %v2401_v17, %v5736_v46 }
 0xa76   :  { %5069 = vmatpush.msk.msrb.mxu0 %vm2522_vm12, %v9875_v60  ;;  %v2413_v43 = vadd.f32 %v2409_v10, %v2402_v7 }
 0xa78   :  { %5070 = vmatpush.msk.msrb.mxu0 %vm2521_vm13, %v9875_v60  ;;  %v7822_v14 = vsel %vm2266_vm3, %v2402_v7, %v2413_v43  ;;  %v2308_v43 = vmul.f32 0.2, %v7716_v44 }
 0xa79   :  { %5015 = vmatmul.msk.f32.vlgmr.msra.gmra.mxu0 %vm189_vm5, %v7663_v5 }
 0xa7b   :  { %v2404_v0 = vpop.f32.mrf.mxu3 }
 0xa7c   :  { %v2405_v4 = vadd.f32 %v2404_v0, %v5732_v42  ;;  %v2305_v0 = vmul.f32 0.2, %v7738_v51 }
 0xa7e   :  { %v2414_v39 = vadd.f32 %v2410_v6, %v2405_v4 }
 0xa80   :  { %v7830_v63 = vsel %vm2267_vm2, %v2405_v4, %v2414_v39 }
 0xa81   :  { %5016 = vmatmul.msk.f32.gmra.mxu0 %vm189_vm5, %v7676_v1 }
 0xa89   :  { %5017 = vmatmul.msk.f32.gmra.mxu0 %vm189_vm5, %v7683_v13 }
 0xa91   :  { %5018 = vmatmul.msk.f32.gmra.mxu0 %vm189_vm5, %v7690_v3 }
 0xa99   :  { %5071 = vmatmul.msk.f32.vlgmr.msrb.gmra.mxu0 %vm189_vm5, %v7513_v37 }
 0xaa1   :  { %5072 = vmatmul.msk.f32.gmra.mxu0 %vm189_vm5, %v7520_v50 }
 0xaa9   :  { %5073 = vmatmul.msk.f32.gmra.mxu0 %vm189_vm5, %v7527_v27 }
 0xab1   :  { %5074 = vmatmul.msk.f32.gmra.mxu0 %vm189_vm5, %v7534_v41 }
 0xae6   :  { %v7846_v36 = vpop.f32.mrf.mxu0 }
 0xae7   :  { %9883 = vst [vmem:[#allocation13_spill] sm:$0xff] %v7846_v36 }
 0xaee   :  { %v7848_v30 = vpop.f32.mrf.mxu0 }
 0xaef   :  { %9884 = vst [vmem:[#allocation14_spill] sm:$0xff] %v7848_v30 }
 0xaf6   :  { %v2293_v40 = vpop.f32.mrf.mxu0 }
 0xaf7   :  { %v2294_v17 = vadd.f32 %v2293_v40, %v5899_v34 }
 0xaf9   :  { %v2309_v39 = vadd.f32 %v2305_v0, %v2294_v17 }
 0xafb   :  { %v7882_v19 = vsel %vm2162_vm0, %v2294_v17, %v2309_v39  ;;  %v2665_v17 = vmul.f32 0.2, %v7797_v48  ;;  %vm2421_vm0 = vcmp.gt.f32.partialorder %v7822_v14, 0.5  ;;  %v2564_v48 = vmul.f32 0.2, %v7822_v14 }
 0xafd   :  { %v2669_v39 = vadd.f32 %v2665_v17, %v5674_v28 }
 0xafe   :  { %v2296_v57 = vpop.f32.mrf.mxu0 }
 0xaff   :  { %v2297_v47 = vadd.f32 %v2296_v57, %v5891_v25 }
 0xb01   :  { %v2310_v4 = vadd.f32 %v2306_v2, %v2297_v47  ;;  %v2562_v2 = vmul.f32 0.2, %v7753_v31 }
 0xb03   :  { %v7872_v40 = vsel %vm2163_vm15, %v2297_v47, %v2310_v4  ;;  %v2666_v47 = vmul.f32 0.2, %v7783_v62  ;;  %vm2422_vm15 = vcmp.gt.f32.partialorder %v7830_v63, 0.5  ;;  %v7951_v62 = vld [vmem:[%s9867_s7 + $0x8] sm:$0x3] }
 0xb04   :  { %vm2318_vm9 = vcmp.gt.f32.partialorder %v7872_v40, 0.5 }
 0xb06   :  { %v2299_v49 = vpop.f32.mrf.mxu0 }
 0xb07   :  { %v2300_v18 = vadd.f32 %v2299_v49, %v5889_v24 }
 0xb09   :  { %v2311_v10 = vadd.f32 %v2307_v12, %v2300_v18 }
 0xb0b   :  { %v7864_v57 = vsel %vm2164_vm14, %v2300_v18, %v2311_v10  ;;  %v2667_v18 = vmul.f32 0.2, %v7776_v61  ;;  %vm2419_vm14 = vcmp.gt.f32.partialorder %v7753_v31, 0.5  ;;  %v7904_v10 = vld [vmem:[%s9867_s7] sm:$0xff]  ;;  %v7946_v61 = vsel %vm2522_vm12, %v5674_v28, %v2669_v39 }
 0xb0c   :  { %vm2319_vm8 = vcmp.gt.f32.partialorder %v7864_v57, 0.5  ;;  %vm2677_vm4 = vcmp.gt.f32.partialorder %v7946_v61, 0.5 }
 0xb0e   :  { %v2302_v8 = vpop.f32.mrf.mxu0 }
 0xb0f   :  { %v2303_v7 = vadd.f32 %v2302_v8, %v5880_v16  ;;  %v2671_v8 = vadd.f32 %v2667_v18, %v5668_v22 }
 0xb11   :  { %v2312_v6 = vadd.f32 %v2308_v43, %v2303_v7  ;;  %v2664_v43 = vmul.f32 0.2, %v7808_v35 }
 0xb13   :  { %v7860_v49 = vsel %vm2165_vm10, %v2303_v7, %v2312_v6  ;;  %vm2317_vm10 = vcmp.gt.f32.partialorder %v7882_v19, 0.5  ;;  %v2670_v7 = vadd.f32 %v2666_v47, %v5676_v29  ;;  %v2563_v6 = vmul.f32 0.2, %v7785_v26 }
 0xb14   :  { %vm2320_vm7 = vcmp.gt.f32.partialorder %v7860_v49, 0.5 }
 0xb15   :  { %5023 = vmatpush.msk.msrb.mxu1 %vm2320_vm7, %v9875_v60  ;;  %v7932_v18 = vsel %vm2523_vm11, %v5676_v29, %v2670_v7 }
 0xb16   :  { %v2550_v12 = vpop.f32.mrf.mxu0  ;;  %vm2678_vm3 = vcmp.gt.f32.partialorder %v7932_v18, 0.5 }
 0xb17   :  { %v2551_v44 = vadd.f32 %v2550_v12, %v5754_v56  ;;  %5024 = vmatpush.msk.msrb.mxu1 %vm2319_vm8, %v9875_v60  ;;  %v7925_v12 = vsel %vm2524_vm6, %v5668_v22, %v2671_v8 }
 0xb18   :  { %vm2679_vm2 = vcmp.gt.f32.partialorder %v7925_v12, 0.5 }
 0xb19   :  { %v2566_v23 = vadd.f32 %v2562_v2, %v2551_v44  ;;  %5025 = vmatpush.msk.msrb.mxu1 %vm2318_vm9, %v9875_v60  ;;  %v2668_v2 = vadd.f32 %v2664_v43, %v5681_v32  ;;  %v2565_v43 = vmul.f32 0.2, %v7830_v63 }
 0xb1b   :  { %5026 = vmatpush.msk.msrb.mxu1 %vm2317_vm10, %v9875_v60  ;;  %v7897_v51 = vsel %vm2419_vm14, %v2551_v44, %v2566_v23  ;;  %v7962_v26 = vsel %vm2521_vm13, %v5681_v32, %v2668_v2 }
 0xb1c   :  { %5027 = vmatmul.msk.f32.vlgmr.msrb.gmra.mxu1 %vm189_vm5, %v7904_v10  ;;  %vm2676_vm6 = vcmp.gt.f32.partialorder %v7962_v26, 0.5 }
 0xb1d   :  { %5045 = vmatpush.msk.msra.mxu1 %vm2422_vm15, %v9875_v60 }
 0xb1e   :  { %v2553_v0 = vpop.f32.mrf.mxu0 }
 0xb1f   :  { %5046 = vmatpush.msk.msra.mxu1 %vm2421_vm0, %v9875_v60  ;;  %v2554_v4 = vadd.f32 %v2553_v0, %v5746_v52 }
 0xb21   :  { %v2567_v44 = vadd.f32 %v2563_v6, %v2554_v4  ;;  %5047 = vmatpush.msk.msra.mxu1 %vm2420_vm1, %v9875_v60 }
 0xb23   :  { %v7934_v23 = vsel %vm2420_vm1, %v2554_v4, %v2567_v44  ;;  %5048 = vmatpush.msk.msra.mxu1 %vm2419_vm14, %v9875_v60 }
 0xb24   :  { %5028 = vmatmul.msk.f32.gmra.mxu1 %vm189_vm5, %v7951_v62  ;;  %vm2575_vm14 = vcmp.gt.f32.partialorder %v7934_v23, 0.5 }
 0xb25   :  { %5101 = vmatpush.msk.msrb.mxu1 %vm2679_vm2, %v9875_v60 }
 0xb26   :  { %v2556_v31 = vpop.f32.mrf.mxu0 }
 0xb27   :  { %5102 = vmatpush.msk.msrb.mxu1 %vm2678_vm3, %v9875_v60  ;;  %v2557_v47 = vadd.f32 %v2556_v31, %v5736_v46  ;;  %v2462_v31 = vmul.f32 0.2, %v7864_v57 }
 0xb29   :  { %5103 = vmatpush.msk.msrb.mxu1 %vm2677_vm4, %v9875_v60  ;;  %v2568_v8 = vadd.f32 %v2564_v48, %v2557_v47 }
 0xb2b   :  { %5104 = vmatpush.msk.msrb.mxu1 %vm2676_vm6, %v9875_v60  ;;  %v7976_v35 = vsel %vm2421_vm0, %v2557_v47, %v2568_v8  ;;  %v2461_v47 = vmul.f32 0.2, %v7872_v40  ;;  %v2821_v40 = vmul.f32 0.2, %v7932_v18 }
 0xb2c   :  { %5049 = vmatmul.msk.f32.vlgmr.msra.gmra.mxu1 %vm189_vm5, %v7663_v5 }
 0xb2e   :  { %v2559_v17 = vpop.f32.mrf.mxu0 }
 0xb2f   :  { %v2560_v7 = vadd.f32 %v2559_v17, %v5732_v42 }
 0xb31   :  { %v2569_v0 = vadd.f32 %v2565_v43, %v2560_v7 }
 0xb33   :  { %v7984_v4 = vsel %vm2422_vm15, %v2560_v7, %v2569_v0  ;;  %v2463_v0 = vmul.f32 0.2, %v7860_v49 }
 0xb34   :  { %5050 = vmatmul.msk.f32.gmra.mxu1 %vm189_vm5, %v7676_v1 }
 0xb3c   :  { %5051 = vmatmul.msk.f32.gmra.mxu1 %vm189_vm5, %v7683_v13 }
 0xb44   :  { %5052 = vmatmul.msk.f32.gmra.mxu1 %vm189_vm5, %v7690_v3 }
 0xb4c   :  { %5105 = vmatmul.msk.f32.vlgmr.msrb.gmra.mxu1 %vm189_vm5, %v7513_v37 }
 0xb54   :  { %5106 = vmatmul.msk.f32.gmra.mxu1 %vm189_vm5, %v7520_v50 }
 0xb5c   :  { %5107 = vmatmul.msk.f32.gmra.mxu1 %vm189_vm5, %v7527_v27 }
 0xb64   :  { %5108 = vmatmul.msk.f32.gmra.mxu1 %vm189_vm5, %v7534_v41 }
 0xb99   :  { %v8000_v14 = vpop.f32.mrf.mxu1 }
 0xb9a   :  { %9885 = vst [vmem:[#allocation15_spill] sm:$0xff] %v8000_v14 }
 0xba1   :  { %v8002_v63 = vpop.f32.mrf.mxu1 }
 0xba2   :  { %9886 = vst [vmem:[#allocation16_spill] sm:$0xff] %v8002_v63  ;;  %v2460_v63 = vmul.f32 0.2, %v7882_v19 }
 0xba9   :  { %v2448_v6 = vpop.f32.mrf.mxu1 }
 0xbaa   :  { %v2449_v17 = vadd.f32 %v2448_v6, %v5899_v34 }
 0xbac   :  { %v2464_v36 = vadd.f32 %v2460_v63, %v2449_v17  ;;  %v2822_v63 = vmul.f32 0.2, %v7925_v12 }
 0xbae   :  { %v8036_v57 = vsel %vm2317_vm10, %v2449_v17, %v2464_v36  ;;  %v2826_v19 = vadd.f32 %v2822_v63, %v5668_v22  ;;  %vm2576_vm10 = vcmp.gt.f32.partialorder %v7976_v35, 0.5 }
 0xbb1   :  { %v2451_v39 = vpop.f32.mrf.mxu1 }
 0xbb2   :  { %v2452_v48 = vadd.f32 %v2451_v39, %v5891_v25 }
 0xbb4   :  { %v2465_v30 = vadd.f32 %v2461_v47, %v2452_v48  ;;  %v2819_v47 = vmul.f32 0.2, %v7962_v26 }
 0xbb6   :  { %v8026_v6 = vsel %vm2318_vm9, %v2452_v48, %v2465_v30  ;;  %vm2577_vm9 = vcmp.gt.f32.partialorder %v7984_v4, 0.5  ;;  %v2825_v48 = vadd.f32 %v2821_v40, %v5676_v29 }
 0xbb7   :  { %vm2473_vm13 = vcmp.gt.f32.partialorder %v8026_v6, 0.5 }
 0xbb9   :  { %v2454_v44 = vpop.f32.mrf.mxu1 }
 0xbba   :  { %v2455_v2 = vadd.f32 %v2454_v44, %v5889_v24 }
 0xbbc   :  { %v2466_v7 = vadd.f32 %v2462_v31, %v2455_v2 }
 0xbbe   :  { %v8018_v39 = vsel %vm2319_vm8, %v2455_v2, %v2466_v7  ;;  %vm2574_vm8 = vcmp.gt.f32.partialorder %v7897_v51, 0.5  ;;  %v2820_v2 = vmul.f32 0.2, %v7946_v61  ;;  %v2718_v7 = vmul.f32 0.2, %v7934_v23 }
 0xbbf   :  { %vm2474_vm12 = vcmp.gt.f32.partialorder %v8018_v39, 0.5  ;;  %v2719_v23 = vmul.f32 0.2, %v7976_v35 }
 0xbc1   :  { %v2457_v8 = vpop.f32.mrf.mxu1 }
 0xbc2   :  { %v2458_v43 = vadd.f32 %v2457_v8, %v5880_v16 }
 0xbc4   :  { %v2467_v14 = vadd.f32 %v2463_v0, %v2458_v43  ;;  %v8074_v0 = vsel %vm2679_vm2, %v5668_v22, %v2826_v19 }
 0xbc5   :  { %vm2834_vm15 = vcmp.gt.f32.partialorder %v8074_v0, 0.5 }
 0xbc6   :  { %v8014_v44 = vsel %vm2320_vm7, %v2458_v43, %v2467_v14  ;;  %v2717_v14 = vmul.f32 0.2, %v7897_v51  ;;  %vm2472_vm7 = vcmp.gt.f32.partialorder %v8036_v57, 0.5  ;;  %v2824_v43 = vadd.f32 %v2820_v2, %v5674_v28 }
 0xbc7   :  { %vm2475_vm11 = vcmp.gt.f32.partialorder %v8014_v44, 0.5  ;;  %v2720_v2 = vmul.f32 0.2, %v7984_v4 }
 0xbc8   :  { %5057 = vmatpush.msk.msrb.mxu2 %vm2475_vm11, %v9875_v60  ;;  %v8095_v12 = vsel %vm2677_vm4, %v5674_v28, %v2824_v43 }
 0xbc9   :  { %v2705_v31 = vpop.f32.mrf.mxu1  ;;  %vm2832_vm1 = vcmp.gt.f32.partialorder %v8095_v12, 0.5 }
 0xbca   :  { %v2706_v49 = vadd.f32 %v2705_v31, %v5754_v56  ;;  %5058 = vmatpush.msk.msrb.mxu2 %vm2474_vm12, %v9875_v60 }
 0xbcc   :  { %v2721_v30 = vadd.f32 %v2717_v14, %v2706_v49  ;;  %5059 = vmatpush.msk.msrb.mxu2 %vm2473_vm13, %v9875_v60  ;;  %v8081_v14 = vsel %vm2678_vm3, %v5676_v29, %v2825_v48 }
 0xbcd   :  { %vm2833_vm0 = vcmp.gt.f32.partialorder %v8081_v14, 0.5 }
 0xbce   :  { %5060 = vmatpush.msk.msrb.mxu2 %vm2472_vm7, %v9875_v60  ;;  %v8051_v36 = vsel %vm2574_vm8, %v2706_v49, %v2721_v30  ;;  %v2823_v49 = vadd.f32 %v2819_v47, %v5681_v32 }
 0xbcf   :  { %5061 = vmatmul.msk.f32.vlgmr.msrb.gmra.mxu2 %vm189_vm5, %v7904_v10 }
 0xbd0   :  { %5079 = vmatpush.msk.msra.mxu2 %vm2577_vm9, %v9875_v60  ;;  %v8106_v18 = vsel %vm2676_vm6, %v5681_v32, %v2823_v49 }
 0xbd1   :  { %v2708_v8 = vpop.f32.mrf.mxu1  ;;  %vm2831_vm2 = vcmp.gt.f32.partialorder %v8106_v18, 0.5 }
 0xbd2   :  { %5080 = vmatpush.msk.msra.mxu2 %vm2576_vm10, %v9875_v60  ;;  %v2709_v17 = vadd.f32 %v2708_v8, %v5746_v52 }
 0xbd4   :  { %v2722_v31 = vadd.f32 %v2718_v7, %v2709_v17  ;;  %5081 = vmatpush.msk.msra.mxu2 %vm2575_vm14, %v9875_v60 }
 0xbd6   :  { %v8083_v63 = vsel %vm2575_vm14, %v2709_v17, %v2722_v31  ;;  %5082 = vmatpush.msk.msra.mxu2 %vm2574_vm8, %v9875_v60  ;;  %v2617_v31 = vmul.f32 0.2, %v8018_v39 }
 0xbd7   :  { %5062 = vmatmul.msk.f32.gmra.mxu2 %vm189_vm5, %v7951_v62  ;;  %vm2730_vm8 = vcmp.gt.f32.partialorder %v8083_v63, 0.5 }
 0xbd8   :  { %5135 = vmatpush.msk.msrb.mxu2 %vm2834_vm15, %v9875_v60 }
 0xbd9   :  { %v2711_v51 = vpop.f32.mrf.mxu1 }
 0xbda   :  { %5136 = vmatpush.msk.msrb.mxu2 %vm2833_vm0, %v9875_v60  ;;  %v2712_v61 = vadd.f32 %v2711_v51, %v5736_v46  ;;  %v2616_v51 = vmul.f32 0.2, %v8026_v6 }
 0xbdc   :  { %5137 = vmatpush.msk.msrb.mxu2 %vm2832_vm1, %v9875_v60  ;;  %v2723_v30 = vadd.f32 %v2719_v23, %v2712_v61 }
 0xbde   :  { %5138 = vmatpush.msk.msrb.mxu2 %vm2831_vm2, %v9875_v60  ;;  %v8120_v26 = vsel %vm2576_vm10, %v2712_v61, %v2723_v30 }
 0xbdf   :  { %5083 = vmatmul.msk.f32.vlgmr.msra.gmra.mxu2 %vm189_vm5, %v7663_v5 }
 0xbe1   :  { %v2714_v40 = vpop.f32.mrf.mxu1 }
 0xbe2   :  { %v2715_v19 = vadd.f32 %v2714_v40, %v5732_v42 }
 0xbe4   :  { %v2724_v48 = vadd.f32 %v2720_v2, %v2715_v19  ;;  %v2615_v2 = vmul.f32 0.2, %v8036_v57 }
 0xbe6   :  { %v8128_v47 = vsel %vm2577_vm9, %v2715_v19, %v2724_v48  ;;  %v2618_v19 = vmul.f32 0.2, %v8014_v44 }
 0xbe7   :  { %5084 = vmatmul.msk.f32.gmra.mxu2 %vm189_vm5, %v7676_v1 }
 0xbef   :  { %5085 = vmatmul.msk.f32.gmra.mxu2 %vm189_vm5, %v7683_v13 }
 0xbf7   :  { %5086 = vmatmul.msk.f32.gmra.mxu2 %vm189_vm5, %v7690_v3 }
 0xbff   :  { %5139 = vmatmul.msk.f32.vlgmr.msrb.gmra.mxu2 %vm189_vm5, %v7513_v37 }
 0xc07   :  { %5140 = vmatmul.msk.f32.gmra.mxu2 %vm189_vm5, %v7520_v50 }
 0xc0f   :  { %5141 = vmatmul.msk.f32.gmra.mxu2 %vm189_vm5, %v7527_v27 }
 0xc17   :  { %5142 = vmatmul.msk.f32.gmra.mxu2 %vm189_vm5, %v7534_v41 }
 0xc52   :  { %v8144_v35 = vpop.f32.mrf.mxu2 }
 0xc53   :  { %9887 = vst [vmem:[#allocation17_spill] sm:$0xff] %v8144_v35 }
 0xc5a   :  { %v8146_v4 = vpop.f32.mrf.mxu2 }
 0xc5b   :  { %9888 = vst [vmem:[#allocation18_spill] sm:$0xff] %v8146_v4 }
 0xc62   :  { %v2603_v8 = vpop.f32.mrf.mxu2 }
 0xc63   :  { %v2604_v61 = vadd.f32 %v2603_v8, %v5899_v34 }
 0xc65   :  { %v2619_v35 = vadd.f32 %v2615_v2, %v2604_v61 }
 0xc67   :  { %v8180_v39 = vsel %vm2472_vm7, %v2604_v61, %v2619_v35  ;;  %v2974_v61 = vmul.f32 0.2, %v8106_v18  ;;  %vm2731_vm7 = vcmp.gt.f32.partialorder %v8120_v26, 0.5 }
 0xc6a   :  { %v2606_v17 = vpop.f32.mrf.mxu2 }
 0xc6b   :  { %v2607_v49 = vadd.f32 %v2606_v17, %v5891_v25 }
 0xc6d   :  { %v2620_v48 = vadd.f32 %v2616_v51, %v2607_v49  ;;  %v2975_v51 = vmul.f32 0.2, %v8095_v12 }
 0xc6f   :  { %v8170_v8 = vsel %vm2473_vm13, %v2607_v49, %v2620_v48  ;;  %v2976_v49 = vmul.f32 0.2, %v8081_v14  ;;  %vm2732_vm13 = vcmp.gt.f32.partialorder %v8128_v47, 0.5  ;;  %v2979_v2 = vadd.f32 %v2975_v51, %v5674_v28 }
 0xc70   :  { %vm2628_vm6 = vcmp.gt.f32.partialorder %v8170_v8, 0.5  ;;  %v2875_v51 = vmul.f32 0.2, %v8128_v47 }
 0xc72   :  { %v2609_v7 = vpop.f32.mrf.mxu2 }
 0xc73   :  { %v2610_v43 = vadd.f32 %v2609_v7, %v5889_v24 }
 0xc75   :  { %v2621_v30 = vadd.f32 %v2617_v31, %v2610_v43 }
 0xc77   :  { %v8162_v17 = vsel %vm2474_vm12, %v2610_v43, %v2621_v30  ;;  %v2977_v43 = vmul.f32 0.2, %v8074_v0  ;;  %vm2729_vm12 = vcmp.gt.f32.partialorder %v8051_v36, 0.5  ;;  %v8239_v0 = vsel %vm2832_vm1, %v5674_v28, %v2979_v2 }
 0xc78   :  { %vm2629_vm4 = vcmp.gt.f32.partialorder %v8162_v17, 0.5  ;;  %vm2987_vm14 = vcmp.gt.f32.partialorder %v8239_v0, 0.5 }
 0xc79   :  { %v2981_v35 = vadd.f32 %v2977_v43, %v5668_v22 }
 0xc7a   :  { %v2612_v23 = vpop.f32.mrf.mxu2 }
 0xc7b   :  { %v2613_v40 = vadd.f32 %v2612_v23, %v5880_v16  ;;  %v2980_v23 = vadd.f32 %v2976_v49, %v5676_v29  ;;  %v8218_v48 = vsel %vm2834_vm15, %v5668_v22, %v2981_v35 }
 0xc7c   :  { %vm2989_vm9 = vcmp.gt.f32.partialorder %v8218_v48, 0.5 }
 0xc7d   :  { %v2622_v4 = vadd.f32 %v2618_v19, %v2613_v40  ;;  %v2873_v19 = vmul.f32 0.2, %v8083_v63  ;;  %v2874_v63 = vmul.f32 0.2, %v8120_v26 }
 0xc7f   :  { %v8158_v7 = vsel %vm2475_vm11, %v2613_v40, %v2622_v4  ;;  %v2872_v4 = vmul.f32 0.2, %v8051_v36  ;;  %vm2627_vm11 = vcmp.gt.f32.partialorder %v8180_v39, 0.5 }
 0xc80   :  { %vm2630_vm3 = vcmp.gt.f32.partialorder %v8158_v7, 0.5 }
 0xc81   :  { %5091 = vmatpush.msk.msra.mxu3 %vm2630_vm3, %v9875_v60 }
 0xc82   :  { %v2860_v31 = vpop.f32.mrf.mxu2 }
 0xc83   :  { %v2861_v44 = vadd.f32 %v2860_v31, %v5754_v56  ;;  %5092 = vmatpush.msk.msra.mxu3 %vm2629_vm4, %v9875_v60 }
 0xc85   :  { %v2876_v6 = vadd.f32 %v2872_v4, %v2861_v44  ;;  %5093 = vmatpush.msk.msra.mxu3 %vm2628_vm6, %v9875_v60  ;;  %v8225_v4 = vsel %vm2833_vm0, %v5676_v29, %v2980_v23 }
 0xc86   :  { %vm2988_vm10 = vcmp.gt.f32.partialorder %v8225_v4, 0.5 }
 0xc87   :  { %5094 = vmatpush.msk.msra.mxu3 %vm2627_vm11, %v9875_v60  ;;  %v8195_v57 = vsel %vm2729_vm12, %v2861_v44, %v2876_v6  ;;  %v2978_v44 = vadd.f32 %v2974_v61, %v5681_v32 }
 0xc88   :  { %5095 = vmatmul.msk.f32.vlgmr.msra.gmra.mxu3 %vm189_vm5, %v7904_v10 }
 0xc89   :  { %5113 = vmatpush.msk.msrb.mxu3 %vm2732_vm13, %v9875_v60  ;;  %v8250_v14 = vsel %vm2831_vm2, %v5681_v32, %v2978_v44 }
 0xc8a   :  { %v2863_v30 = vpop.f32.mrf.mxu2  ;;  %vm2986_vm15 = vcmp.gt.f32.partialorder %v8250_v14, 0.5 }
 0xc8b   :  { %5114 = vmatpush.msk.msrb.mxu3 %vm2731_vm7, %v9875_v60  ;;  %v2864_v40 = vadd.f32 %v2863_v30, %v5746_v52 }
 0xc8d   :  { %v2877_v31 = vadd.f32 %v2873_v19, %v2864_v40  ;;  %5115 = vmatpush.msk.msrb.mxu3 %vm2730_vm8, %v9875_v60 }
 0xc8f   :  { %v8227_v43 = vsel %vm2730_vm8, %v2864_v40, %v2877_v31  ;;  %5116 = vmatpush.msk.msrb.mxu3 %vm2729_vm12, %v9875_v60 }
 0xc90   :  { %5096 = vmatmul.msk.f32.gmra.mxu3 %vm189_vm5, %v7951_v62  ;;  %vm2885_vm12 = vcmp.gt.f32.partialorder %v8227_v43, 0.5 }
 0xc91   :  { %5169 = vmatpush.msk.msra.mxu3 %vm2989_vm9, %v9875_v60 }
 0xc92   :  { %v2866_v36 = vpop.f32.mrf.mxu2 }
 0xc93   :  { %5170 = vmatpush.msk.msra.mxu3 %vm2988_vm10, %v9875_v60  ;;  %v2867_v12 = vadd.f32 %v2866_v36, %v5736_v46 }
 0xc95   :  { %5171 = vmatpush.msk.msra.mxu3 %vm2987_vm14, %v9875_v60  ;;  %v2878_v6 = vadd.f32 %v2874_v63, %v2867_v12  ;;  %v2773_v63 = vmul.f32 0.2, %v8158_v7 }
 0xc97   :  { %5172 = vmatpush.msk.msra.mxu3 %vm2986_vm15, %v9875_v60  ;;  %v8264_v18 = vsel %vm2731_vm7, %v2867_v12, %v2878_v6  ;;  %v2770_v12 = vmul.f32 0.2, %v8180_v39 }
 0xc98   :  { %5117 = vmatmul.msk.f32.vlgmr.msrb.gmra.mxu3 %vm189_vm5, %v7663_v5 }
 0xc9a   :  { %v2869_v49 = vpop.f32.mrf.mxu2 }
 0xc9b   :  { %v2870_v35 = vadd.f32 %v2869_v49, %v5732_v42 }
 0xc9d   :  { %v2879_v23 = vadd.f32 %v2875_v51, %v2870_v35 }
 0xc9f   :  { %v8272_v61 = vsel %vm2732_vm13, %v2870_v35, %v2879_v23 }
 0xca0   :  { %5118 = vmatmul.msk.f32.gmra.mxu3 %vm189_vm5, %v7676_v1 }
 0xca8   :  { %5119 = vmatmul.msk.f32.gmra.mxu3 %vm189_vm5, %v7683_v13 }
 0xcb0   :  { %5120 = vmatmul.msk.f32.gmra.mxu3 %vm189_vm5, %v7690_v3 }
 0xcb8   :  { %5173 = vmatmul.msk.f32.vlgmr.msra.gmra.mxu3 %vm189_vm5, %v7513_v37  ;;  %v2772_v37 = vmul.f32 0.2, %v8162_v17 }
 0xcc0   :  { %5174 = vmatmul.msk.f32.gmra.mxu3 %vm189_vm5, %v7520_v50  ;;  %v2771_v50 = vmul.f32 0.2, %v8170_v8 }
 0xcc8   :  { %5175 = vmatmul.msk.f32.gmra.mxu3 %vm189_vm5, %v7527_v27 }
 0xcd0   :  { %5176 = vmatmul.msk.f32.gmra.mxu3 %vm189_vm5, %v7534_v41 }
 0xd0b   :  { %v8288_v26 = vpop.f32.mrf.mxu3 }
 0xd0c   :  { %9889 = vst [vmem:[#allocation19_spill] sm:$0xff] %v8288_v26 }
 0xd13   :  { %v8290_v47 = vpop.f32.mrf.mxu3 }
 0xd14   :  { %9890 = vst [vmem:[#allocation20_spill] sm:$0xff] %v8290_v47 }
 0xd1b   :  { %v2758_v30 = vpop.f32.mrf.mxu3 }
 0xd1c   :  { %v2759_v27 = vadd.f32 %v2758_v30, %v5899_v34 }
 0xd1e   :  { %v2774_v35 = vadd.f32 %v2770_v12, %v2759_v27 }
 0xd20   :  { %v8324_v17 = vsel %vm2627_vm11, %v2759_v27, %v2774_v35  ;;  %v3129_v27 = vmul.f32 0.2, %v8250_v14  ;;  %vm2886_vm11 = vcmp.gt.f32.partialorder %v8264_v18, 0.5 }
 0xd22   :  { %v3133_v35 = vadd.f32 %v3129_v27, %v5681_v32 }
 0xd23   :  { %v2761_v40 = vpop.f32.mrf.mxu3 }
 0xd24   :  { %v2762_v31 = vadd.f32 %v2761_v40, %v5891_v25 }
 0xd26   :  { %v2775_v6 = vadd.f32 %v2771_v50, %v2762_v31  ;;  %v3130_v50 = vmul.f32 0.2, %v8239_v0  ;;  %v3029_v0 = vmul.f32 0.2, %v8264_v18  ;;  %v8434_v18 = vld [vmem:[%s9865_s3 + $0x8] sm:$0xff] }
 0xd28   :  { %v8314_v30 = vsel %vm2628_vm6, %v2762_v31, %v2775_v6  ;;  %vm2887_vm6 = vcmp.gt.f32.partialorder %v8272_v61, 0.5  ;;  %v3134_v12 = vadd.f32 %v3130_v50, %v5674_v28 }
 0xd29   :  { %vm2783_vm2 = vcmp.gt.f32.partialorder %v8314_v30, 0.5 }
 0xd2b   :  { %v2764_v19 = vpop.f32.mrf.mxu3 }
 0xd2c   :  { %v2765_v2 = vadd.f32 %v2764_v19, %v5889_v24  ;;  %v3027_v19 = vmul.f32 0.2, %v8195_v57 }
 0xd2e   :  { %v2776_v36 = vadd.f32 %v2772_v37, %v2765_v2  ;;  %v3131_v37 = vmul.f32 0.2, %v8225_v4  ;;  %v8394_v4 = vsel %vm2986_vm15, %v5681_v32, %v3133_v35 }
 0xd30   :  { %v8306_v23 = vsel %vm2629_vm4, %v2765_v2, %v2776_v36  ;;  %v3132_v2 = vmul.f32 0.2, %v8218_v48  ;;  %vm2884_vm4 = vcmp.gt.f32.partialorder %v8195_v57, 0.5  ;;  %v8383_v48 = vsel %vm2987_vm14, %v5674_v28, %v3134_v12 }
 0xd31   :  { %vm2784_vm1 = vcmp.gt.f32.partialorder %v8306_v23, 0.5  ;;  %vm3142_vm8 = vcmp.gt.f32.partialorder %v8383_v48, 0.5 }
 0xd32   :  { %v3136_v31 = vadd.f32 %v3132_v2, %v5668_v22 }
 0xd33   :  { %v2767_v44 = vpop.f32.mrf.mxu3 }
 0xd34   :  { %v2768_v41 = vadd.f32 %v2767_v44, %v5880_v16  ;;  %v3135_v44 = vadd.f32 %v3131_v37, %v5676_v29  ;;  %v8362_v6 = vsel %vm2989_vm9, %v5668_v22, %v3136_v31  ;;  %vm3141_vm9 = vcmp.gt.f32.partialorder %v8394_v4, 0.5 }
 0xd35   :  { %vm3144_vm13 = vcmp.gt.f32.partialorder %v8362_v6, 0.5  ;;  %v3030_v37 = vmul.f32 0.2, %v8272_v61 }
 0xd36   :  { %v2777_v49 = vadd.f32 %v2773_v63, %v2768_v41  ;;  %v3028_v63 = vmul.f32 0.2, %v8227_v43 }
 0xd38   :  { %v8302_v51 = vsel %vm2630_vm3, %v2768_v41, %v2777_v49  ;;  %vm2782_vm3 = vcmp.gt.f32.partialorder %v8324_v17, 0.5 }
 0xd39   :  { %vm2785_vm0 = vcmp.gt.f32.partialorder %v8302_v51, 0.5 }
 0xd3a   :  { %5125 = vmatpush.msk.msra.mxu0 %vm2785_vm0, %v9875_v60 }
 0xd3b   :  { %v3015_v40 = vpop.f32.mrf.mxu3 }
 0xd3c   :  { %v3016_v7 = vadd.f32 %v3015_v40, %v5754_v56  ;;  %5126 = vmatpush.msk.msra.mxu0 %vm2784_vm1, %v9875_v60  ;;  %v8369_v40 = vsel %vm2988_vm10, %v5676_v29, %v3135_v44 }
 0xd3d   :  { %vm3143_vm7 = vcmp.gt.f32.partialorder %v8369_v40, 0.5 }
 0xd3e   :  { %v3031_v8 = vadd.f32 %v3027_v19, %v3016_v7  ;;  %5127 = vmatpush.msk.msra.mxu0 %vm2783_vm2, %v9875_v60 }
 0xd40   :  { %5128 = vmatpush.msk.msra.mxu0 %vm2782_vm3, %v9875_v60  ;;  %v8339_v39 = vsel %vm2884_vm4, %v3016_v7, %v3031_v8 }
 0xd41   :  { %5129 = vmatmul.msk.f32.vlgmr.msra.gmra.mxu0 %vm189_vm5, %v7904_v10 }
 0xd42   :  { %5147 = vmatpush.msk.msrb.mxu0 %vm2887_vm6, %v9875_v60 }
 0xd43   :  { %v3018_v36 = vpop.f32.mrf.mxu3 }
 0xd44   :  { %5148 = vmatpush.msk.msrb.mxu0 %vm2886_vm11, %v9875_v60  ;;  %v3019_v41 = vadd.f32 %v3018_v36, %v5746_v52 }
 0xd46   :  { %v3032_v49 = vadd.f32 %v3028_v63, %v3019_v41  ;;  %5149 = vmatpush.msk.msrb.mxu0 %vm2885_vm12, %v9875_v60  ;;  %v2927_v63 = vmul.f32 0.2, %v8306_v23 }
 0xd48   :  { %5150 = vmatpush.msk.msrb.mxu0 %vm2884_vm4, %v9875_v60  ;;  %v8375_v43 = vsel %vm2885_vm12, %v3019_v41, %v3032_v49  ;;  %v2926_v49 = vmul.f32 0.2, %v8314_v30 }
 0xd49   :  { %5130 = vmatmul.msk.f32.gmra.mxu0 %vm189_vm5, %v7951_v62  ;;  %vm3040_vm4 = vcmp.gt.f32.partialorder %v8375_v43, 0.5 }
 0xd4a   :  { %5203 = vmatpush.msk.msra.mxu0 %vm3144_vm13, %v9875_v60 }
 0xd4b   :  { %v3021_v57 = vpop.f32.mrf.mxu3 }
 0xd4c   :  { %5204 = vmatpush.msk.msra.mxu0 %vm3143_vm7, %v9875_v60  ;;  %v3022_v7 = vadd.f32 %v3021_v57, %v5736_v46 }
 0xd4e   :  { %5205 = vmatpush.msk.msra.mxu0 %vm3142_vm8, %v9875_v60  ;;  %v3033_v19 = vadd.f32 %v3029_v0, %v3022_v7 }
 0xd50   :  { %5206 = vmatpush.msk.msra.mxu0 %vm3141_vm9, %v9875_v60  ;;  %v8408_v14 = vsel %vm2886_vm11, %v3022_v7, %v3033_v19  ;;  %v2928_v19 = vmul.f32 0.2, %v8302_v51 }
 0xd51   :  { %5151 = vmatmul.msk.f32.vlgmr.msrb.gmra.mxu0 %vm189_vm5, %v7663_v5  ;;  %v8427_v5 = vld [vmem:[%s9865_s3] sm:$0xff] }
 0xd53   :  { %v3024_v2 = vpop.f32.mrf.mxu3 }
 0xd54   :  { %v3025_v8 = vadd.f32 %v3024_v2, %v5732_v42  ;;  %v2925_v2 = vmul.f32 0.2, %v8324_v17 }
 0xd56   :  { %v3034_v31 = vadd.f32 %v3030_v37, %v3025_v8 }
 0xd58   :  { %v8416_v50 = vsel %vm2887_vm6, %v3025_v8, %v3034_v31 }
 0xd59   :  { %5152 = vmatmul.msk.f32.gmra.mxu0 %vm189_vm5, %v7676_v1  ;;  %v8441_v1 = vld [vmem:[%s9865_s3 + $0x10] sm:$0xff] }
 0xd61   :  { %5153 = vmatmul.msk.f32.gmra.mxu0 %vm189_vm5, %v7683_v13  ;;  %v8448_v13 = vld [vmem:[%s9865_s3 + $0x18] sm:$0xff] }
 0xd69   :  { %5154 = vmatmul.msk.f32.gmra.mxu0 %vm189_vm5, %v7690_v3 }
 0xd71   :  { %5207 = vmatmul.msk.f32.vlgmr.msra.gmra.mxu0 %vm189_vm5, %v8427_v5 }
 0xd79   :  { %5208 = vmatmul.msk.f32.gmra.mxu0 %vm189_vm5, %v8434_v18 }
 0xd81   :  { %5209 = vmatmul.msk.f32.gmra.mxu0 %vm189_vm5, %v8441_v1 }
 0xd89   :  { %5210 = vmatmul.msk.f32.gmra.mxu0 %vm189_vm5, %v8448_v13 }
 0xdbe   :  { %v8452_v3 = vpop.f32.mrf.mxu0 }
 0xdbf   :  { %9891 = vst [vmem:[#allocation21_spill] sm:$0xff] %v8452_v3 }
 0xdc6   :  { %v8454_v61 = vpop.f32.mrf.mxu0 }
 0xdc7   :  { %9892 = vst [vmem:[#allocation22_spill] sm:$0xff] %v8454_v61 }
 0xdce   :  { %v2913_v44 = vpop.f32.mrf.mxu0 }
 0xdcf   :  { %v2914_v57 = vadd.f32 %v2913_v44, %v5899_v34 }
 0xdd1   :  { %v2929_v31 = vadd.f32 %v2925_v2, %v2914_v57 }
 0xdd3   :  { %v8488_v23 = vsel %vm2782_vm3, %v2914_v57, %v2929_v31  ;;  %v3285_v57 = vmul.f32 0.2, %v8383_v48  ;;  %vm3041_vm3 = vcmp.gt.f32.partialorder %v8408_v14, 0.5  ;;  %v3184_v48 = vmul.f32 0.2, %v8408_v14  ;;  %v8590_v14 = vld [vmem:[%s9866_s5 + $0x8] sm:$0xff] }
 0xdd6   :  { %v2916_v27 = vpop.f32.mrf.mxu0 }
 0xdd7   :  { %v2917_v12 = vadd.f32 %v2916_v27, %v5891_v25 }
 0xdd9   :  { %v2930_v8 = vadd.f32 %v2926_v49, %v2917_v12  ;;  %v3182_v49 = vmul.f32 0.2, %v8339_v39 }
 0xddb   :  { %v8478_v44 = vsel %vm2783_vm2, %v2917_v12, %v2930_v8  ;;  %v3286_v12 = vmul.f32 0.2, %v8369_v40  ;;  %vm3042_vm2 = vcmp.gt.f32.partialorder %v8416_v50, 0.5  ;;  %v3183_v8 = vmul.f32 0.2, %v8375_v43 }
 0xddc   :  { %vm2938_vm15 = vcmp.gt.f32.partialorder %v8478_v44, 0.5 }
 0xdde   :  { %v2919_v36 = vpop.f32.mrf.mxu0 }
 0xddf   :  { %v2920_v41 = vadd.f32 %v2919_v36, %v5889_v24 }
 0xde1   :  { %v2931_v7 = vadd.f32 %v2927_v63, %v2920_v41 }
 0xde3   :  { %v8470_v27 = vsel %vm2784_vm1, %v2920_v41, %v2931_v7  ;;  %v3287_v41 = vmul.f32 0.2, %v8362_v6  ;;  %vm3039_vm1 = vcmp.gt.f32.partialorder %v8339_v39, 0.5  ;;  %v3290_v7 = vadd.f32 %v3286_v12, %v5676_v29  ;;  %v8577_v12 = vld [vmem:[%s9866_s5] sm:$0xff] }
 0xde4   :  { %vm2939_vm14 = vcmp.gt.f32.partialorder %v8470_v27, 0.5 }
 0xde6   :  { %v2922_v35 = vpop.f32.mrf.mxu0 }
 0xde7   :  { %v2923_v0 = vadd.f32 %v2922_v35, %v5880_v16  ;;  %v3291_v35 = vadd.f32 %v3287_v41, %v5668_v22 }
 0xde9   :  { %v2932_v37 = vadd.f32 %v2928_v19, %v2923_v0  ;;  %v8526_v31 = vsel %vm3144_vm13, %v5668_v22, %v3291_v35 }
 0xdea   :  { %vm3299_vm6 = vcmp.gt.f32.partialorder %v8526_v31, 0.5 }
 0xdeb   :  { %v8466_v36 = vsel %vm2785_vm0, %v2923_v0, %v2932_v37  ;;  %vm2937_vm0 = vcmp.gt.f32.partialorder %v8488_v23, 0.5  ;;  %v3284_v0 = vmul.f32 0.2, %v8394_v4  ;;  %v3289_v37 = vadd.f32 %v3285_v57, %v5674_v28 }
 0xdec   :  { %vm2940_vm10 = vcmp.gt.f32.partialorder %v8466_v36, 0.5  ;;  %v3083_v47 = vmul.f32 0.2, %v8466_v36 }
 0xded   :  { %5159 = vmatpush.msk.msra.mxu1 %vm2940_vm10, %v9875_v60  ;;  %v8547_v6 = vsel %vm3142_vm8, %v5674_v28, %v3289_v37 }
 0xdee   :  { %v3170_v63 = vpop.f32.mrf.mxu0  ;;  %vm3297_vm12 = vcmp.gt.f32.partialorder %v8547_v6, 0.5 }
 0xdef   :  { %v3171_v51 = vadd.f32 %v3170_v63, %v5754_v56  ;;  %5160 = vmatpush.msk.msra.mxu1 %vm2939_vm14, %v9875_v60 }
 0xdf1   :  { %v3186_v30 = vadd.f32 %v3182_v49, %v3171_v51  ;;  %5161 = vmatpush.msk.msra.mxu1 %vm2938_vm15, %v9875_v60  ;;  %v8533_v49 = vsel %vm3143_vm7, %v5676_v29, %v3290_v7  ;;  %v3185_v7 = vmul.f32 0.2, %v8416_v50  ;;  %v8604_v50 = vld [vmem:[%s9866_s5 + $0x18] sm:$0xff] }
 0xdf2   :  { %vm3298_vm11 = vcmp.gt.f32.partialorder %v8533_v49, 0.5 }
 0xdf3   :  { %5162 = vmatpush.msk.msra.mxu1 %vm2937_vm0, %v9875_v60  ;;  %v8503_v17 = vsel %vm3039_vm1, %v3171_v51, %v3186_v30  ;;  %v3288_v51 = vadd.f32 %v3284_v0, %v5681_v32 }
 0xdf4   :  { %5163 = vmatmul.msk.f32.vlgmr.msra.gmra.mxu1 %vm189_vm5, %v7904_v10 }
 0xdf5   :  { %5181 = vmatpush.msk.msrb.mxu1 %vm3042_vm2, %v9875_v60  ;;  %v8558_v40 = vsel %vm3141_vm9, %v5681_v32, %v3288_v51 }
 0xdf6   :  { %v3173_v19 = vpop.f32.mrf.mxu0  ;;  %vm3296_vm13 = vcmp.gt.f32.partialorder %v8558_v40, 0.5 }
 0xdf7   :  { %5182 = vmatpush.msk.msrb.mxu1 %vm3041_vm3, %v9875_v60  ;;  %v3174_v2 = vadd.f32 %v3173_v19, %v5746_v52 }
 0xdf9   :  { %v3187_v63 = vadd.f32 %v3183_v8, %v3174_v2  ;;  %5183 = vmatpush.msk.msrb.mxu1 %vm3040_vm4, %v9875_v60 }
 0xdfb   :  { %5184 = vmatpush.msk.msrb.mxu1 %vm3039_vm1, %v9875_v60  ;;  %v8539_v43 = vsel %vm3040_vm4, %v3174_v2, %v3187_v63  ;;  %v8597_v2 = vld [vmem:[%s9866_s5 + $0x10] sm:$0xff] }
 0xdfc   :  { %5164 = vmatmul.msk.f32.gmra.mxu1 %vm189_vm5, %v7951_v62  ;;  %vm3195_vm1 = vcmp.gt.f32.partialorder %v8539_v43, 0.5 }
 0xdfd   :  { %5237 = vmatpush.msk.msra.mxu1 %vm3299_vm6, %v9875_v60 }
 0xdfe   :  { %v3176_v39 = vpop.f32.mrf.mxu0 }
 0xdff   :  { %5238 = vmatpush.msk.msra.mxu1 %vm3298_vm11, %v9875_v60  ;;  %v3177_v41 = vadd.f32 %v3176_v39, %v5736_v46 }
 0xe01   :  { %5239 = vmatpush.msk.msra.mxu1 %vm3297_vm12, %v9875_v60  ;;  %v3188_v30 = vadd.f32 %v3184_v48, %v3177_v41 }
 0xe03   :  { %5240 = vmatpush.msk.msra.mxu1 %vm3296_vm13, %v9875_v60  ;;  %v8572_v4 = vsel %vm3041_vm3, %v3177_v41, %v3188_v30  ;;  %v3082_v30 = vmul.f32 0.2, %v8470_v27  ;;  %v3442_v27 = vmul.f32 0.2, %v8526_v31 }
 0xe04   :  { %5185 = vmatmul.msk.f32.vlgmr.msrb.gmra.mxu1 %vm189_vm5, %v8577_v12 }
 0xe06   :  { %v3179_v35 = vpop.f32.mrf.mxu0 }
 0xe07   :  { %v3180_v57 = vadd.f32 %v3179_v35, %v5732_v42  ;;  %v3081_v35 = vmul.f32 0.2, %v8478_v44 }
 0xe09   :  { %v3189_v0 = vadd.f32 %v3185_v7, %v3180_v57 }
 0xe0b   :  { %v8585_v19 = vsel %vm3042_vm2, %v3180_v57, %v3189_v0 }
 0xe0c   :  { %5186 = vmatmul.msk.f32.gmra.mxu1 %vm189_vm5, %v8590_v14 }
 0xe14   :  { %5187 = vmatmul.msk.f32.gmra.mxu1 %vm189_vm5, %v8597_v2 }
 0xe1c   :  { %5188 = vmatmul.msk.f32.gmra.mxu1 %vm189_vm5, %v8604_v50 }
 0xe24   :  { %5241 = vmatmul.msk.f32.vlgmr.msra.gmra.mxu1 %vm189_vm5, %v8427_v5 }
 0xe2c   :  { %5242 = vmatmul.msk.f32.gmra.mxu1 %vm189_vm5, %v8434_v18 }
 0xe34   :  { %5243 = vmatmul.msk.f32.gmra.mxu1 %vm189_vm5, %v8441_v1 }
 0xe3c   :  { %5244 = vmatmul.msk.f32.gmra.mxu1 %vm189_vm5, %v8448_v13 }
 0xe71   :  { %v8616_v8 = vpop.f32.mrf.mxu1 }
 0xe72   :  { %9893 = vst [vmem:[#allocation23_spill] sm:$0xff] %v8616_v8 }
 0xe79   :  { %v8618_v37 = vpop.f32.mrf.mxu1 }
 0xe7a   :  { %9894 = vst [vmem:[#allocation24_spill] sm:$0xff] %v8618_v37  ;;  %v3080_v37 = vmul.f32 0.2, %v8488_v23  ;;  %v3446_v23 = vadd.f32 %v3442_v27, %v5668_v22 }
 0xe81   :  { %v3068_v63 = vpop.f32.mrf.mxu1 }
 0xe82   :  { %v3069_v7 = vadd.f32 %v3068_v63, %v5899_v34 }
 0xe84   :  { %v3084_v26 = vadd.f32 %v3080_v37, %v3069_v7  ;;  %v3440_v37 = vmul.f32 0.2, %v8547_v6  ;;  %v3339_v6 = vmul.f32 0.2, %v8572_v4 }
 0xe86   :  { %v8652_v36 = vsel %vm2937_vm0, %v3069_v7, %v3084_v26  ;;  %vm3196_vm0 = vcmp.gt.f32.partialorder %v8572_v4, 0.5  ;;  %v8690_v7 = vsel %vm3299_vm6, %v5668_v22, %v3446_v23 }
 0xe87   :  { %vm3454_vm2 = vcmp.gt.f32.partialorder %v8690_v7, 0.5 }
 0xe89   :  { %v3071_v51 = vpop.f32.mrf.mxu1 }
 0xe8a   :  { %v3072_v48 = vadd.f32 %v3071_v51, %v5891_v25 }
 0xe8c   :  { %v3085_v8 = vadd.f32 %v3081_v35, %v3072_v48 }
 0xe8e   :  { %v8642_v63 = vsel %vm2938_vm15, %v3072_v48, %v3085_v8  ;;  %v3441_v8 = vmul.f32 0.2, %v8533_v49  ;;  %vm3197_vm15 = vcmp.gt.f32.partialorder %v8585_v19, 0.5  ;;  %v3439_v48 = vmul.f32 0.2, %v8558_v40 }
 0xe8f   :  { %vm3093_vm9 = vcmp.gt.f32.partialorder %v8642_v63, 0.5 }
 0xe91   :  { %v3074_v39 = vpop.f32.mrf.mxu1 }
 0xe92   :  { %v3075_v41 = vadd.f32 %v3074_v39, %v5889_v24 }
 0xe94   :  { %v3086_v0 = vadd.f32 %v3082_v30, %v3075_v41 }
 0xe96   :  { %v8634_v39 = vsel %vm2939_vm14, %v3075_v41, %v3086_v0  ;;  %vm3194_vm14 = vcmp.gt.f32.partialorder %v8503_v17, 0.5  ;;  %v3445_v41 = vadd.f32 %v3441_v8, %v5676_v29  ;;  %v3340_v8 = vmul.f32 0.2, %v8585_v19 }
 0xe97   :  { %vm3094_vm8 = vcmp.gt.f32.partialorder %v8634_v39, 0.5 }
 0xe99   :  { %v3077_v57 = vpop.f32.mrf.mxu1 }
 0xe9a   :  { %v3078_v61 = vadd.f32 %v3077_v57, %v5880_v16  ;;  %v3444_v57 = vadd.f32 %v3440_v37, %v5674_v28 }
 0xe9c   :  { %v3087_v3 = vadd.f32 %v3083_v47, %v3078_v61  ;;  %v8711_v31 = vsel %vm3297_vm12, %v5674_v28, %v3444_v57  ;;  %v3237_v57 = vmul.f32 0.2, %v8634_v39 }
 0xe9d   :  { %vm3452_vm4 = vcmp.gt.f32.partialorder %v8711_v31, 0.5 }
 0xe9e   :  { %v8630_v51 = vsel %vm2940_vm10, %v3078_v61, %v3087_v3  ;;  %v3337_v61 = vmul.f32 0.2, %v8503_v17  ;;  %vm3092_vm10 = vcmp.gt.f32.partialorder %v8652_v36, 0.5 }
 0xe9f   :  { %vm3095_vm7 = vcmp.gt.f32.partialorder %v8630_v51, 0.5 }
 0xea0   :  { %5193 = vmatpush.msk.msra.mxu2 %vm3095_vm7, %v9875_v60 }
 0xea1   :  { %v3325_v47 = vpop.f32.mrf.mxu1 }
 0xea2   :  { %v3326_v3 = vadd.f32 %v3325_v47, %v5754_v56  ;;  %5194 = vmatpush.msk.msra.mxu2 %vm3094_vm8, %v9875_v60  ;;  %v3443_v47 = vadd.f32 %v3439_v48, %v5681_v32 }
 0xea4   :  { %v3341_v44 = vadd.f32 %v3337_v61, %v3326_v3  ;;  %5195 = vmatpush.msk.msra.mxu2 %vm3093_vm9, %v9875_v60  ;;  %v8722_v49 = vsel %vm3296_vm13, %v5681_v32, %v3443_v47 }
 0xea5   :  { %vm3451_vm6 = vcmp.gt.f32.partialorder %v8722_v49, 0.5 }
 0xea6   :  { %5196 = vmatpush.msk.msra.mxu2 %vm3092_vm10, %v9875_v60  ;;  %v8667_v26 = vsel %vm3194_vm14, %v3326_v3, %v3341_v44  ;;  %v8697_v3 = vsel %vm3298_vm11, %v5676_v29, %v3445_v41 }
 0xea7   :  { %5197 = vmatmul.msk.f32.vlgmr.msra.gmra.mxu2 %vm189_vm5, %v7904_v10  ;;  %v3338_v10 = vmul.f32 0.2, %v8539_v43  ;;  %vm3453_vm3 = vcmp.gt.f32.partialorder %v8697_v3, 0.5 }
 0xea8   :  { %5215 = vmatpush.msk.msrb.mxu2 %vm3197_vm15, %v9875_v60 }
 0xea9   :  { %v3328_v30 = vpop.f32.mrf.mxu1 }
 0xeaa   :  { %5216 = vmatpush.msk.msrb.mxu2 %vm3196_vm0, %v9875_v60  ;;  %v3329_v35 = vadd.f32 %v3328_v30, %v5746_v52 }
 0xeac   :  { %v3342_v0 = vadd.f32 %v3338_v10, %v3329_v35  ;;  %5217 = vmatpush.msk.msrb.mxu2 %vm3195_vm1, %v9875_v60 }
 0xeae   :  { %5218 = vmatpush.msk.msrb.mxu2 %vm3194_vm14, %v9875_v60  ;;  %v8703_v43 = vsel %vm3195_vm1, %v3329_v35, %v3342_v0  ;;  %v3236_v0 = vmul.f32 0.2, %v8642_v63 }
 0xeaf   :  { %5198 = vmatmul.msk.f32.gmra.mxu2 %vm189_vm5, %v7951_v62  ;;  %vm3350_vm14 = vcmp.gt.f32.partialorder %v8703_v43, 0.5 }
 0xeb0   :  { %5271 = vmatpush.msk.msra.mxu2 %vm3454_vm2, %v9875_v60 }
 0xeb1   :  { %v3331_v17 = vpop.f32.mrf.mxu1 }
 0xeb2   :  { %5272 = vmatpush.msk.msra.mxu2 %vm3453_vm3, %v9875_v60  ;;  %v3332_v61 = vadd.f32 %v3331_v17, %v5736_v46 }
 0xeb4   :  { %5273 = vmatpush.msk.msra.mxu2 %vm3452_vm4, %v9875_v60  ;;  %v3343_v62 = vadd.f32 %v3339_v6, %v3332_v61 }
 0xeb6   :  { %5274 = vmatpush.msk.msra.mxu2 %vm3451_vm6, %v9875_v60  ;;  %v8736_v40 = vsel %vm3196_vm0, %v3332_v61, %v3343_v62  ;;  %v3238_v62 = vmul.f32 0.2, %v8630_v51 }
 0xeb7   :  { %5219 = vmatmul.msk.f32.vlgmr.msrb.gmra.mxu2 %vm189_vm5, %v8577_v12 }
 0xeb9   :  { %v3334_v27 = vpop.f32.mrf.mxu1 }
 0xeba   :  { %v3335_v44 = vadd.f32 %v3334_v27, %v5732_v42  ;;  %v3235_v27 = vmul.f32 0.2, %v8652_v36 }
 0xebc   :  { %v3344_v23 = vadd.f32 %v3340_v8, %v3335_v44 }
 0xebe   :  { %v8744_v37 = vsel %vm3197_vm15, %v3335_v44, %v3344_v23 }
 0xebf   :  { %5220 = vmatmul.msk.f32.gmra.mxu2 %vm189_vm5, %v8590_v14 }
 0xec7   :  { %5221 = vmatmul.msk.f32.gmra.mxu2 %vm189_vm5, %v8597_v2 }
 0xecf   :  { %5222 = vmatmul.msk.f32.gmra.mxu2 %vm189_vm5, %v8604_v50 }
 0xed7   :  { %5275 = vmatmul.msk.f32.vlgmr.msra.gmra.mxu2 %vm189_vm5, %v8427_v5 }
 0xedf   :  { %5276 = vmatmul.msk.f32.gmra.mxu2 %vm189_vm5, %v8434_v18 }
 0xee7   :  { %5277 = vmatmul.msk.f32.gmra.mxu2 %vm189_vm5, %v8441_v1 }
 0xeef   :  { %5278 = vmatmul.msk.f32.gmra.mxu2 %vm189_vm5, %v8448_v13 }
 0xf2a   :  { %v8760_v4 = vpop.f32.mrf.mxu2 }
 0xf2b   :  { %9895 = vst [vmem:[#allocation25_spill] sm:$0xff] %v8760_v4 }
 0xf32   :  { %v8762_v19 = vpop.f32.mrf.mxu2 }
 0xf33   :  { %9896 = vst [vmem:[#allocation26_spill] sm:$0xff] %v8762_v19 }
 0xf3a   :  { %v3223_v41 = vpop.f32.mrf.mxu2 }
 0xf3b   :  { %v3224_v17 = vadd.f32 %v3223_v41, %v5899_v34 }
 0xf3d   :  { %v3239_v23 = vadd.f32 %v3235_v27, %v3224_v17 }
 0xf3f   :  { %v8796_v39 = vsel %vm3092_vm10, %v3224_v17, %v3239_v23  ;;  %v3595_v17 = vmul.f32 0.2, %v8711_v31  ;;  %vm3351_vm10 = vcmp.gt.f32.partialorder %v8736_v40, 0.5 }
 0xf41   :  { %v3599_v23 = vadd.f32 %v3595_v17, %v5674_v28 }
 0xf42   :  { %v3226_v48 = vpop.f32.mrf.mxu2 }
 0xf43   :  { %v3227_v10 = vadd.f32 %v3226_v48, %v5891_v25 }
 0xf45   :  { %v3240_v44 = vadd.f32 %v3236_v0, %v3227_v10  ;;  %v3492_v0 = vmul.f32 0.2, %v8667_v26 }
 0xf47   :  { %v8786_v41 = vsel %vm3093_vm9, %v3227_v10, %v3240_v44  ;;  %v3596_v10 = vmul.f32 0.2, %v8697_v3  ;;  %vm3352_vm9 = vcmp.gt.f32.partialorder %v8744_v37, 0.5  ;;  %v8865_v3 = vld [vmem:[%s9867_s7 + $0x8] sm:$0x3] }
 0xf48   :  { %vm3248_vm13 = vcmp.gt.f32.partialorder %v8786_v41, 0.5 }
 0xf4a   :  { %v3229_v30 = vpop.f32.mrf.mxu2 }
 0xf4b   :  { %v3230_v35 = vadd.f32 %v3229_v30, %v5889_v24 }
 0xf4d   :  { %v3241_v61 = vadd.f32 %v3237_v57, %v3230_v35 }
 0xf4f   :  { %v8778_v30 = vsel %vm3094_vm8, %v3230_v35, %v3241_v61  ;;  %v3597_v35 = vmul.f32 0.2, %v8690_v7  ;;  %vm3349_vm8 = vcmp.gt.f32.partialorder %v8667_v26, 0.5  ;;  %v8818_v61 = vld [vmem:[%s9867_s7] sm:$0xff]  ;;  %v8860_v7 = vsel %vm3452_vm4, %v5674_v28, %v3599_v23 }
 0xf50   :  { %vm3249_vm12 = vcmp.gt.f32.partialorder %v8778_v30, 0.5  ;;  %vm3607_vm1 = vcmp.gt.f32.partialorder %v8860_v7, 0.5 }
 0xf52   :  { %v3232_v47 = vpop.f32.mrf.mxu2 }
 0xf53   :  { %v3233_v6 = vadd.f32 %v3232_v47, %v5880_v16  ;;  %v3601_v47 = vadd.f32 %v3597_v35, %v5668_v22 }
 0xf55   :  { %v3242_v8 = vadd.f32 %v3238_v62, %v3233_v6  ;;  %v3594_v62 = vmul.f32 0.2, %v8722_v49 }
 0xf57   :  { %v8774_v48 = vsel %vm3095_vm7, %v3233_v6, %v3242_v8  ;;  %vm3247_vm7 = vcmp.gt.f32.partialorder %v8796_v39, 0.5  ;;  %v3600_v6 = vadd.f32 %v3596_v10, %v5676_v29  ;;  %v3493_v8 = vmul.f32 0.2, %v8703_v43 }
 0xf58   :  { %vm3250_vm11 = vcmp.gt.f32.partialorder %v8774_v48, 0.5  ;;  %v3494_v10 = vmul.f32 0.2, %v8736_v40 }
 0xf59   :  { %5227 = vmatpush.msk.msrb.mxu3 %vm3250_vm11, %v9875_v60  ;;  %v8846_v35 = vsel %vm3453_vm3, %v5676_v29, %v3600_v6 }
 0xf5a   :  { %v3480_v57 = vpop.f32.mrf.mxu2  ;;  %vm3608_vm0 = vcmp.gt.f32.partialorder %v8846_v35, 0.5 }
 0xf5b   :  { %v3481_v51 = vadd.f32 %v3480_v57, %v5754_v56  ;;  %5228 = vmatpush.msk.msrb.mxu3 %vm3249_vm12, %v9875_v60  ;;  %v8839_v57 = vsel %vm3454_vm2, %v5668_v22, %v3601_v47 }
 0xf5c   :  { %vm3609_vm15 = vcmp.gt.f32.partialorder %v8839_v57, 0.5 }
 0xf5d   :  { %v3496_v63 = vadd.f32 %v3492_v0, %v3481_v51  ;;  %5229 = vmatpush.msk.msrb.mxu3 %vm3248_vm13, %v9875_v60  ;;  %v3598_v0 = vadd.f32 %v3594_v62, %v5681_v32  ;;  %v3495_v62 = vmul.f32 0.2, %v8744_v37 }
 0xf5f   :  { %5230 = vmatpush.msk.msrb.mxu3 %vm3247_vm7, %v9875_v60  ;;  %v8811_v36 = vsel %vm3349_vm8, %v3481_v51, %v3496_v63  ;;  %v8876_v31 = vsel %vm3451_vm6, %v5681_v32, %v3598_v0 }
 0xf60   :  { %5231 = vmatmul.msk.f32.vlgmr.msrb.gmra.mxu3 %vm189_vm5, %v8818_v61  ;;  %vm3606_vm2 = vcmp.gt.f32.partialorder %v8876_v31, 0.5 }
 0xf61   :  { %5249 = vmatpush.msk.msra.mxu3 %vm3352_vm9, %v9875_v60 }
 0xf62   :  { %v3483_v27 = vpop.f32.mrf.mxu2 }
 0xf63   :  { %5250 = vmatpush.msk.msra.mxu3 %vm3351_vm10, %v9875_v60  ;;  %v3484_v44 = vadd.f32 %v3483_v27, %v5746_v52 }
 0xf65   :  { %v3497_v51 = vadd.f32 %v3493_v8, %v3484_v44  ;;  %5251 = vmatpush.msk.msra.mxu3 %vm3350_vm14, %v9875_v60 }
 0xf67   :  { %5252 = vmatpush.msk.msra.mxu3 %vm3349_vm8, %v9875_v60  ;;  %v8852_v43 = vsel %vm3350_vm14, %v3484_v44, %v3497_v51 }
 0xf68   :  { %5232 = vmatmul.msk.f32.gmra.mxu3 %vm189_vm5, %v8865_v3  ;;  %vm3505_vm8 = vcmp.gt.f32.partialorder %v8852_v43, 0.5 }
 0xf69   :  { %5305 = vmatpush.msk.msrb.mxu3 %vm3609_vm15, %v9875_v60 }
 0xf6a   :  { %v3486_v26 = vpop.f32.mrf.mxu2 }
 0xf6b   :  { %5306 = vmatpush.msk.msrb.mxu3 %vm3608_vm0, %v9875_v60  ;;  %v3487_v63 = vadd.f32 %v3486_v26, %v5736_v46 }
 0xf6d   :  { %5307 = vmatpush.msk.msrb.mxu3 %vm3607_vm1, %v9875_v60  ;;  %v3498_v47 = vadd.f32 %v3494_v10, %v3487_v63  ;;  %v3391_v10 = vmul.f32 0.2, %v8786_v41  ;;  %v3751_v41 = vmul.f32 0.2, %v8846_v35 }
 0xf6f   :  { %5308 = vmatpush.msk.msrb.mxu3 %vm3606_vm2, %v9875_v60  ;;  %v8890_v49 = vsel %vm3351_vm10, %v3487_v63, %v3498_v47  ;;  %v3392_v63 = vmul.f32 0.2, %v8778_v30 }
 0xf70   :  { %5253 = vmatmul.msk.f32.vlgmr.msra.gmra.mxu3 %vm189_vm5, %v8577_v12 }
 0xf72   :  { %v3489_v17 = vpop.f32.mrf.mxu2 }
 0xf73   :  { %v3490_v6 = vadd.f32 %v3489_v17, %v5732_v42 }
 0xf75   :  { %v3499_v27 = vadd.f32 %v3495_v62, %v3490_v6 }
 0xf77   :  { %v8898_v44 = vsel %vm3352_vm9, %v3490_v6, %v3499_v27  ;;  %v3393_v27 = vmul.f32 0.2, %v8774_v48 }
 0xf78   :  { %5254 = vmatmul.msk.f32.gmra.mxu3 %vm189_vm5, %v8590_v14 }
 0xf80   :  { %5255 = vmatmul.msk.f32.gmra.mxu3 %vm189_vm5, %v8597_v2 }
 0xf88   :  { %5256 = vmatmul.msk.f32.gmra.mxu3 %vm189_vm5, %v8604_v50 }
 0xf90   :  { %5309 = vmatmul.msk.f32.vlgmr.msrb.gmra.mxu3 %vm189_vm5, %v8427_v5 }
 0xf98   :  { %5310 = vmatmul.msk.f32.gmra.mxu3 %vm189_vm5, %v8434_v18 }
 0xfa0   :  { %5311 = vmatmul.msk.f32.gmra.mxu3 %vm189_vm5, %v8441_v1 }
 0xfa8   :  { %5312 = vmatmul.msk.f32.gmra.mxu3 %vm189_vm5, %v8448_v13 }
 0xfe3   :  { %v8914_v40 = vpop.f32.mrf.mxu3 }
 0xfe4   :  { %9897 = vst [vmem:[#allocation27_spill] sm:$0xff] %v8914_v40 }
 0xfeb   :  { %v8916_v37 = vpop.f32.mrf.mxu3 }
 0xfec   :  { %9898 = vst [vmem:[#allocation28_spill] sm:$0xff] %v8916_v37  ;;  %v3390_v37 = vmul.f32 0.2, %v8796_v39 }
 0xff3   :  { %v3378_v8 = vpop.f32.mrf.mxu3 }
 0xff4   :  { %v3379_v17 = vadd.f32 %v3378_v8, %v5899_v34 }
 0xff6   :  { %v3394_v4 = vadd.f32 %v3390_v37, %v3379_v17  ;;  %v3752_v37 = vmul.f32 0.2, %v8839_v57 }
 0xff8   :  { %v8950_v30 = vsel %vm3247_vm7, %v3379_v17, %v3394_v4  ;;  %v3756_v39 = vadd.f32 %v3752_v37, %v5668_v22  ;;  %vm3506_vm7 = vcmp.gt.f32.partialorder %v8890_v49, 0.5 }
 0xffb   :  { %v3381_v23 = vpop.f32.mrf.mxu3 }
 0xffc   :  { %v3382_v26 = vadd.f32 %v3381_v23, %v5891_v25 }
 0xffe   :  { %v3395_v19 = vadd.f32 %v3391_v10, %v3382_v26  ;;  %v3749_v10 = vmul.f32 0.2, %v8876_v31 }
0x1000   :  { %v8940_v8 = vsel %vm3248_vm13, %v3382_v26, %v3395_v19  ;;  %vm3507_vm13 = vcmp.gt.f32.partialorder %v8898_v44, 0.5  ;;  %v3755_v26 = vadd.f32 %v3751_v41, %v5676_v29 }
0x1001   :  { %vm3403_vm6 = vcmp.gt.f32.partialorder %v8940_v8, 0.5 }
0x1003   :  { %v3384_v51 = vpop.f32.mrf.mxu3 }
0x1004   :  { %v3385_v0 = vadd.f32 %v3384_v51, %v5889_v24 }
0x1006   :  { %v3396_v6 = vadd.f32 %v3392_v63, %v3385_v0 }
0x1008   :  { %v8932_v51 = vsel %vm3249_vm12, %v3385_v0, %v3396_v6  ;;  %vm3504_vm12 = vcmp.gt.f32.partialorder %v8811_v36, 0.5  ;;  %v3750_v0 = vmul.f32 0.2, %v8860_v7  ;;  %v3648_v6 = vmul.f32 0.2, %v8852_v43 }
0x1009   :  { %vm3404_vm4 = vcmp.gt.f32.partialorder %v8932_v51, 0.5  ;;  %v3649_v7 = vmul.f32 0.2, %v8890_v49  ;;  %v489_v49 = vadd.f32 %v6312_v38, %v6168_v45  ;;  %v9899_v38 = vld [vmem:[#allocation2_spill] sm:$0xff] }
0x100b   :  { %v3387_v47 = vpop.f32.mrf.mxu3 }
0x100c   :  { %v3388_v62 = vadd.f32 %v3387_v47, %v5880_v16 }
0x100e   :  { %v3397_v40 = vadd.f32 %v3393_v27, %v3388_v62  ;;  %v8988_v27 = vsel %vm3609_vm15, %v5668_v22, %v3756_v39 }
0x100f   :  { %vm3764_vm9 = vcmp.gt.f32.partialorder %v8988_v27, 0.5 }
0x1010   :  { %v8928_v23 = vsel %vm3250_vm11, %v3388_v62, %v3397_v40  ;;  %v3647_v40 = vmul.f32 0.2, %v8811_v36  ;;  %vm3402_vm11 = vcmp.gt.f32.partialorder %v8950_v30, 0.5  ;;  %v3754_v62 = vadd.f32 %v3750_v0, %v5674_v28 }
0x1011   :  { %vm3405_vm3 = vcmp.gt.f32.partialorder %v8928_v23, 0.5  ;;  %v3650_v0 = vmul.f32 0.2, %v8898_v44  ;;  %v647_v44 = vadd.f32 %v6316_v58, %v489_v49  ;;  %v9907_v49 = vld [vmem:[#allocation6_spill] sm:$0xff] }
0x1012   :  { %5261 = vmatpush.msk.msrb.mxu0 %vm3405_vm3, %v9875_v60  ;;  %v9009_v57 = vsel %vm3607_vm1, %v5674_v28, %v3754_v62  ;;  %v492_v62 = vadd.f32 %v6314_v9, %v6170_v54  ;;  %v9904_v9 = vld [vmem:[#allocation11_spill] sm:$0xff] }
0x1013   :  { %v3635_v63 = vpop.f32.mrf.mxu3  ;;  %vm3762_vm14 = vcmp.gt.f32.partialorder %v9009_v57, 0.5 }
0x1014   :  { %v3636_v48 = vadd.f32 %v3635_v63, %v5754_v56  ;;  %5262 = vmatpush.msk.msrb.mxu0 %vm3404_vm4, %v9875_v60 }
0x1016   :  { %v3651_v19 = vadd.f32 %v3647_v40, %v3636_v48  ;;  %5263 = vmatpush.msk.msrb.mxu0 %vm3403_vm6, %v9875_v60  ;;  %v8995_v40 = vsel %vm3608_vm0, %v5676_v29, %v3755_v26 }
0x1017   :  { %vm3763_vm10 = vcmp.gt.f32.partialorder %v8995_v40, 0.5 }
0x1018   :  { %5264 = vmatpush.msk.msrb.mxu0 %vm3402_vm11, %v9875_v60  ;;  %v8965_v4 = vsel %vm3504_vm12, %v3636_v48, %v3651_v19  ;;  %v3753_v48 = vadd.f32 %v3749_v10, %v5681_v32 }
0x1019   :  { %5265 = vmatmul.msk.f32.vlgmr.msrb.gmra.mxu0 %vm189_vm5, %v8818_v61 }
0x101a   :  { %5283 = vmatpush.msk.msra.mxu0 %vm3507_vm13, %v9875_v60  ;;  %v9020_v35 = vsel %vm3606_vm2, %v5681_v32, %v3753_v48  ;;  %v648_v48 = vadd.f32 %v6318_v20, %v492_v62 }
0x101b   :  { %v3638_v47 = vpop.f32.mrf.mxu3  ;;  %vm3761_vm15 = vcmp.gt.f32.partialorder %v9020_v35, 0.5 }
0x101c   :  { %5284 = vmatpush.msk.msra.mxu0 %vm3506_vm7, %v9875_v60  ;;  %v3639_v17 = vadd.f32 %v3638_v47, %v5746_v52  ;;  %v802_v47 = vadd.f32 %v6460_v21, %v647_v44  ;;  %v9900_v21 = vld [vmem:[#allocation7_spill] sm:$0xff] }
0x101d   :  { %v9908_v44 = vld [vmem:[#allocation15_spill] sm:$0xff] }
0x101e   :  { %v3652_v63 = vadd.f32 %v3648_v6, %v3639_v17  ;;  %5285 = vmatpush.msk.msra.mxu0 %vm3505_vm8, %v9875_v60 }
0x1020   :  { %5286 = vmatpush.msk.msra.mxu0 %vm3504_vm12, %v9875_v60  ;;  %v9001_v43 = vsel %vm3505_vm8, %v3639_v17, %v3652_v63  ;;  %v957_v17 = vadd.f32 %v6624_v15, %v802_v47  ;;  %v9901_v15 = vld [vmem:[#allocation3_spill] sm:$0xff]  ;;  %v9909_v47 = vld [vmem:[#allocation8_spill] sm:$0xff] }
0x1021   :  { %5266 = vmatmul.msk.f32.gmra.mxu0 %vm189_vm5, %v8865_v3  ;;  %vm3660_vm12 = vcmp.gt.f32.partialorder %v9001_v43, 0.5 }
0x1022   :  { %5339 = vmatpush.msk.msrb.mxu0 %vm3764_vm9, %v9875_v60  ;;  %v1112_v6 = vadd.f32 %v6788_v59, %v957_v17  ;;  %v9902_v59 = vld [vmem:[#allocation9_spill] sm:$0xff] }
0x1023   :  { %v3641_v36 = vpop.f32.mrf.mxu3 }
0x1024   :  { %5340 = vmatpush.msk.msrb.mxu0 %vm3763_vm10, %v9875_v60  ;;  %v3642_v37 = vadd.f32 %v3641_v36, %v5736_v46  ;;  %v1267_v63 = vadd.f32 %v6932_v55, %v1112_v6  ;;  %v9910_v6 = vld [vmem:[#allocation17_spill] sm:$0xff] }
0x1026   :  { %5341 = vmatpush.msk.msrb.mxu0 %vm3762_vm14, %v9875_v60  ;;  %v3653_v19 = vadd.f32 %v3649_v7, %v3642_v37  ;;  %v1422_v36 = vadd.f32 %v7086_v11, %v1267_v63  ;;  %v9911_v63 = vld [vmem:[#allocation10_spill] sm:$0xff] }
0x1028   :  { %5342 = vmatpush.msk.msrb.mxu0 %vm3761_vm15, %v9875_v60  ;;  %v9034_v31 = vsel %vm3506_vm7, %v3642_v37, %v3653_v19  ;;  %v803_v37 = vadd.f32 %v6462_v53, %v648_v48  ;;  %v1577_v45 = vadd.f32 %v7230_v33, %v1422_v36  ;;  %v9912_v36 = vld [vmem:[#allocation19_spill] sm:$0xff] }
0x1029   :  { %5287 = vmatmul.msk.f32.vlgmr.msra.gmra.mxu0 %vm189_vm5, %v8577_v12 }
0x102a   :  { %v958_v58 = vadd.f32 %v9899_v38, %v803_v37  ;;  %v1732_v7 = vadd.f32 %v9900_v21, %v1577_v45  ;;  %v9913_v45 = vld [vmem:[#allocation12_spill] sm:$0xff] }
0x102b   :  { %v3644_v41 = vpop.f32.mrf.mxu3 }
0x102c   :  { %v3645_v39 = vadd.f32 %v3644_v41, %v5732_v42  ;;  %v1113_v19 = vadd.f32 %v9901_v15, %v958_v58  ;;  %v1887_v41 = vadd.f32 %v9902_v59, %v1732_v7  ;;  %v9914_v58 = vld [vmem:[#allocation21_spill] sm:$0xff]  ;;  %v9915_v7 = vld [vmem:[#allocation14_spill] sm:$0xff] }
0x102e   :  { %v3654_v26 = vadd.f32 %v3650_v0, %v3645_v39  ;;  %v2042_v55 = vadd.f32 %v9904_v9, %v1887_v41  ;;  %v9905_v0 = vld [vmem:[#allocation5_spill] sm:$0xff]  ;;  %v9917_v41 = vld [vmem:[#allocation16_spill] sm:$0xff] }
0x1030   :  { %v9042_v10 = vsel %vm3507_vm13, %v3645_v39, %v3654_v26  ;;  %v9903_v39 = vld [vmem:[#allocation4_spill] sm:$0xff]  ;;  %v9906_v26 = vld [vmem:[#allocation13_spill] sm:$0xff] }
0x1031   :  { %5288 = vmatmul.msk.f32.gmra.mxu0 %vm189_vm5, %v8590_v14  ;;  %v1268_v54 = vadd.f32 %v9903_v39, %v1113_v19  ;;  %v2197_v11 = vadd.f32 %v9906_v26, %v2042_v55  ;;  %v9916_v19 = vld [vmem:[#allocation23_spill] sm:$0xff]  ;;  %v9919_v55 = vld [vmem:[#allocation18_spill] sm:$0xff] }
0x1033   :  { %v1423_v20 = vadd.f32 %v9905_v0, %v1268_v54  ;;  %v2352_v33 = vadd.f32 %v9908_v44, %v2197_v11  ;;  %v9918_v54 = vld [vmem:[#allocation25_spill] sm:$0xff]  ;;  %v9921_v11 = vld [vmem:[#allocation20_spill] sm:$0xff] }
0x1035   :  { %v1578_v53 = vadd.f32 %v9907_v49, %v1423_v20  ;;  %v2507_v62 = vadd.f32 %v9910_v6, %v2352_v33  ;;  %v9920_v20 = vld [vmem:[#allocation27_spill] sm:$0xff]  ;;  %v9922_v33 = vld [vmem:[#allocation22_spill] sm:$0xff] }
0x1037   :  { %v1733_v17 = vadd.f32 %v9909_v47, %v1578_v53  ;;  %v2662_v37 = vadd.f32 %v9912_v36, %v2507_v62  ;;  %v9924_v62 = vld [vmem:[#allocation26_spill] sm:$0xff] }
0x1039   :  { %5289 = vmatmul.msk.f32.gmra.mxu0 %vm189_vm5, %v8597_v2  ;;  %v1888_v48 = vadd.f32 %v9911_v63, %v1733_v17  ;;  %v2817_v21 = vadd.f32 %v9914_v58, %v2662_v37  ;;  %v9923_v17 = vld [vmem:[#allocation24_spill] sm:$0xff] }
0x103b   :  { %v2043_v38 = vadd.f32 %v9913_v45, %v1888_v48  ;;  %v2972_v59 = vadd.f32 %v9916_v19, %v2817_v21  ;;  %v9925_v48 = vld [vmem:[#allocation28_spill] sm:$0xff]  ;;  %v3547_v19 = vmul.f32 0.2, %v8932_v51 }
0x103d   :  { %v2198_v15 = vadd.f32 %v9915_v7, %v2043_v38  ;;  %v3127_v9 = vadd.f32 %v9918_v54, %v2972_v59  ;;  %v3546_v59 = vmul.f32 0.2, %v8940_v8 }
0x103f   :  { %v2353_v39 = vadd.f32 %v9917_v41, %v2198_v15  ;;  %v3282_v26 = vadd.f32 %v9920_v20, %v3127_v9 }
0x1041   :  { %5290 = vmatmul.msk.f32.gmra.mxu0 %vm189_vm5, %v8604_v50  ;;  %v2508_v0 = vadd.f32 %v9919_v55, %v2353_v39  ;;  %v3548_v55 = vmul.f32 0.2, %v8928_v23 }
0x1043   :  { %v2663_v49 = vadd.f32 %v9921_v11, %v2508_v0  ;;  %v3545_v0 = vmul.f32 0.2, %v8950_v30 }
0x1045   :  { %v2818_v47 = vadd.f32 %v9922_v33, %v2663_v49 }
0x1047   :  { %v2973_v6 = vadd.f32 %v9923_v17, %v2818_v47  ;;  %v3802_v17 = vmul.f32 0.2, %v8965_v4 }
0x1049   :  { %5343 = vmatmul.msk.f32.vlgmr.msrb.gmra.mxu0 %vm189_vm5, %v8427_v5  ;;  %v3128_v63 = vadd.f32 %v9924_v62, %v2973_v6  ;;  %v3907_v6 = vmul.f32 0.2, %v8988_v27  ;;  %v3906_v62 = vmul.f32 0.2, %v8995_v40 }
0x104b   :  { %v3283_v36 = vadd.f32 %v9925_v48, %v3128_v63  ;;  %v3911_v63 = vadd.f32 %v3907_v6, %v5668_v22  ;;  %v3905_v48 = vmul.f32 0.2, %v9009_v57  ;;  %v3804_v57 = vmul.f32 0.2, %v9034_v31 }
0x1051   :  { %5344 = vmatmul.msk.f32.gmra.mxu0 %vm189_vm5, %v8434_v18 }
0x1059   :  { %5345 = vmatmul.msk.f32.gmra.mxu0 %vm189_vm5, %v8441_v1 }
0x1061   :  { %5346 = vmatmul.msk.f32.gmra.mxu0 %vm189_vm5, %v8448_v13 }
0x1096   :  { %v3431_v53 = vpop.f32.mrf.mxu0 }
0x1097   :  { %v9094_v44 = vadd.f32 %v3431_v53, %v3282_v26 }
0x109e   :  { %v3434_v37 = vpop.f32.mrf.mxu0 }
0x109f   :  { %v9100_v45 = vadd.f32 %v3434_v37, %v3283_v36  ;;  %v3910_v36 = vadd.f32 %v3906_v62, %v5676_v29  ;;  %v3904_v37 = vmul.f32 0.2, %v9020_v35 }
0x10a6   :  { %v3533_v38 = vpop.f32.mrf.mxu0 }
0x10a7   :  { %v3534_v39 = vadd.f32 %v3533_v38, %v5899_v34 }
0x10a9   :  { %v3549_v11 = vadd.f32 %v3545_v0, %v3534_v39  ;;  %v3805_v0 = vmul.f32 0.2, %v9042_v10 }
0x10ab   :  { %v9134_v51 = vsel %vm3402_vm11, %v3534_v39, %v3549_v11  ;;  %vm3661_vm11 = vcmp.gt.f32.partialorder %v9034_v31, 0.5 }
0x10ae   :  { %v3536_v58 = vpop.f32.mrf.mxu0 }
0x10af   :  { %v3537_v15 = vadd.f32 %v3536_v58, %v5891_v25 }
0x10b1   :  { %v3550_v20 = vadd.f32 %v3546_v59, %v3537_v15  ;;  %v3908_v59 = vadd.f32 %v3904_v37, %v5681_v32 }
0x10b3   :  { %v9124_v33 = vsel %vm3403_vm6, %v3537_v15, %v3550_v20  ;;  %vm3662_vm6 = vcmp.gt.f32.partialorder %v9042_v10, 0.5  ;;  %v9172_v15 = vsel %vm3764_vm9, %v5668_v22, %v3911_v63  ;;  %v9204_v40 = vsel %vm3761_vm15, %v5681_v32, %v3908_v59 }
0x10b4   :  { %vm3558_vm2 = vcmp.gt.f32.partialorder %v9124_v33, 0.5  ;;  %vm3919_vm13 = vcmp.gt.f32.partialorder %v9172_v15, 0.5  ;;  %vm3916_vm9 = vcmp.gt.f32.partialorder %v9204_v40, 0.5 }
0x10b6   :  { %v3539_v21 = vpop.f32.mrf.mxu0 }
0x10b7   :  { %v3540_v7 = vadd.f32 %v3539_v21, %v5889_v24  ;;  %v3803_v21 = vmul.f32 0.2, %v9001_v43 }
0x10b9   :  { %v3551_v54 = vadd.f32 %v3547_v19, %v3540_v7 }
0x10bb   :  { %v9116_v53 = vsel %vm3404_vm4, %v3540_v7, %v3551_v54  ;;  %vm3659_vm4 = vcmp.gt.f32.partialorder %v8965_v4, 0.5  ;;  %v3909_v7 = vadd.f32 %v3905_v48, %v5674_v28  ;;  %v3700_v48 = vmul.f32 0.2, %v9134_v51 }
0x10bc   :  { %vm3559_vm1 = vcmp.gt.f32.partialorder %v9116_v53, 0.5 }
0x10bd   :  { %v9193_v27 = vsel %vm3762_vm14, %v5674_v28, %v3909_v7 }
0x10be   :  { %v3542_v41 = vpop.f32.mrf.mxu0  ;;  %vm3917_vm8 = vcmp.gt.f32.partialorder %v9193_v27, 0.5 }
0x10bf   :  { %v3543_v9 = vadd.f32 %v3542_v41, %v5880_v16  ;;  %v9179_v41 = vsel %vm3763_vm10, %v5676_v29, %v3910_v36 }
0x10c0   :  { %vm3918_vm7 = vcmp.gt.f32.partialorder %v9179_v41, 0.5 }
0x10c1   :  { %v3552_v26 = vadd.f32 %v3548_v55, %v3543_v9 }
0x10c3   :  { %v9112_v49 = vsel %vm3405_vm3, %v3543_v9, %v3552_v26  ;;  %vm3557_vm3 = vcmp.gt.f32.partialorder %v9134_v51, 0.5 }
0x10c4   :  { %vm3560_vm0 = vcmp.gt.f32.partialorder %v9112_v49, 0.5 }
0x10c5   :  { %5295 = vmatpush.msk.msrb.mxu1 %vm3560_vm0, %v9875_v60 }
0x10c6   :  { %v3790_v47 = vpop.f32.mrf.mxu0 }
0x10c7   :  { %v3791_v23 = vadd.f32 %v3790_v47, %v5754_v56  ;;  %5296 = vmatpush.msk.msrb.mxu1 %vm3559_vm1, %v9875_v60 }
0x10c9   :  { %v3806_v8 = vadd.f32 %v3802_v17, %v3791_v23  ;;  %5297 = vmatpush.msk.msrb.mxu1 %vm3558_vm2, %v9875_v60 }
0x10cb   :  { %5298 = vmatpush.msk.msrb.mxu1 %vm3557_vm3, %v9875_v60  ;;  %v9149_v30 = vsel %vm3659_vm4, %v3791_v23, %v3806_v8  ;;  %v3701_v8 = vmul.f32 0.2, %v9124_v33 }
0x10cc   :  { %5299 = vmatmul.msk.f32.vlgmr.msrb.gmra.mxu1 %vm189_vm5, %v8818_v61  ;;  %v3957_v59 = vmul.f32 0.2, %v9149_v30 }
0x10cd   :  { %5317 = vmatpush.msk.msra.mxu1 %vm3662_vm6, %v9875_v60 }
0x10ce   :  { %v3793_v38 = vpop.f32.mrf.mxu0 }
0x10cf   :  { %5318 = vmatpush.msk.msra.mxu1 %vm3661_vm11, %v9875_v60  ;;  %v3794_v58 = vadd.f32 %v3793_v38, %v5746_v52 }
0x10d1   :  { %v3807_v19 = vadd.f32 %v3803_v21, %v3794_v58  ;;  %5319 = vmatpush.msk.msra.mxu1 %vm3660_vm12, %v9875_v60 }
0x10d3   :  { %5320 = vmatpush.msk.msra.mxu1 %vm3659_vm4, %v9875_v60  ;;  %v9185_v43 = vsel %vm3660_vm12, %v3794_v58, %v3807_v19 }
0x10d4   :  { %5300 = vmatmul.msk.f32.gmra.mxu1 %vm189_vm5, %v8865_v3  ;;  %vm3815_vm4 = vcmp.gt.f32.partialorder %v9185_v43, 0.5 }
0x10d5   :  { %5373 = vmatpush.msk.msrb.mxu1 %vm3919_vm13, %v9875_v60 }
0x10d6   :  { %v3796_v4 = vpop.f32.mrf.mxu0 }
0x10d7   :  { %5374 = vmatpush.msk.msrb.mxu1 %vm3918_vm7, %v9875_v60  ;;  %v3797_v39 = vadd.f32 %v3796_v4, %v5736_v46  ;;  %v4062_v4 = vmul.f32 0.2, %v9172_v15 }
0x10d9   :  { %5375 = vmatpush.msk.msrb.mxu1 %vm3917_vm8, %v9875_v60  ;;  %v3808_v54 = vadd.f32 %v3804_v57, %v3797_v39  ;;  %v4066_v57 = vadd.f32 %v4062_v4, %v5668_v22 }
0x10db   :  { %5376 = vmatpush.msk.msrb.mxu1 %vm3916_vm9, %v9875_v60  ;;  %v9218_v35 = vsel %vm3661_vm11, %v3797_v39, %v3808_v54  ;;  %v4061_v39 = vmul.f32 0.2, %v9179_v41  ;;  %v4060_v54 = vmul.f32 0.2, %v9193_v27 }
0x10dc   :  { %5321 = vmatmul.msk.f32.vlgmr.msra.gmra.mxu1 %vm189_vm5, %v8577_v12  ;;  %v3959_v27 = vmul.f32 0.2, %v9218_v35 }
0x10de   :  { %v3799_v9 = vpop.f32.mrf.mxu0 }
0x10df   :  { %v3800_v55 = vadd.f32 %v3799_v9, %v5732_v42  ;;  %v4065_v9 = vadd.f32 %v4061_v39, %v5676_v29 }
0x10e1   :  { %v3809_v20 = vadd.f32 %v3805_v0, %v3800_v55 }
0x10e3   :  { %v9226_v26 = vsel %vm3662_vm6, %v3800_v55, %v3809_v20  ;;  %v4059_v55 = vmul.f32 0.2, %v9204_v40 }
0x10e4   :  { %5322 = vmatmul.msk.f32.gmra.mxu1 %vm189_vm5, %v8590_v14 }
0x10ec   :  { %5323 = vmatmul.msk.f32.gmra.mxu1 %vm189_vm5, %v8597_v2 }
0x10f4   :  { %5324 = vmatmul.msk.f32.gmra.mxu1 %vm189_vm5, %v8604_v50 }
0x10fc   :  { %5377 = vmatmul.msk.f32.vlgmr.msrb.gmra.mxu1 %vm189_vm5, %v8427_v5 }
0x1104   :  { %5378 = vmatmul.msk.f32.gmra.mxu1 %vm189_vm5, %v8434_v18 }
0x110c   :  { %5379 = vmatmul.msk.f32.gmra.mxu1 %vm189_vm5, %v8441_v1  ;;  %v3702_v1 = vmul.f32 0.2, %v9116_v53 }
0x1114   :  { %5380 = vmatmul.msk.f32.gmra.mxu1 %vm189_vm5, %v8448_v13 }
0x1149   :  { %v3586_v31 = vpop.f32.mrf.mxu1 }
0x114a   :  { %v9243_v10 = vadd.f32 %v3586_v31, %v9094_v44  ;;  %v3958_v31 = vmul.f32 0.2, %v9185_v43 }
0x1151   :  { %v3589_v11 = vpop.f32.mrf.mxu1 }
0x1152   :  { %v9246_v47 = vadd.f32 %v3589_v11, %v9100_v45  ;;  %v3703_v45 = vmul.f32 0.2, %v9112_v49  ;;  %v4064_v11 = vadd.f32 %v4060_v54, %v5674_v28 }
0x1154   :  { %v9339_v15 = vsel %vm3917_vm8, %v5674_v28, %v4064_v11 }
0x1155   :  { %vm4072_vm12 = vcmp.gt.f32.partialorder %v9339_v15, 0.5 }
0x1159   :  { %v3688_v23 = vpop.f32.mrf.mxu1 }
0x115a   :  { %v3689_v62 = vadd.f32 %v3688_v23, %v5899_v34  ;;  %v9318_v23 = vsel %vm3919_vm13, %v5668_v22, %v4066_v57 }
0x115b   :  { %vm4074_vm6 = vcmp.gt.f32.partialorder %v9318_v23, 0.5 }
0x115c   :  { %v3704_v38 = vadd.f32 %v3700_v48, %v3689_v62 }
0x115e   :  { %v9280_v53 = vsel %vm3557_vm3, %v3689_v62, %v3704_v38  ;;  %vm3816_vm3 = vcmp.gt.f32.partialorder %v9218_v35, 0.5  ;;  %v3960_v62 = vmul.f32 0.2, %v9226_v26  ;;  %v9390_v35 = vld [vmem:[%s9865_s3 + $0x8] sm:$0xff] }
0x115f   :  { %v3855_v54 = vmul.f32 0.2, %v9280_v53 }
0x1161   :  { %v3691_v17 = vpop.f32.mrf.mxu1 }
0x1162   :  { %v3692_v18 = vadd.f32 %v3691_v17, %v5891_v25 }
0x1164   :  { %v3705_v36 = vadd.f32 %v3701_v8, %v3692_v18 }
0x1166   :  { %v9270_v7 = vsel %vm3558_vm2, %v3692_v18, %v3705_v36  ;;  %vm3817_vm2 = vcmp.gt.f32.partialorder %v9226_v26, 0.5 }
0x1167   :  { %vm3713_vm15 = vcmp.gt.f32.partialorder %v9270_v7, 0.5  ;;  %v3856_v4 = vmul.f32 0.2, %v9270_v7 }
0x1169   :  { %v3694_v5 = vpop.f32.mrf.mxu1 }
0x116a   :  { %v3695_v6 = vadd.f32 %v3694_v5, %v5889_v24  ;;  %v4063_v5 = vadd.f32 %v4059_v55, %v5681_v32 }
0x116c   :  { %v3706_v44 = vadd.f32 %v3702_v1, %v3695_v6  ;;  %v9350_v41 = vsel %vm3916_vm9, %v5681_v32, %v4063_v5 }
0x116d   :  { %vm4071_vm13 = vcmp.gt.f32.partialorder %v9350_v41, 0.5 }
0x116e   :  { %v9262_v21 = vsel %vm3559_vm1, %v3695_v6, %v3706_v44  ;;  %vm3814_vm1 = vcmp.gt.f32.partialorder %v9149_v30, 0.5  ;;  %v9325_v6 = vsel %vm3918_vm7, %v5676_v29, %v4065_v9 }
0x116f   :  { %vm3714_vm14 = vcmp.gt.f32.partialorder %v9262_v21, 0.5  ;;  %vm4073_vm11 = vcmp.gt.f32.partialorder %v9325_v6, 0.5 }
0x1171   :  { %v3697_v13 = vpop.f32.mrf.mxu1 }
0x1172   :  { %v3698_v63 = vadd.f32 %v3697_v13, %v5880_v16 }
0x1174   :  { %v3707_v37 = vadd.f32 %v3703_v45, %v3698_v63 }
0x1176   :  { %v9258_v58 = vsel %vm3560_vm0, %v3698_v63, %v3707_v37  ;;  %vm3712_vm0 = vcmp.gt.f32.partialorder %v9280_v53, 0.5 }
0x1177   :  { %vm3715_vm10 = vcmp.gt.f32.partialorder %v9258_v58, 0.5 }
0x1178   :  { %5329 = vmatpush.msk.msrb.mxu2 %vm3715_vm10, %v9875_v60 }
0x1179   :  { %v3945_v19 = vpop.f32.mrf.mxu1 }
0x117a   :  { %v3946_v49 = vadd.f32 %v3945_v19, %v5754_v56  ;;  %5330 = vmatpush.msk.msrb.mxu2 %vm3714_vm14, %v9875_v60 }
0x117c   :  { %v3961_v33 = vadd.f32 %v3957_v59, %v3946_v49  ;;  %5331 = vmatpush.msk.msrb.mxu2 %vm3713_vm15, %v9875_v60  ;;  %v3857_v59 = vmul.f32 0.2, %v9262_v21 }
0x117e   :  { %5332 = vmatpush.msk.msrb.mxu2 %vm3712_vm0, %v9875_v60  ;;  %v9295_v51 = vsel %vm3814_vm1, %v3946_v49, %v3961_v33 }
0x117f   :  { %5333 = vmatmul.msk.f32.vlgmr.msrb.gmra.mxu2 %vm189_vm5, %v8818_v61  ;;  %v4112_v5 = vmul.f32 0.2, %v9295_v51 }
0x1180   :  { %5351 = vmatpush.msk.msra.mxu2 %vm3817_vm2, %v9875_v60 }
0x1181   :  { %v3948_v0 = vpop.f32.mrf.mxu1 }
0x1182   :  { %5352 = vmatpush.msk.msra.mxu2 %vm3816_vm3, %v9875_v60  ;;  %v3949_v20 = vadd.f32 %v3948_v0, %v5746_v52 }
0x1184   :  { %v3962_v17 = vadd.f32 %v3958_v31, %v3949_v20  ;;  %5353 = vmatpush.msk.msra.mxu2 %vm3815_vm4, %v9875_v60 }
0x1186   :  { %5354 = vmatpush.msk.msra.mxu2 %vm3814_vm1, %v9875_v60  ;;  %v9331_v43 = vsel %vm3815_vm4, %v3949_v20, %v3962_v17 }
0x1187   :  { %5334 = vmatmul.msk.f32.gmra.mxu2 %vm189_vm5, %v8865_v3  ;;  %vm3970_vm1 = vcmp.gt.f32.partialorder %v9331_v43, 0.5 }
0x1188   :  { %5407 = vmatpush.msk.msrb.mxu2 %vm4074_vm6, %v9875_v60 }
0x1189   :  { %v3951_v30 = vpop.f32.mrf.mxu1 }
0x118a   :  { %5408 = vmatpush.msk.msrb.mxu2 %vm4073_vm11, %v9875_v60  ;;  %v3952_v18 = vadd.f32 %v3951_v30, %v5736_v46  ;;  %v4217_v30 = vmul.f32 0.2, %v9318_v23 }
0x118c   :  { %5409 = vmatpush.msk.msrb.mxu2 %vm4072_vm12, %v9875_v60  ;;  %v3963_v1 = vadd.f32 %v3959_v27, %v3952_v18  ;;  %v4221_v27 = vadd.f32 %v4217_v30, %v5668_v22 }
0x118e   :  { %5410 = vmatpush.msk.msrb.mxu2 %vm4071_vm13, %v9875_v60  ;;  %v9364_v40 = vsel %vm3816_vm3, %v3952_v18, %v3963_v1  ;;  %v4216_v18 = vmul.f32 0.2, %v9325_v6  ;;  %v4215_v1 = vmul.f32 0.2, %v9339_v15 }
0x118f   :  { %5355 = vmatmul.msk.f32.vlgmr.msra.gmra.mxu2 %vm189_vm5, %v8577_v12  ;;  %v9383_v12 = vld [vmem:[%s9865_s3] sm:$0xff]  ;;  %v4114_v15 = vmul.f32 0.2, %v9364_v40 }
0x1191   :  { %v3954_v8 = vpop.f32.mrf.mxu1 }
0x1192   :  { %v3955_v13 = vadd.f32 %v3954_v8, %v5732_v42  ;;  %v4220_v8 = vadd.f32 %v4216_v18, %v5676_v29 }
0x1194   :  { %v3964_v44 = vadd.f32 %v3960_v62, %v3955_v13 }
0x1196   :  { %v9372_v63 = vsel %vm3817_vm2, %v3955_v13, %v3964_v44  ;;  %v4214_v13 = vmul.f32 0.2, %v9350_v41 }
0x1197   :  { %5356 = vmatmul.msk.f32.gmra.mxu2 %vm189_vm5, %v8590_v14  ;;  %v9397_v14 = vld [vmem:[%s9865_s3 + $0x10] sm:$0xff] }
0x119f   :  { %5357 = vmatmul.msk.f32.gmra.mxu2 %vm189_vm5, %v8597_v2  ;;  %v9404_v2 = vld [vmem:[%s9865_s3 + $0x18] sm:$0xff] }
0x11a7   :  { %5358 = vmatmul.msk.f32.gmra.mxu2 %vm189_vm5, %v8604_v50 }
0x11af   :  { %5411 = vmatmul.msk.f32.vlgmr.msrb.gmra.mxu2 %vm189_vm5, %v9383_v12 }
0x11b7   :  { %5412 = vmatmul.msk.f32.gmra.mxu2 %vm189_vm5, %v9390_v35 }
0x11bf   :  { %5413 = vmatmul.msk.f32.gmra.mxu2 %vm189_vm5, %v9397_v14 }
0x11c7   :  { %5414 = vmatmul.msk.f32.gmra.mxu2 %vm189_vm5, %v9404_v2 }
0x1202   :  { %v3741_v50 = vpop.f32.mrf.mxu2 }
0x1203   :  { %v9409_v26 = vadd.f32 %v3741_v50, %v9243_v10  ;;  %v4113_v50 = vmul.f32 0.2, %v9331_v43 }
0x120a   :  { %v3744_v45 = vpop.f32.mrf.mxu2 }
0x120b   :  { %v9412_v48 = vadd.f32 %v3744_v45, %v9246_v47  ;;  %v3858_v47 = vmul.f32 0.2, %v9258_v58  ;;  %v4219_v45 = vadd.f32 %v4215_v1, %v5674_v28 }
0x120d   :  { %v9505_v23 = vsel %vm4072_vm12, %v5674_v28, %v4219_v45 }
0x120e   :  { %vm4227_vm4 = vcmp.gt.f32.partialorder %v9505_v23, 0.5 }
0x1212   :  { %v3843_v36 = vpop.f32.mrf.mxu2 }
0x1213   :  { %v3844_v39 = vadd.f32 %v3843_v36, %v5899_v34  ;;  %v9484_v36 = vsel %vm4074_vm6, %v5668_v22, %v4221_v27 }
0x1214   :  { %vm4229_vm2 = vcmp.gt.f32.partialorder %v9484_v36, 0.5 }
0x1215   :  { %v3859_v0 = vadd.f32 %v3855_v54, %v3844_v39  ;;  %v9555_v54 = vld [vmem:[%s9866_s5 + $0x10] sm:$0xff] }
0x1217   :  { %v9446_v21 = vsel %vm3712_vm0, %v3844_v39, %v3859_v0  ;;  %vm3971_vm0 = vcmp.gt.f32.partialorder %v9364_v40, 0.5  ;;  %v9548_v40 = vld [vmem:[%s9866_s5 + $0x8] sm:$0xff] }
0x121a   :  { %v3846_v37 = vpop.f32.mrf.mxu2 }
0x121b   :  { %v3847_v49 = vadd.f32 %v3846_v37, %v5891_v25 }
0x121d   :  { %v3860_v9 = vadd.f32 %v3856_v4, %v3847_v49  ;;  %v9535_v4 = vld [vmem:[%s9866_s5] sm:$0xff] }
0x121f   :  { %v9436_v11 = vsel %vm3713_vm15, %v3847_v49, %v3860_v9  ;;  %vm3972_vm15 = vcmp.gt.f32.partialorder %v9372_v63, 0.5 }
0x1220   :  { %vm3868_vm9 = vcmp.gt.f32.partialorder %v9436_v11, 0.5  ;;  %v4011_v1 = vmul.f32 0.2, %v9436_v11 }
0x1222   :  { %v3849_v38 = vpop.f32.mrf.mxu2 }
0x1223   :  { %v3850_v19 = vadd.f32 %v3849_v38, %v5889_v24  ;;  %v4218_v38 = vadd.f32 %v4214_v13, %v5681_v32 }
0x1225   :  { %v3861_v10 = vadd.f32 %v3857_v59, %v3850_v19  ;;  %v9516_v6 = vsel %vm4071_vm13, %v5681_v32, %v4218_v38 }
0x1226   :  { %vm4226_vm6 = vcmp.gt.f32.partialorder %v9516_v6, 0.5 }
0x1227   :  { %v9428_v31 = vsel %vm3714_vm14, %v3850_v19, %v3861_v10  ;;  %vm3969_vm14 = vcmp.gt.f32.partialorder %v9295_v51, 0.5  ;;  %v9491_v19 = vsel %vm4073_vm11, %v5676_v29, %v4220_v8  ;;  %v4115_v10 = vmul.f32 0.2, %v9372_v63  ;;  %v9562_v63 = vld [vmem:[%s9866_s5 + $0x18] sm:$0xff] }
0x1228   :  { %vm3869_vm8 = vcmp.gt.f32.partialorder %v9428_v31, 0.5  ;;  %vm4228_vm3 = vcmp.gt.f32.partialorder %v9491_v19, 0.5  ;;  %v4012_v27 = vmul.f32 0.2, %v9428_v31 }
0x122a   :  { %v3852_v33 = vpop.f32.mrf.mxu2 }
0x122b   :  { %v3853_v57 = vadd.f32 %v3852_v33, %v5880_v16 }
0x122d   :  { %v3862_v55 = vadd.f32 %v3858_v47, %v3853_v57 }
0x122f   :  { %v9424_v20 = vsel %vm3715_vm10, %v3853_v57, %v3862_v55  ;;  %vm3867_vm10 = vcmp.gt.f32.partialorder %v9446_v21, 0.5 }
0x1230   :  { %vm3870_vm7 = vcmp.gt.f32.partialorder %v9424_v20, 0.5 }
0x1231   :  { %5363 = vmatpush.msk.msra.mxu3 %vm3870_vm7, %v9875_v60 }
0x1232   :  { %v4100_v17 = vpop.f32.mrf.mxu2 }
0x1233   :  { %v4101_v58 = vadd.f32 %v4100_v17, %v5754_v56  ;;  %5364 = vmatpush.msk.msra.mxu3 %vm3869_vm8, %v9875_v60 }
0x1235   :  { %v4116_v7 = vadd.f32 %v4112_v5, %v4101_v58  ;;  %5365 = vmatpush.msk.msra.mxu3 %vm3868_vm9, %v9875_v60 }
0x1237   :  { %5366 = vmatpush.msk.msra.mxu3 %vm3867_vm10, %v9875_v60  ;;  %v9461_v53 = vsel %vm3969_vm14, %v4101_v58, %v4116_v7 }
0x1238   :  { %5367 = vmatmul.msk.f32.vlgmr.msra.gmra.mxu3 %vm189_vm5, %v8818_v61 }
0x1239   :  { %5385 = vmatpush.msk.msrb.mxu3 %vm3972_vm15, %v9875_v60 }
0x123a   :  { %v4103_v62 = vpop.f32.mrf.mxu2 }
0x123b   :  { %5386 = vmatpush.msk.msrb.mxu3 %vm3971_vm0, %v9875_v60  ;;  %v4104_v44 = vadd.f32 %v4103_v62, %v5746_v52 }
0x123d   :  { %v4117_v37 = vadd.f32 %v4113_v50, %v4104_v44  ;;  %5387 = vmatpush.msk.msrb.mxu3 %vm3970_vm1, %v9875_v60 }
0x123f   :  { %5388 = vmatpush.msk.msrb.mxu3 %vm3969_vm14, %v9875_v60  ;;  %v9497_v43 = vsel %vm3970_vm1, %v4104_v44, %v4117_v37  ;;  %v4010_v44 = vmul.f32 0.2, %v9446_v21 }
0x1240   :  { %5368 = vmatmul.msk.f32.gmra.mxu3 %vm189_vm5, %v8865_v3  ;;  %vm4125_vm14 = vcmp.gt.f32.partialorder %v9497_v43, 0.5 }
0x1241   :  { %5441 = vmatpush.msk.msra.mxu3 %vm4229_vm2, %v9875_v60 }
0x1242   :  { %v4106_v51 = vpop.f32.mrf.mxu2 }
0x1243   :  { %5442 = vmatpush.msk.msra.mxu3 %vm4228_vm3, %v9875_v60  ;;  %v4107_v49 = vadd.f32 %v4106_v51, %v5736_v46 }
0x1245   :  { %5443 = vmatpush.msk.msra.mxu3 %vm4227_vm4, %v9875_v60  ;;  %v4118_v59 = vadd.f32 %v4114_v15, %v4107_v49 }
0x1247   :  { %5444 = vmatpush.msk.msra.mxu3 %vm4226_vm6, %v9875_v60  ;;  %v9530_v41 = vsel %vm3971_vm0, %v4107_v49, %v4118_v59  ;;  %v4267_v59 = vmul.f32 0.2, %v9461_v53 }
0x1248   :  { %5389 = vmatmul.msk.f32.vlgmr.msrb.gmra.mxu3 %vm189_vm5, %v9535_v4 }
0x124a   :  { %v4109_v33 = vpop.f32.mrf.mxu2 }
0x124b   :  { %v4110_v39 = vadd.f32 %v4109_v33, %v5732_v42  ;;  %v4372_v33 = vmul.f32 0.2, %v9484_v36 }
0x124d   :  { %v4119_v57 = vadd.f32 %v4115_v10, %v4110_v39  ;;  %v4376_v10 = vadd.f32 %v4372_v33, %v5668_v22 }
0x124f   :  { %v9543_v47 = vsel %vm3972_vm15, %v4110_v39, %v4119_v57  ;;  %v4371_v39 = vmul.f32 0.2, %v9491_v19  ;;  %v4370_v57 = vmul.f32 0.2, %v9505_v23  ;;  %v4269_v19 = vmul.f32 0.2, %v9530_v41 }
0x1250   :  { %5390 = vmatmul.msk.f32.gmra.mxu3 %vm189_vm5, %v9548_v40  ;;  %v4270_v23 = vmul.f32 0.2, %v9543_v47 }
0x1258   :  { %5391 = vmatmul.msk.f32.gmra.mxu3 %vm189_vm5, %v9555_v54 }
0x1260   :  { %5392 = vmatmul.msk.f32.gmra.mxu3 %vm189_vm5, %v9562_v63 }
0x1268   :  { %5445 = vmatmul.msk.f32.vlgmr.msra.gmra.mxu3 %vm189_vm5, %v9383_v12 }
0x1270   :  { %5446 = vmatmul.msk.f32.gmra.mxu3 %vm189_vm5, %v9390_v35 }
0x1278   :  { %5447 = vmatmul.msk.f32.gmra.mxu3 %vm189_vm5, %v9397_v14 }
0x1280   :  { %5448 = vmatmul.msk.f32.gmra.mxu3 %vm189_vm5, %v9404_v2 }
0x12bb   :  { %v3896_v9 = vpop.f32.mrf.mxu3 }
0x12bc   :  { %v9575_v55 = vadd.f32 %v3896_v9, %v9409_v26  ;;  %v4375_v9 = vadd.f32 %v4371_v39, %v5676_v29 }
0x12c3   :  { %v3899_v0 = vpop.f32.mrf.mxu3 }
0x12c4   :  { %v9578_v17 = vadd.f32 %v3899_v0, %v9412_v48  ;;  %v4013_v48 = vmul.f32 0.2, %v9424_v20  ;;  %v4369_v0 = vmul.f32 0.2, %v9516_v6 }
0x12cb   :  { %v3998_v58 = vpop.f32.mrf.mxu3 }
0x12cc   :  { %v3999_v13 = vadd.f32 %v3998_v58, %v5899_v34 }
0x12ce   :  { %v4014_v37 = vadd.f32 %v4010_v44, %v3999_v13 }
0x12d0   :  { %v9612_v31 = vsel %vm3867_vm10, %v3999_v13, %v4014_v37  ;;  %vm4126_vm10 = vcmp.gt.f32.partialorder %v9530_v41, 0.5 }
0x12d3   :  { %v4001_v5 = vpop.f32.mrf.mxu3 }
0x12d4   :  { %v4002_v18 = vadd.f32 %v4001_v5, %v5891_v25 }
0x12d6   :  { %v4015_v50 = vadd.f32 %v4011_v1, %v4002_v18  ;;  %v4379_v1 = vsel %vm4228_vm3, %v5676_v29, %v4375_v9 }
0x12d7   :  { %vm4383_vm0 = vcmp.gt.f32.partialorder %v4379_v1, 0.5 }
0x12d8   :  { %v9602_v49 = vsel %vm3868_vm9, %v4002_v18, %v4015_v50  ;;  %vm4127_vm9 = vcmp.gt.f32.partialorder %v9543_v47, 0.5 }
0x12d9   :  { %vm4023_vm13 = vcmp.gt.f32.partialorder %v9602_v49, 0.5 }
0x12db   :  { %v4004_v30 = vpop.f32.mrf.mxu3 }
0x12dc   :  { %v4005_v7 = vadd.f32 %v4004_v30, %v5889_v24  ;;  %v4374_v30 = vadd.f32 %v4370_v57, %v5674_v28 }
0x12de   :  { %v4016_v26 = vadd.f32 %v4012_v27, %v4005_v7  ;;  %v4373_v27 = vadd.f32 %v4369_v0, %v5681_v32 }
0x12e0   :  { %v9594_v51 = vsel %vm3869_vm8, %v4005_v7, %v4016_v26  ;;  %vm4124_vm8 = vcmp.gt.f32.partialorder %v9461_v53, 0.5  ;;  %v4380_v7 = vsel %vm4229_vm2, %v5668_v22, %v4376_v10  ;;  %v4378_v22 = vsel %vm4227_vm4, %v5674_v28, %v4374_v30 }
0x12e1   :  { %vm4024_vm12 = vcmp.gt.f32.partialorder %v9594_v51, 0.5  ;;  %vm4384_vm15 = vcmp.gt.f32.partialorder %v4380_v7, 0.5  ;;  %v4377_v53 = vsel %vm4226_vm6, %v5681_v32, %v4373_v27  ;;  %vm4382_vm1 = vcmp.gt.f32.partialorder %v4378_v22, 0.5  ;;  %v9774_v7 = vld [vmem:[%s9867_s7 + $0x8] sm:$0x3] }
0x12e2   :  { %vm4381_vm2 = vcmp.gt.f32.partialorder %v4377_v53, 0.5 }
0x12e3   :  { %v4007_v8 = vpop.f32.mrf.mxu3 }
0x12e4   :  { %v4008_v62 = vadd.f32 %v4007_v8, %v5880_v16 }
0x12e6   :  { %v4017_v45 = vadd.f32 %v4013_v48, %v4008_v62 }
0x12e8   :  { %v9590_v38 = vsel %vm3870_vm7, %v4008_v62, %v4017_v45  ;;  %vm4022_vm7 = vcmp.gt.f32.partialorder %v9612_v31, 0.5  ;;  %v4166_v45 = vmul.f32 0.2, %v9602_v49 }
0x12e9   :  { %vm4025_vm11 = vcmp.gt.f32.partialorder %v9590_v38, 0.5 }
0x12ea   :  { %5397 = vmatpush.msk.msra.mxu0 %vm4025_vm11, %v9875_v60 }
0x12eb   :  { %v4255_v15 = vpop.f32.mrf.mxu3 }
0x12ec   :  { %v4256_v20 = vadd.f32 %v4255_v15, %v5754_v56  ;;  %5398 = vmatpush.msk.msra.mxu0 %vm4024_vm12, %v9875_v60 }
0x12ee   :  { %v4271_v11 = vadd.f32 %v4267_v59, %v4256_v20  ;;  %5399 = vmatpush.msk.msra.mxu0 %vm4023_vm13, %v9875_v60 }
0x12f0   :  { %5400 = vmatpush.msk.msra.mxu0 %vm4022_vm7, %v9875_v60  ;;  %v9627_v21 = vsel %vm4124_vm8, %v4256_v20, %v4271_v11  ;;  %v4165_v20 = vmul.f32 0.2, %v9612_v31  ;;  %v9754_v31 = vld [vmem:[%s9867_s7] sm:$0xff] }
0x12f1   :  { %5401 = vmatmul.msk.f32.vlgmr.msra.gmra.mxu0 %vm189_vm5, %v8818_v61  ;;  %v4268_v61 = vmul.f32 0.2, %v9497_v43  ;;  %v4422_v0 = vmul.f32 0.2, %v9627_v21 }
0x12f2   :  { %5419 = vmatpush.msk.msrb.mxu0 %vm4127_vm9, %v9875_v60 }
0x12f3   :  { %v4258_v58 = vpop.f32.mrf.mxu3 }
0x12f4   :  { %5420 = vmatpush.msk.msrb.mxu0 %vm4126_vm10, %v9875_v60  ;;  %v4259_v5 = vadd.f32 %v4258_v58, %v5746_v52 }
0x12f6   :  { %v4272_v18 = vadd.f32 %v4268_v61, %v4259_v5  ;;  %5421 = vmatpush.msk.msrb.mxu0 %vm4125_vm14, %v9875_v60 }
0x12f8   :  { %5422 = vmatpush.msk.msrb.mxu0 %vm4124_vm8, %v9875_v60  ;;  %v9658_v8 = vsel %vm4125_vm14, %v4259_v5, %v4272_v18 }
0x12f9   :  { %5402 = vmatmul.msk.f32.gmra.mxu0 %vm189_vm5, %v8865_v3  ;;  %v4423_v5 = vmul.f32 0.2, %v9658_v8  ;;  %vm4280_vm8 = vcmp.gt.f32.partialorder %v9658_v8, 0.5 }
0x12fa   :  { %5475 = vmatpush.msk.msra.mxu0 %vm4384_vm15, %v9875_v60 }
0x12fb   :  { %v4261_v29 = vpop.f32.mrf.mxu3 }
0x12fc   :  { %5476 = vmatpush.msk.msra.mxu0 %vm4383_vm0, %v9875_v60  ;;  %v4262_v36 = vadd.f32 %v4261_v29, %v5736_v46 }
0x12fe   :  { %5477 = vmatpush.msk.msra.mxu0 %vm4382_vm1, %v9875_v60  ;;  %v4273_v43 = vadd.f32 %v4269_v19, %v4262_v36 }
0x1300   :  { %5478 = vmatpush.msk.msra.mxu0 %vm4381_vm2, %v9875_v60  ;;  %v9676_v28 = vsel %vm4126_vm10, %v4262_v36, %v4273_v43 }
0x1301   :  { %5423 = vmatmul.msk.f32.vlgmr.msrb.gmra.mxu0 %vm189_vm5, %v9535_v4  ;;  %v4424_v27 = vmul.f32 0.2, %v9676_v28 }
0x1303   :  { %v4264_v3 = vpop.f32.mrf.mxu3 }
0x1304   :  { %v4265_v32 = vadd.f32 %v4264_v3, %v5732_v42 }
0x1306   :  { %v4274_v6 = vadd.f32 %v4270_v23, %v4265_v32 }
0x1308   :  { %v9684_v13 = vsel %vm4127_vm9, %v4265_v32, %v4274_v6 }
0x1309   :  { %5424 = vmatmul.msk.f32.gmra.mxu0 %vm189_vm5, %v9548_v40  ;;  %v4425_v53 = vmul.f32 0.2, %v9684_v13 }
0x1311   :  { %5425 = vmatmul.msk.f32.gmra.mxu0 %vm189_vm5, %v9555_v54 }
0x1319   :  { %5426 = vmatmul.msk.f32.gmra.mxu0 %vm189_vm5, %v9562_v63 }
0x1321   :  { %5479 = vmatmul.msk.f32.vlgmr.msra.gmra.mxu0 %vm189_vm5, %v9383_v12 }
0x1329   :  { %5480 = vmatmul.msk.f32.gmra.mxu0 %vm189_vm5, %v9390_v35 }
0x1331   :  { %5481 = vmatmul.msk.f32.gmra.mxu0 %vm189_vm5, %v9397_v14  ;;  %v4167_v14 = vmul.f32 0.2, %v9594_v51 }
0x1339   :  { %5482 = vmatmul.msk.f32.gmra.mxu0 %vm189_vm5, %v9404_v2 }
0x136e   :  { %v4051_v41 = vpop.f32.mrf.mxu0 }
0x136f   :  { %v9701_v47 = vadd.f32 %v4051_v41, %v9575_v55 }
0x1376   :  { %v4054_v26 = vpop.f32.mrf.mxu0 }
0x1377   :  { %v9704_v62 = vadd.f32 %v4054_v26, %v9578_v17  ;;  %v4168_v17 = vmul.f32 0.2, %v9590_v38 }
0x137e   :  { %v4153_v48 = vpop.f32.mrf.mxu0 }
0x137f   :  { %v4154_v37 = vadd.f32 %v4153_v48, %v5899_v34 }
0x1381   :  { %v4169_v11 = vadd.f32 %v4165_v20, %v4154_v37 }
0x1383   :  { %v9738_v51 = vsel %vm4022_vm7, %v4154_v37, %v4169_v11  ;;  %vm4281_vm7 = vcmp.gt.f32.partialorder %v9676_v28, 0.5 }
0x1386   :  { %v4156_v44 = vpop.f32.mrf.mxu0 }
0x1387   :  { %v4157_v35 = vadd.f32 %v4156_v44, %v5891_v25 }
0x1389   :  { %v4170_v59 = vadd.f32 %v4166_v45, %v4157_v35 }
0x138b   :  { %v9728_v57 = vsel %vm4023_vm13, %v4157_v35, %v4170_v59  ;;  %vm4282_vm13 = vcmp.gt.f32.partialorder %v9684_v13, 0.5 }
0x138c   :  { %vm4178_vm6 = vcmp.gt.f32.partialorder %v9728_v57, 0.5  ;;  %v4321_v26 = vmul.f32 0.2, %v9728_v57 }
0x138e   :  { %v4159_v12 = vpop.f32.mrf.mxu0 }
0x138f   :  { %v4160_v50 = vadd.f32 %v4159_v12, %v5889_v24 }
0x1391   :  { %v4171_v55 = vadd.f32 %v4167_v14, %v4160_v50 }
0x1393   :  { %v9720_v10 = vsel %vm4024_vm12, %v4160_v50, %v4171_v55  ;;  %vm4279_vm12 = vcmp.gt.f32.partialorder %v9627_v21, 0.5 }
0x1394   :  { %vm4179_vm4 = vcmp.gt.f32.partialorder %v9720_v10, 0.5  ;;  %v4322_v41 = vmul.f32 0.2, %v9720_v10 }
0x1396   :  { %v4162_v2 = vpop.f32.mrf.mxu0 }
0x1397   :  { %v4163_v15 = vadd.f32 %v4162_v2, %v5880_v16 }
0x1399   :  { %v4172_v33 = vadd.f32 %v4168_v17, %v4163_v15 }
0x139b   :  { %v9716_v39 = vsel %vm4025_vm11, %v4163_v15, %v4172_v33  ;;  %vm4177_vm11 = vcmp.gt.f32.partialorder %v9738_v51, 0.5 }
0x139c   :  { %vm4180_vm3 = vcmp.gt.f32.partialorder %v9716_v39, 0.5  ;;  %v4323_v50 = vmul.f32 0.2, %v9716_v39 }
0x139d   :  { %5431 = vmatpush.msk.msra.mxu1 %vm4180_vm3, %v9875_v60 }
0x139e   :  { %v4410_v9 = vpop.f32.mrf.mxu0 }
0x139f   :  { %v4411_v38 = vadd.f32 %v4410_v9, %v5754_v56  ;;  %5432 = vmatpush.msk.msra.mxu1 %vm4179_vm4, %v9875_v60 }
0x13a1   :  { %v4426_v49 = vadd.f32 %v4422_v0, %v4411_v38  ;;  %5433 = vmatpush.msk.msra.mxu1 %vm4178_vm6, %v9875_v60 }
0x13a3   :  { %5434 = vmatpush.msk.msra.mxu1 %vm4177_vm11, %v9875_v60  ;;  %v9749_v56 = vsel %vm4279_vm12, %v4411_v38, %v4426_v49 }
0x13a4   :  { %5435 = vmatmul.msk.f32.vlgmr.msra.gmra.mxu1 %vm189_vm5, %v9754_v31 }
0x13a5   :  { %5453 = vmatpush.msk.msrb.mxu1 %vm4282_vm13, %v9875_v60 }
0x13a6   :  { %v4413_v21 = vpop.f32.mrf.mxu0 }
0x13a7   :  { %5454 = vmatpush.msk.msrb.mxu1 %vm4281_vm7, %v9875_v60  ;;  %v4414_v58 = vadd.f32 %v4413_v21, %v5746_v52 }
0x13a9   :  { %v4427_v61 = vadd.f32 %v4423_v5, %v4414_v58  ;;  %5455 = vmatpush.msk.msrb.mxu1 %vm4280_vm8, %v9875_v60 }
0x13ab   :  { %5456 = vmatpush.msk.msrb.mxu1 %vm4279_vm12, %v9875_v60  ;;  %v4431_v30 = vsel %vm4280_vm8, %v4414_v58, %v4427_v61 }
0x13ac   :  { %5436 = vmatmul.msk.f32.gmra.mxu1 %vm189_vm5, %v9774_v7  ;;  %vm4435_vm2 = vcmp.gt.f32.partialorder %v4431_v30, 0.5 }
0x13ae   :  { %v4416_v18 = vpop.f32.mrf.mxu0 }
0x13af   :  { %v4417_v52 = vadd.f32 %v4416_v18, %v5736_v46  ;;  %v4531_v18 = vpop.permute.xlu0 %4530 }
0x13b1   :  { %v4428_v1 = vadd.f32 %v4424_v27, %v4417_v52 }
0x13b3   :  { %v4432_v8 = vsel %vm4281_vm7, %v4417_v52, %v4428_v1  ;;  %vm4542_vm7 = vcmask 58368  }
0x13b4   :  { %5457 = vmatmul.msk.f32.vlgmr.msrb.gmra.mxu1 %vm189_vm5, %v9535_v4  ;;  %vm4436_vm1 = vcmp.gt.f32.partialorder %v4432_v8, 0.5 }
0x13b6   :  { %v4419_v22 = vpop.f32.mrf.mxu0 }
0x13b7   :  { %v4420_v29 = vadd.f32 %v4419_v22, %v5732_v42 }
0x13b9   :  { %v4429_v36 = vadd.f32 %v4425_v53, %v4420_v29 }
0x13bb   :  { %v4433_v19 = vsel %vm4282_vm13, %v4420_v29, %v4429_v36  ;;  %vm4540_vm13 = vcmask 64512  }
0x13bc   :  { %5458 = vmatmul.msk.f32.gmra.mxu1 %vm189_vm5, %v9548_v40  ;;  %vm4437_vm0 = vcmp.gt.f32.partialorder %v4433_v19, 0.5 }
0x13c4   :  { %5459 = vmatmul.msk.f32.gmra.mxu1 %vm189_vm5, %v9555_v54 }
0x13cc   :  { %5460 = vmatmul.msk.f32.gmra.mxu1 %vm189_vm5, %v9562_v63 }
0x1421   :  { %v4206_v46 = vpop.f32.mrf.mxu1 }
0x1422   :  { %v4212_v43 = vadd.f32 %v4206_v46, %v9701_v47 }
0x1429   :  { %v4209_v28 = vpop.f32.mrf.mxu1 }
0x142a   :  { %v4213_v42 = vadd.f32 %v4209_v28, %v9704_v62  ;;  %v4320_v62 = vmul.f32 0.2, %v9738_v51 }
0x1431   :  { %v4308_v3 = vpop.f32.mrf.mxu1 }
0x1432   :  { %v4309_v44 = vadd.f32 %v4308_v3, %v5899_v34 }
0x1434   :  { %v4324_v45 = vadd.f32 %v4320_v62, %v4309_v44 }
0x1436   :  { %v4328_v15 = vsel %vm4177_vm11, %v4309_v44, %v4324_v45 }
0x1437   :  { %vm4332_vm15 = vcmp.gt.f32.partialorder %v4328_v15, 0.5  ;;  %v4475_v49 = vmul.f32 0.2, %v4328_v15 }
0x1439   :  { %v4311_v32 = vpop.f32.mrf.mxu1 }
0x143a   :  { %v4312_v13 = vadd.f32 %v4311_v32, %v5891_v25 }
0x143c   :  { %v4325_v35 = vadd.f32 %v4321_v26, %v4312_v13 }
0x143e   :  { %v4329_v55 = vsel %vm4178_vm6, %v4312_v13, %v4325_v35 }
0x143f   :  { %vm4333_vm14 = vcmp.gt.f32.partialorder %v4329_v55, 0.5  ;;  %v4476_v38 = vmul.f32 0.2, %v4329_v55 }
0x1441   :  { %v4314_v23 = vpop.f32.mrf.mxu1 }
0x1442   :  { %v4315_v6 = vadd.f32 %v4314_v23, %v5889_v24 }
0x1444   :  { %v4326_v12 = vadd.f32 %v4322_v41, %v4315_v6 }
0x1446   :  { %v4330_v37 = vsel %vm4179_vm4, %v4315_v6, %v4326_v12 }
0x1447   :  { %vm4334_vm10 = vcmp.gt.f32.partialorder %v4330_v37, 0.5  ;;  %v4477_v9 = vmul.f32 0.2, %v4330_v37 }
0x1449   :  { %v4317_v48 = vpop.f32.mrf.mxu1 }
0x144a   :  { %v4318_v47 = vadd.f32 %v4317_v48, %v5880_v16 }
0x144c   :  { %v4327_v14 = vadd.f32 %v4323_v50, %v4318_v47 }
0x144e   :  { %v4331_v2 = vsel %vm4180_vm3, %v4318_v47, %v4327_v14  ;;  %vm4434_vm3 = vcmp.gt.f32.partialorder %v9749_v56, 0.5 }
0x144f   :  { %vm4335_vm9 = vcmp.gt.f32.partialorder %v4331_v2, 0.5 }
0x1450   :  { %5465 = vmatpush.msk.msra.mxu2 %vm4335_vm9, %v9875_v60 }
0x1452   :  { %5466 = vmatpush.msk.msra.mxu2 %vm4334_vm10, %v9875_v60 }
0x1454   :  { %5467 = vmatpush.msk.msra.mxu2 %vm4333_vm14, %v9875_v60 }
0x1456   :  { %5468 = vmatpush.msk.msra.mxu2 %vm4332_vm15, %v9875_v60 }
0x1457   :  { %5469 = vmatmul.msk.f32.vlgmr.msra.gmra.mxu2 %vm189_vm5, %v9754_v31 }
0x1458   :  { %5487 = vmatpush.msk.msrb.mxu2 %vm4437_vm0, %v9875_v60 }
0x145a   :  { %5488 = vmatpush.msk.msrb.mxu2 %vm4436_vm1, %v9875_v60 }
0x145c   :  { %5489 = vmatpush.msk.msrb.mxu2 %vm4435_vm2, %v9875_v60 }
0x145e   :  { %5490 = vmatpush.msk.msrb.mxu2 %vm4434_vm3, %v9875_v60 }
0x145f   :  { %5470 = vmatmul.msk.f32.gmra.mxu2 %vm189_vm5, %v9774_v7 }
0x1467   :  { %5491 = vmatmul.msk.f32.vlgmr.msrb.gmra.mxu2 %vm189_vm5, %v9535_v4 }
0x146f   :  { %5492 = vmatmul.msk.f32.gmra.mxu2 %vm189_vm5, %v9548_v40 }
0x1477   :  { %5493 = vmatmul.msk.f32.gmra.mxu2 %vm189_vm5, %v9555_v54 }
0x147f   :  { %5494 = vmatmul.msk.f32.gmra.mxu2 %vm189_vm5, %v9562_v63  ;;  %v4478_v63 = vmul.f32 0.2, %v4331_v2 }
0x14da   :  { %v4361_v17 = vpop.f32.mrf.mxu2 }
0x14db   :  { %v4367_v20 = vadd.f32 %v4361_v17, %v4212_v43 }
0x14e2   :  { %v4364_v59 = vpop.f32.mrf.mxu2 }
0x14e3   :  { %v4368_v33 = vadd.f32 %v4364_v59, %v4213_v42 }
0x14ea   :  { %v4463_v11 = vpop.f32.mrf.mxu2 }
0x14eb   :  { %v4464_v0 = vadd.f32 %v4463_v11, %v5899_v34 }
0x14ed   :  { %v4479_v58 = vadd.f32 %v4475_v49, %v4464_v0 }
0x14f2   :  { %v4466_v39 = vpop.f32.mrf.mxu2 }
0x14f3   :  { %v4467_v4 = vadd.f32 %v4466_v39, %v5891_v25  ;;  %v4483_v25 = vsel %vm4332_vm15, %v4464_v0, %v4479_v58 }
0x14f4   :  { %vm4487_vm12 = vcmp.gt.f32.partialorder %v4483_v25, 0.5 }
0x14f5   :  { %v4480_v56 = vadd.f32 %v4476_v38, %v4467_v4 }
0x14fa   :  { %v4469_v10 = vpop.f32.mrf.mxu2 }
0x14fb   :  { %v4470_v57 = vadd.f32 %v4469_v10, %v5889_v24  ;;  %v4484_v24 = vsel %vm4333_vm14, %v4467_v4, %v4480_v56 }
0x14fc   :  { %vm4488_vm11 = vcmp.gt.f32.partialorder %v4484_v24, 0.5 }
0x14fd   :  { %v4481_v54 = vadd.f32 %v4477_v9, %v4470_v57 }
0x14ff   :  { %v4485_v61 = vsel %vm4334_vm10, %v4470_v57, %v4481_v54 }
0x1500   :  { %vm4489_vm6 = vcmp.gt.f32.partialorder %v4485_v61, 0.5 }
0x1502   :  { %v4472_v40 = vpop.f32.mrf.mxu2 }
0x1503   :  { %v4473_v51 = vadd.f32 %v4472_v40, %v5880_v16 }
0x1505   :  { %v4482_v21 = vadd.f32 %v4478_v63, %v4473_v51 }
0x1507   :  { %v4486_v5 = vsel %vm4335_vm9, %v4473_v51, %v4482_v21 }
0x1508   :  { %vm4490_vm4 = vcmp.gt.f32.partialorder %v4486_v5, 0.5 }
0x1509   :  { %5499 = vmatpush.msk.msrb.mxu3 %vm4490_vm4, %v9875_v60 }
0x150b   :  { %5500 = vmatpush.msk.msrb.mxu3 %vm4489_vm6, %v9875_v60 }
0x150d   :  { %5501 = vmatpush.msk.msrb.mxu3 %vm4488_vm11, %v9875_v60 }
0x150f   :  { %5502 = vmatpush.msk.msrb.mxu3 %vm4487_vm12, %v9875_v60  ;;  %v4536_v60 = vpop.permute.xlu1 %4535 }
0x1510   :  { %5503 = vmatmul.msk.f32.vlgmr.msrb.gmra.mxu3 %vm189_vm5, %v9754_v31 }
0x1518   :  { %5504 = vmatmul.msk.f32.gmra.mxu3 %vm189_vm5, %v9774_v7 }
0x1593   :  { %v4516_v16 = vpop.f32.mrf.mxu3 }
0x1594   :  { %v4522_v34 = vadd.f32 %v4516_v16, %v4367_v20 }
0x1596   :  { %v4524_v30 = vmul.f32 0.035714287, %v4522_v34 }
0x1598   :  { %v4538_v52 = vadd.f32 %v4531_v18, %v4524_v30 }
0x159a   :  { %4541 = vst.msk [vmem:[%s9868_s9] sm:$0xff] %vm4540_vm13, %v4538_v52 }
0x159b   :  { %v4519_v27 = vpop.f32.mrf.mxu3 }
0x159c   :  { %v4523_v1 = vadd.f32 %v4519_v27, %v4368_v33 }
0x159e   :  { %v4525_v8 = vmul.f32 0.035714287, %v4523_v1 }
0x15a0   :  { %v4539_v22 = vadd.f32 %v4536_v60, %v4525_v8 }
0x15a2   :  { %4543 = vst.msk [vmem:[%s9868_s9 + $0x8] sm:$0x3] %vm4542_vm7, %v4539_v22 }

</bundles_post_ra>
